<compile_context>
chip_gen: v7x
topology: tpu7x:2x2x1
jax: 0.10.0
libtpu: 0.0.40
codegen_flags: <defaults>
</compile_context>

<pallas_src>
import jax
import jax.numpy as jnp
from jax.experimental import pallas as pl
from jax.experimental.pallas import tpu as pltpu

INPUT_DIM = 2
HIDDEN_DIM = 16
LATENT_DIM = 4

_SUB = 8                 # sublanes per vreg
_CHUNK_COLS = 256        # lane-columns per unrolled in-kernel chunk (2048 elems)
_MAX_TILE_COLS = 4096    # 32768 elements per grid step (~1 MiB in + 1 MiB out)
_SPLIT_COLS = 1024       # force >=2 grid steps (v7x megacore) above 2*this

# Flat packed-parameter layout (float32, lives in SMEM inside the kernel).
_W1_OFF = 0                                    # [16, 2] row-major
_B1_OFF = _W1_OFF + HIDDEN_DIM * INPUT_DIM     # 32
_W2_OFF = _B1_OFF + HIDDEN_DIM                 # 48, [4, 16]
_B2_OFF = _W2_OFF + LATENT_DIM * HIDDEN_DIM    # 112
_W3_OFF = _B2_OFF + LATENT_DIM                 # 116, [16, 4]
_B3_OFF = _W3_OFF + HIDDEN_DIM * LATENT_DIM    # 180
_W4_OFF = _B3_OFF + HIDDEN_DIM                 # 196, [2, 16]
_B4_OFF = _W4_OFF + INPUT_DIM * HIDDEN_DIM     # 228
_PACK_LEN = _B4_OFF + INPUT_DIM                # 230


def _cdiv(a, b):
    return -(-a // b)


def _round_up(a, b):
    return _cdiv(a, b) * b


def vae_kernel(x_ref, p_ref, o_ref):
    """x_ref/o_ref: [INPUT_DIM, 8, cols_tile] VMEM; p_ref: [230] f32 SMEM."""

    # --- Read every weight/bias once as an SMEM scalar (scalar slots, ~free).
    def wmat(off, out_dim, in_dim):
        return [[p_ref[off + o * in_dim + k] for k in range(in_dim)]
                for o in range(out_dim)]

    def bvec(off, out_dim):
        return [p_ref[off + o] for o in range(out_dim)]

    w1, b1 = wmat(_W1_OFF, HIDDEN_DIM, INPUT_DIM), bvec(_B1_OFF, HIDDEN_DIM)
    w2, b2 = wmat(_W2_OFF, LATENT_DIM, HIDDEN_DIM), bvec(_B2_OFF, LATENT_DIM)
    w3, b3 = wmat(_W3_OFF, HIDDEN_DIM, LATENT_DIM), bvec(_B3_OFF, HIDDEN_DIM)
    w4, b4 = wmat(_W4_OFF, INPUT_DIM, HIDDEN_DIM), bvec(_B4_OFF, INPUT_DIM)

    def layer(acts, w, b, relu):
        # acts: list of [8, _CHUNK_COLS] slabs (one per input feature).
        outs = []
        for o in range(len(w)):
            acc = acts[0] * w[o][0]
            for k in range(1, len(acts)):
                acc = acc + acts[k] * w[o][k]
            acc = acc + b[o]
            outs.append(jnp.maximum(acc, 0.0) if relu else acc)
        return outs

    cols_tile = x_ref.shape[-1]
    n_chunks = cols_tile // _CHUNK_COLS   # cols_tile is a multiple of _CHUNK_COLS

    for c in range(n_chunks):             # unrolled; static, 256-aligned slices
        sl = pl.ds(c * _CHUNK_COLS, _CHUNK_COLS)
        x = [x_ref[i, :, sl] for i in range(INPUT_DIM)]   # each [8, 256]
        h = layer(x, w1, b1, True)    # encoder Linear(2,16)  + ReLU
        z = layer(h, w2, b2, True)    # encoder Linear(16,4)  + ReLU
        d = layer(z, w3, b3, True)    # decoder Linear(4,16)  + ReLU
        y = layer(d, w4, b4, False)   # decoder Linear(16,2)
        for i in range(INPUT_DIM):
            o_ref[i, :, sl] = y[i]


def _choose_tiling(n):
    """Pick (grid_steps, cols_per_step) for a batch of n rows."""
    cols_needed = max(1, _cdiv(n, _SUB))
    if cols_needed <= _CHUNK_COLS:
        return 1, _CHUNK_COLS
    steps = _cdiv(cols_needed, _MAX_TILE_COLS)
    if steps < 2 and cols_needed >= 2 * _SPLIT_COLS:
        steps = 2                      # use both TensorCores on v7x
    cols_tile = _round_up(_cdiv(cols_needed, steps), _CHUNK_COLS)
    return steps, cols_tile


def vae_forward(x, packed_params):
    """x: [N, INPUT_DIM] float32.  packed_params: [230] float32."""
    n, d_in = x.shape
    assert d_in == INPUT_DIM

    steps, cols_tile = _choose_tiling(n)
    cols_total = steps * cols_tile
    n_pad = cols_total * _SUB

    # [N, 2] -> [2, 8, cols_total].  jnp.pad fuses under jit (no copy-in-place).
    x3 = jnp.pad(x.T, ((0, 0), (0, n_pad - n))).reshape(INPUT_DIM, _SUB, cols_total)

    out3 = pl.pallas_call(
        vae_kernel,
        out_shape=jax.ShapeDtypeStruct((INPUT_DIM, _SUB, cols_total), jnp.float32),
        grid=(steps,),
        in_specs=[
            pl.BlockSpec((INPUT_DIM, _SUB, cols_tile), lambda i: (0, 0, i)),
            pl.BlockSpec(memory_space=pltpu.MemorySpace.SMEM),   # packed params
        ],
        out_specs=pl.BlockSpec((INPUT_DIM, _SUB, cols_tile), lambda i: (0, 0, i)),
        compiler_params=pltpu.CompilerParams(dimension_semantics=("parallel",)),
    )(x3, packed_params)

    return out3.reshape(INPUT_DIM, n_pad)[:, :n].T


def init_params(key):
    """PyTorch-style init: W ~ U(-1/sqrt(fan_in), ..), stored as [out, in]."""
    def linear(key, fan_in, fan_out):
        kw, kb = jax.random.split(key)
        bound = 1.0 / (fan_in ** 0.5)
        w = jax.random.uniform(kw, (fan_out, fan_in), jnp.float32, -bound, bound)
        b = jax.random.uniform(kb, (fan_out,), jnp.float32, -bound, bound)
        return w, b

    k1, k2, k3, k4 = jax.random.split(key, 4)
    w1, b1 = linear(k1, INPUT_DIM, HIDDEN_DIM)
    w2, b2 = linear(k2, HIDDEN_DIM, LATENT_DIM)
    w3, b3 = linear(k3, LATENT_DIM, HIDDEN_DIM)
    w4, b4 = linear(k4, HIDDEN_DIM, INPUT_DIM)
    return dict(w1=w1, b1=b1, w2=w2, b2=b2, w3=w3, b3=b3, w4=w4, b4=b4)


def pack_params(p):
    """Flatten all weights/biases into one f32[230] vector (SMEM operand)."""
    flat = jnp.concatenate([
        p["w1"].reshape(-1), p["b1"],
        p["w2"].reshape(-1), p["b2"],
        p["w3"].reshape(-1), p["b3"],
        p["w4"].reshape(-1), p["b4"],
    ]).astype(jnp.float32)
    assert flat.shape[0] == _PACK_LEN
    return flat


def vae_forward_ref(x, p):
    h = jnp.maximum(x @ p["w1"].T + p["b1"], 0.0)
    z = jnp.maximum(h @ p["w2"].T + p["b2"], 0.0)
    d = jnp.maximum(z @ p["w3"].T + p["b3"], 0.0)
    return d @ p["w4"].T + p["b4"]


if __name__ == "__main__":
    key = jax.random.PRNGKey(0)
    kx, kp = jax.random.split(key)

    params = init_params(kp)
    packed = pack_params(params)
    fwd = jax.jit(vae_forward)

    # Small deterministic batch (stand-in for scaled transactions): 256 x 2.
    x = jax.random.normal(kx, (256, INPUT_DIM), dtype=jnp.float32)
    out = jax.block_until_ready(fwd(x, packed))
    ref = vae_forward_ref(x, params)
    assert out.shape == (256, INPUT_DIM)
    assert jnp.allclose(out, ref, atol=1e-5, rtol=1e-5), "mismatch vs JAX reference"

    # Also exercise the multi-grid-step + padded-tail path (N not a multiple of 8).
    x2 = jax.random.normal(jax.random.PRNGKey(1), (16389, INPUT_DIM), dtype=jnp.float32)
    out2 = jax.block_until_ready(fwd(x2, packed))
    ref2 = vae_forward_ref(x2, params)
    assert out2.shape == (16389, INPUT_DIM)
    assert jnp.allclose(out2, ref2, atol=1e-5, rtol=1e-5), "mismatch (multi-step path)"

    print("KERNEL_OK")
</pallas_src>

<mosaic_0001>
module attributes {stable_mosaic.version = 11 : i64} {
  func.func @vae_kernel(%arg0: i32, %arg1: memref<2x8x256xf32, #tpu.memory_space<vmem>>, %arg2: memref<230xf32, #tpu.memory_space<smem>>, %arg3: memref<2x8x256xf32, #tpu.memory_space<vmem>>) attributes {dimension_semantics = [#tpu.dimension_semantics<parallel>], iteration_bounds = array<i64: 1>, scalar_prefetch = 0 : i64, scratch_operands = 0 : i64, tpu.core_type = #tpu.core_type<tc>, window_params = [{transform_indices = @transform_0, window_bounds = array<i64: 2, 8, 256>}, {transform_indices = @transform_1, window_bounds = array<i64: 230>}, {transform_indices = @transform_2, window_bounds = array<i64: 2, 8, 256>}]} {
    %c0 = arith.constant 0 : index
    %0 = memref.load %arg2[%c0] : memref<230xf32, #tpu.memory_space<smem>>
    %c1 = arith.constant 1 : index
    %1 = memref.load %arg2[%c1] : memref<230xf32, #tpu.memory_space<smem>>
    %c2 = arith.constant 2 : index
    %2 = memref.load %arg2[%c2] : memref<230xf32, #tpu.memory_space<smem>>
    %c3 = arith.constant 3 : index
    %3 = memref.load %arg2[%c3] : memref<230xf32, #tpu.memory_space<smem>>
    %c4 = arith.constant 4 : index
    %4 = memref.load %arg2[%c4] : memref<230xf32, #tpu.memory_space<smem>>
    %c5 = arith.constant 5 : index
    %5 = memref.load %arg2[%c5] : memref<230xf32, #tpu.memory_space<smem>>
    %c6 = arith.constant 6 : index
    %6 = memref.load %arg2[%c6] : memref<230xf32, #tpu.memory_space<smem>>
    %c7 = arith.constant 7 : index
    %7 = memref.load %arg2[%c7] : memref<230xf32, #tpu.memory_space<smem>>
    %c8 = arith.constant 8 : index
    %8 = memref.load %arg2[%c8] : memref<230xf32, #tpu.memory_space<smem>>
    %c9 = arith.constant 9 : index
    %9 = memref.load %arg2[%c9] : memref<230xf32, #tpu.memory_space<smem>>
    %c10 = arith.constant 10 : index
    %10 = memref.load %arg2[%c10] : memref<230xf32, #tpu.memory_space<smem>>
    %c11 = arith.constant 11 : index
    %11 = memref.load %arg2[%c11] : memref<230xf32, #tpu.memory_space<smem>>
    %c12 = arith.constant 12 : index
    %12 = memref.load %arg2[%c12] : memref<230xf32, #tpu.memory_space<smem>>
    %c13 = arith.constant 13 : index
    %13 = memref.load %arg2[%c13] : memref<230xf32, #tpu.memory_space<smem>>
    %c14 = arith.constant 14 : index
    %14 = memref.load %arg2[%c14] : memref<230xf32, #tpu.memory_space<smem>>
    %c15 = arith.constant 15 : index
    %15 = memref.load %arg2[%c15] : memref<230xf32, #tpu.memory_space<smem>>
    %c16 = arith.constant 16 : index
    %16 = memref.load %arg2[%c16] : memref<230xf32, #tpu.memory_space<smem>>
    %c17 = arith.constant 17 : index
    %17 = memref.load %arg2[%c17] : memref<230xf32, #tpu.memory_space<smem>>
    %c18 = arith.constant 18 : index
    %18 = memref.load %arg2[%c18] : memref<230xf32, #tpu.memory_space<smem>>
    %c19 = arith.constant 19 : index
    %19 = memref.load %arg2[%c19] : memref<230xf32, #tpu.memory_space<smem>>
    %c20 = arith.constant 20 : index
    %20 = memref.load %arg2[%c20] : memref<230xf32, #tpu.memory_space<smem>>
    %c21 = arith.constant 21 : index
    %21 = memref.load %arg2[%c21] : memref<230xf32, #tpu.memory_space<smem>>
    %c22 = arith.constant 22 : index
    %22 = memref.load %arg2[%c22] : memref<230xf32, #tpu.memory_space<smem>>
    %c23 = arith.constant 23 : index
    %23 = memref.load %arg2[%c23] : memref<230xf32, #tpu.memory_space<smem>>
    %c24 = arith.constant 24 : index
    %24 = memref.load %arg2[%c24] : memref<230xf32, #tpu.memory_space<smem>>
    %c25 = arith.constant 25 : index
    %25 = memref.load %arg2[%c25] : memref<230xf32, #tpu.memory_space<smem>>
    %c26 = arith.constant 26 : index
    %26 = memref.load %arg2[%c26] : memref<230xf32, #tpu.memory_space<smem>>
    %c27 = arith.constant 27 : index
    %27 = memref.load %arg2[%c27] : memref<230xf32, #tpu.memory_space<smem>>
    %c28 = arith.constant 28 : index
    %28 = memref.load %arg2[%c28] : memref<230xf32, #tpu.memory_space<smem>>
    %c29 = arith.constant 29 : index
    %29 = memref.load %arg2[%c29] : memref<230xf32, #tpu.memory_space<smem>>
    %c30 = arith.constant 30 : index
    %30 = memref.load %arg2[%c30] : memref<230xf32, #tpu.memory_space<smem>>
    %c31 = arith.constant 31 : index
    %31 = memref.load %arg2[%c31] : memref<230xf32, #tpu.memory_space<smem>>
    %c32 = arith.constant 32 : index
    %32 = memref.load %arg2[%c32] : memref<230xf32, #tpu.memory_space<smem>>
    %c33 = arith.constant 33 : index
    %33 = memref.load %arg2[%c33] : memref<230xf32, #tpu.memory_space<smem>>
    %c34 = arith.constant 34 : index
    %34 = memref.load %arg2[%c34] : memref<230xf32, #tpu.memory_space<smem>>
    %c35 = arith.constant 35 : index
    %35 = memref.load %arg2[%c35] : memref<230xf32, #tpu.memory_space<smem>>
    %c36 = arith.constant 36 : index
    %36 = memref.load %arg2[%c36] : memref<230xf32, #tpu.memory_space<smem>>
    %c37 = arith.constant 37 : index
    %37 = memref.load %arg2[%c37] : memref<230xf32, #tpu.memory_space<smem>>
    %c38 = arith.constant 38 : index
    %38 = memref.load %arg2[%c38] : memref<230xf32, #tpu.memory_space<smem>>
    %c39 = arith.constant 39 : index
    %39 = memref.load %arg2[%c39] : memref<230xf32, #tpu.memory_space<smem>>
    %c40 = arith.constant 40 : index
    %40 = memref.load %arg2[%c40] : memref<230xf32, #tpu.memory_space<smem>>
    %c41 = arith.constant 41 : index
    %41 = memref.load %arg2[%c41] : memref<230xf32, #tpu.memory_space<smem>>
    %c42 = arith.constant 42 : index
    %42 = memref.load %arg2[%c42] : memref<230xf32, #tpu.memory_space<smem>>
    %c43 = arith.constant 43 : index
    %43 = memref.load %arg2[%c43] : memref<230xf32, #tpu.memory_space<smem>>
    %c44 = arith.constant 44 : index
    %44 = memref.load %arg2[%c44] : memref<230xf32, #tpu.memory_space<smem>>
    %c45 = arith.constant 45 : index
    %45 = memref.load %arg2[%c45] : memref<230xf32, #tpu.memory_space<smem>>
    %c46 = arith.constant 46 : index
    %46 = memref.load %arg2[%c46] : memref<230xf32, #tpu.memory_space<smem>>
    %c47 = arith.constant 47 : index
    %47 = memref.load %arg2[%c47] : memref<230xf32, #tpu.memory_space<smem>>
    %c48 = arith.constant 48 : index
    %48 = memref.load %arg2[%c48] : memref<230xf32, #tpu.memory_space<smem>>
    %c49 = arith.constant 49 : index
    %49 = memref.load %arg2[%c49] : memref<230xf32, #tpu.memory_space<smem>>
    %c50 = arith.constant 50 : index
    %50 = memref.load %arg2[%c50] : memref<230xf32, #tpu.memory_space<smem>>
    %c51 = arith.constant 51 : index
    %51 = memref.load %arg2[%c51] : memref<230xf32, #tpu.memory_space<smem>>
    %c52 = arith.constant 52 : index
    %52 = memref.load %arg2[%c52] : memref<230xf32, #tpu.memory_space<smem>>
    %c53 = arith.constant 53 : index
    %53 = memref.load %arg2[%c53] : memref<230xf32, #tpu.memory_space<smem>>
    %c54 = arith.constant 54 : index
    %54 = memref.load %arg2[%c54] : memref<230xf32, #tpu.memory_space<smem>>
    %c55 = arith.constant 55 : index
    %55 = memref.load %arg2[%c55] : memref<230xf32, #tpu.memory_space<smem>>
    %c56 = arith.constant 56 : index
    %56 = memref.load %arg2[%c56] : memref<230xf32, #tpu.memory_space<smem>>
    %c57 = arith.constant 57 : index
    %57 = memref.load %arg2[%c57] : memref<230xf32, #tpu.memory_space<smem>>
    %c58 = arith.constant 58 : index
    %58 = memref.load %arg2[%c58] : memref<230xf32, #tpu.memory_space<smem>>
    %c59 = arith.constant 59 : index
    %59 = memref.load %arg2[%c59] : memref<230xf32, #tpu.memory_space<smem>>
    %c60 = arith.constant 60 : index
    %60 = memref.load %arg2[%c60] : memref<230xf32, #tpu.memory_space<smem>>
    %c61 = arith.constant 61 : index
    %61 = memref.load %arg2[%c61] : memref<230xf32, #tpu.memory_space<smem>>
    %c62 = arith.constant 62 : index
    %62 = memref.load %arg2[%c62] : memref<230xf32, #tpu.memory_space<smem>>
    %c63 = arith.constant 63 : index
    %63 = memref.load %arg2[%c63] : memref<230xf32, #tpu.memory_space<smem>>
    %c64 = arith.constant 64 : index
    %64 = memref.load %arg2[%c64] : memref<230xf32, #tpu.memory_space<smem>>
    %c65 = arith.constant 65 : index
    %65 = memref.load %arg2[%c65] : memref<230xf32, #tpu.memory_space<smem>>
    %c66 = arith.constant 66 : index
    %66 = memref.load %arg2[%c66] : memref<230xf32, #tpu.memory_space<smem>>
    %c67 = arith.constant 67 : index
    %67 = memref.load %arg2[%c67] : memref<230xf32, #tpu.memory_space<smem>>
    %c68 = arith.constant 68 : index
    %68 = memref.load %arg2[%c68] : memref<230xf32, #tpu.memory_space<smem>>
    %c69 = arith.constant 69 : index
    %69 = memref.load %arg2[%c69] : memref<230xf32, #tpu.memory_space<smem>>
    %c70 = arith.constant 70 : index
    %70 = memref.load %arg2[%c70] : memref<230xf32, #tpu.memory_space<smem>>
    %c71 = arith.constant 71 : index
    %71 = memref.load %arg2[%c71] : memref<230xf32, #tpu.memory_space<smem>>
    %c72 = arith.constant 72 : index
    %72 = memref.load %arg2[%c72] : memref<230xf32, #tpu.memory_space<smem>>
    %c73 = arith.constant 73 : index
    %73 = memref.load %arg2[%c73] : memref<230xf32, #tpu.memory_space<smem>>
    %c74 = arith.constant 74 : index
    %74 = memref.load %arg2[%c74] : memref<230xf32, #tpu.memory_space<smem>>
    %c75 = arith.constant 75 : index
    %75 = memref.load %arg2[%c75] : memref<230xf32, #tpu.memory_space<smem>>
    %c76 = arith.constant 76 : index
    %76 = memref.load %arg2[%c76] : memref<230xf32, #tpu.memory_space<smem>>
    %c77 = arith.constant 77 : index
    %77 = memref.load %arg2[%c77] : memref<230xf32, #tpu.memory_space<smem>>
    %c78 = arith.constant 78 : index
    %78 = memref.load %arg2[%c78] : memref<230xf32, #tpu.memory_space<smem>>
    %c79 = arith.constant 79 : index
    %79 = memref.load %arg2[%c79] : memref<230xf32, #tpu.memory_space<smem>>
    %c80 = arith.constant 80 : index
    %80 = memref.load %arg2[%c80] : memref<230xf32, #tpu.memory_space<smem>>
    %c81 = arith.constant 81 : index
    %81 = memref.load %arg2[%c81] : memref<230xf32, #tpu.memory_space<smem>>
    %c82 = arith.constant 82 : index
    %82 = memref.load %arg2[%c82] : memref<230xf32, #tpu.memory_space<smem>>
    %c83 = arith.constant 83 : index
    %83 = memref.load %arg2[%c83] : memref<230xf32, #tpu.memory_space<smem>>
    %c84 = arith.constant 84 : index
    %84 = memref.load %arg2[%c84] : memref<230xf32, #tpu.memory_space<smem>>
    %c85 = arith.constant 85 : index
    %85 = memref.load %arg2[%c85] : memref<230xf32, #tpu.memory_space<smem>>
    %c86 = arith.constant 86 : index
    %86 = memref.load %arg2[%c86] : memref<230xf32, #tpu.memory_space<smem>>
    %c87 = arith.constant 87 : index
    %87 = memref.load %arg2[%c87] : memref<230xf32, #tpu.memory_space<smem>>
    %c88 = arith.constant 88 : index
    %88 = memref.load %arg2[%c88] : memref<230xf32, #tpu.memory_space<smem>>
    %c89 = arith.constant 89 : index
    %89 = memref.load %arg2[%c89] : memref<230xf32, #tpu.memory_space<smem>>
    %c90 = arith.constant 90 : index
    %90 = memref.load %arg2[%c90] : memref<230xf32, #tpu.memory_space<smem>>
    %c91 = arith.constant 91 : index
    %91 = memref.load %arg2[%c91] : memref<230xf32, #tpu.memory_space<smem>>
    %c92 = arith.constant 92 : index
    %92 = memref.load %arg2[%c92] : memref<230xf32, #tpu.memory_space<smem>>
    %c93 = arith.constant 93 : index
    %93 = memref.load %arg2[%c93] : memref<230xf32, #tpu.memory_space<smem>>
    %c94 = arith.constant 94 : index
    %94 = memref.load %arg2[%c94] : memref<230xf32, #tpu.memory_space<smem>>
    %c95 = arith.constant 95 : index
    %95 = memref.load %arg2[%c95] : memref<230xf32, #tpu.memory_space<smem>>
    %c96 = arith.constant 96 : index
    %96 = memref.load %arg2[%c96] : memref<230xf32, #tpu.memory_space<smem>>
    %c97 = arith.constant 97 : index
    %97 = memref.load %arg2[%c97] : memref<230xf32, #tpu.memory_space<smem>>
    %c98 = arith.constant 98 : index
    %98 = memref.load %arg2[%c98] : memref<230xf32, #tpu.memory_space<smem>>
    %c99 = arith.constant 99 : index
    %99 = memref.load %arg2[%c99] : memref<230xf32, #tpu.memory_space<smem>>
    %c100 = arith.constant 100 : index
    %100 = memref.load %arg2[%c100] : memref<230xf32, #tpu.memory_space<smem>>
    %c101 = arith.constant 101 : index
    %101 = memref.load %arg2[%c101] : memref<230xf32, #tpu.memory_space<smem>>
    %c102 = arith.constant 102 : index
    %102 = memref.load %arg2[%c102] : memref<230xf32, #tpu.memory_space<smem>>
    %c103 = arith.constant 103 : index
    %103 = memref.load %arg2[%c103] : memref<230xf32, #tpu.memory_space<smem>>
    %c104 = arith.constant 104 : index
    %104 = memref.load %arg2[%c104] : memref<230xf32, #tpu.memory_space<smem>>
    %c105 = arith.constant 105 : index
    %105 = memref.load %arg2[%c105] : memref<230xf32, #tpu.memory_space<smem>>
    %c106 = arith.constant 106 : index
    %106 = memref.load %arg2[%c106] : memref<230xf32, #tpu.memory_space<smem>>
    %c107 = arith.constant 107 : index
    %107 = memref.load %arg2[%c107] : memref<230xf32, #tpu.memory_space<smem>>
    %c108 = arith.constant 108 : index
    %108 = memref.load %arg2[%c108] : memref<230xf32, #tpu.memory_space<smem>>
    %c109 = arith.constant 109 : index
    %109 = memref.load %arg2[%c109] : memref<230xf32, #tpu.memory_space<smem>>
    %c110 = arith.constant 110 : index
    %110 = memref.load %arg2[%c110] : memref<230xf32, #tpu.memory_space<smem>>
    %c111 = arith.constant 111 : index
    %111 = memref.load %arg2[%c111] : memref<230xf32, #tpu.memory_space<smem>>
    %c112 = arith.constant 112 : index
    %112 = memref.load %arg2[%c112] : memref<230xf32, #tpu.memory_space<smem>>
    %c113 = arith.constant 113 : index
    %113 = memref.load %arg2[%c113] : memref<230xf32, #tpu.memory_space<smem>>
    %c114 = arith.constant 114 : index
    %114 = memref.load %arg2[%c114] : memref<230xf32, #tpu.memory_space<smem>>
    %c115 = arith.constant 115 : index
    %115 = memref.load %arg2[%c115] : memref<230xf32, #tpu.memory_space<smem>>
    %c116 = arith.constant 116 : index
    %116 = memref.load %arg2[%c116] : memref<230xf32, #tpu.memory_space<smem>>
    %c117 = arith.constant 117 : index
    %117 = memref.load %arg2[%c117] : memref<230xf32, #tpu.memory_space<smem>>
    %c118 = arith.constant 118 : index
    %118 = memref.load %arg2[%c118] : memref<230xf32, #tpu.memory_space<smem>>
    %c119 = arith.constant 119 : index
    %119 = memref.load %arg2[%c119] : memref<230xf32, #tpu.memory_space<smem>>
    %c120 = arith.constant 120 : index
    %120 = memref.load %arg2[%c120] : memref<230xf32, #tpu.memory_space<smem>>
    %c121 = arith.constant 121 : index
    %121 = memref.load %arg2[%c121] : memref<230xf32, #tpu.memory_space<smem>>
    %c122 = arith.constant 122 : index
    %122 = memref.load %arg2[%c122] : memref<230xf32, #tpu.memory_space<smem>>
    %c123 = arith.constant 123 : index
    %123 = memref.load %arg2[%c123] : memref<230xf32, #tpu.memory_space<smem>>
    %c124 = arith.constant 124 : index
    %124 = memref.load %arg2[%c124] : memref<230xf32, #tpu.memory_space<smem>>
    %c125 = arith.constant 125 : index
    %125 = memref.load %arg2[%c125] : memref<230xf32, #tpu.memory_space<smem>>
    %c126 = arith.constant 126 : index
    %126 = memref.load %arg2[%c126] : memref<230xf32, #tpu.memory_space<smem>>
    %c127 = arith.constant 127 : index
    %127 = memref.load %arg2[%c127] : memref<230xf32, #tpu.memory_space<smem>>
    %c128 = arith.constant 128 : index
    %128 = memref.load %arg2[%c128] : memref<230xf32, #tpu.memory_space<smem>>
    %c129 = arith.constant 129 : index
    %129 = memref.load %arg2[%c129] : memref<230xf32, #tpu.memory_space<smem>>
    %c130 = arith.constant 130 : index
    %130 = memref.load %arg2[%c130] : memref<230xf32, #tpu.memory_space<smem>>
    %c131 = arith.constant 131 : index
    %131 = memref.load %arg2[%c131] : memref<230xf32, #tpu.memory_space<smem>>
    %c132 = arith.constant 132 : index
    %132 = memref.load %arg2[%c132] : memref<230xf32, #tpu.memory_space<smem>>
    %c133 = arith.constant 133 : index
    %133 = memref.load %arg2[%c133] : memref<230xf32, #tpu.memory_space<smem>>
    %c134 = arith.constant 134 : index
    %134 = memref.load %arg2[%c134] : memref<230xf32, #tpu.memory_space<smem>>
    %c135 = arith.constant 135 : index
    %135 = memref.load %arg2[%c135] : memref<230xf32, #tpu.memory_space<smem>>
    %c136 = arith.constant 136 : index
    %136 = memref.load %arg2[%c136] : memref<230xf32, #tpu.memory_space<smem>>
    %c137 = arith.constant 137 : index
    %137 = memref.load %arg2[%c137] : memref<230xf32, #tpu.memory_space<smem>>
    %c138 = arith.constant 138 : index
    %138 = memref.load %arg2[%c138] : memref<230xf32, #tpu.memory_space<smem>>
    %c139 = arith.constant 139 : index
    %139 = memref.load %arg2[%c139] : memref<230xf32, #tpu.memory_space<smem>>
    %c140 = arith.constant 140 : index
    %140 = memref.load %arg2[%c140] : memref<230xf32, #tpu.memory_space<smem>>
    %c141 = arith.constant 141 : index
    %141 = memref.load %arg2[%c141] : memref<230xf32, #tpu.memory_space<smem>>
    %c142 = arith.constant 142 : index
    %142 = memref.load %arg2[%c142] : memref<230xf32, #tpu.memory_space<smem>>
    %c143 = arith.constant 143 : index
    %143 = memref.load %arg2[%c143] : memref<230xf32, #tpu.memory_space<smem>>
    %c144 = arith.constant 144 : index
    %144 = memref.load %arg2[%c144] : memref<230xf32, #tpu.memory_space<smem>>
    %c145 = arith.constant 145 : index
    %145 = memref.load %arg2[%c145] : memref<230xf32, #tpu.memory_space<smem>>
    %c146 = arith.constant 146 : index
    %146 = memref.load %arg2[%c146] : memref<230xf32, #tpu.memory_space<smem>>
    %c147 = arith.constant 147 : index
    %147 = memref.load %arg2[%c147] : memref<230xf32, #tpu.memory_space<smem>>
    %c148 = arith.constant 148 : index
    %148 = memref.load %arg2[%c148] : memref<230xf32, #tpu.memory_space<smem>>
    %c149 = arith.constant 149 : index
    %149 = memref.load %arg2[%c149] : memref<230xf32, #tpu.memory_space<smem>>
    %c150 = arith.constant 150 : index
    %150 = memref.load %arg2[%c150] : memref<230xf32, #tpu.memory_space<smem>>
    %c151 = arith.constant 151 : index
    %151 = memref.load %arg2[%c151] : memref<230xf32, #tpu.memory_space<smem>>
    %c152 = arith.constant 152 : index
    %152 = memref.load %arg2[%c152] : memref<230xf32, #tpu.memory_space<smem>>
    %c153 = arith.constant 153 : index
    %153 = memref.load %arg2[%c153] : memref<230xf32, #tpu.memory_space<smem>>
    %c154 = arith.constant 154 : index
    %154 = memref.load %arg2[%c154] : memref<230xf32, #tpu.memory_space<smem>>
    %c155 = arith.constant 155 : index
    %155 = memref.load %arg2[%c155] : memref<230xf32, #tpu.memory_space<smem>>
    %c156 = arith.constant 156 : index
    %156 = memref.load %arg2[%c156] : memref<230xf32, #tpu.memory_space<smem>>
    %c157 = arith.constant 157 : index
    %157 = memref.load %arg2[%c157] : memref<230xf32, #tpu.memory_space<smem>>
    %c158 = arith.constant 158 : index
    %158 = memref.load %arg2[%c158] : memref<230xf32, #tpu.memory_space<smem>>
    %c159 = arith.constant 159 : index
    %159 = memref.load %arg2[%c159] : memref<230xf32, #tpu.memory_space<smem>>
    %c160 = arith.constant 160 : index
    %160 = memref.load %arg2[%c160] : memref<230xf32, #tpu.memory_space<smem>>
    %c161 = arith.constant 161 : index
    %161 = memref.load %arg2[%c161] : memref<230xf32, #tpu.memory_space<smem>>
    %c162 = arith.constant 162 : index
    %162 = memref.load %arg2[%c162] : memref<230xf32, #tpu.memory_space<smem>>
    %c163 = arith.constant 163 : index
    %163 = memref.load %arg2[%c163] : memref<230xf32, #tpu.memory_space<smem>>
    %c164 = arith.constant 164 : index
    %164 = memref.load %arg2[%c164] : memref<230xf32, #tpu.memory_space<smem>>
    %c165 = arith.constant 165 : index
    %165 = memref.load %arg2[%c165] : memref<230xf32, #tpu.memory_space<smem>>
    %c166 = arith.constant 166 : index
    %166 = memref.load %arg2[%c166] : memref<230xf32, #tpu.memory_space<smem>>
    %c167 = arith.constant 167 : index
    %167 = memref.load %arg2[%c167] : memref<230xf32, #tpu.memory_space<smem>>
    %c168 = arith.constant 168 : index
    %168 = memref.load %arg2[%c168] : memref<230xf32, #tpu.memory_space<smem>>
    %c169 = arith.constant 169 : index
    %169 = memref.load %arg2[%c169] : memref<230xf32, #tpu.memory_space<smem>>
    %c170 = arith.constant 170 : index
    %170 = memref.load %arg2[%c170] : memref<230xf32, #tpu.memory_space<smem>>
    %c171 = arith.constant 171 : index
    %171 = memref.load %arg2[%c171] : memref<230xf32, #tpu.memory_space<smem>>
    %c172 = arith.constant 172 : index
    %172 = memref.load %arg2[%c172] : memref<230xf32, #tpu.memory_space<smem>>
    %c173 = arith.constant 173 : index
    %173 = memref.load %arg2[%c173] : memref<230xf32, #tpu.memory_space<smem>>
    %c174 = arith.constant 174 : index
    %174 = memref.load %arg2[%c174] : memref<230xf32, #tpu.memory_space<smem>>
    %c175 = arith.constant 175 : index
    %175 = memref.load %arg2[%c175] : memref<230xf32, #tpu.memory_space<smem>>
    %c176 = arith.constant 176 : index
    %176 = memref.load %arg2[%c176] : memref<230xf32, #tpu.memory_space<smem>>
    %c177 = arith.constant 177 : index
    %177 = memref.load %arg2[%c177] : memref<230xf32, #tpu.memory_space<smem>>
    %c178 = arith.constant 178 : index
    %178 = memref.load %arg2[%c178] : memref<230xf32, #tpu.memory_space<smem>>
    %c179 = arith.constant 179 : index
    %179 = memref.load %arg2[%c179] : memref<230xf32, #tpu.memory_space<smem>>
    %c180 = arith.constant 180 : index
    %180 = memref.load %arg2[%c180] : memref<230xf32, #tpu.memory_space<smem>>
    %c181 = arith.constant 181 : index
    %181 = memref.load %arg2[%c181] : memref<230xf32, #tpu.memory_space<smem>>
    %c182 = arith.constant 182 : index
    %182 = memref.load %arg2[%c182] : memref<230xf32, #tpu.memory_space<smem>>
    %c183 = arith.constant 183 : index
    %183 = memref.load %arg2[%c183] : memref<230xf32, #tpu.memory_space<smem>>
    %c184 = arith.constant 184 : index
    %184 = memref.load %arg2[%c184] : memref<230xf32, #tpu.memory_space<smem>>
    %c185 = arith.constant 185 : index
    %185 = memref.load %arg2[%c185] : memref<230xf32, #tpu.memory_space<smem>>
    %c186 = arith.constant 186 : index
    %186 = memref.load %arg2[%c186] : memref<230xf32, #tpu.memory_space<smem>>
    %c187 = arith.constant 187 : index
    %187 = memref.load %arg2[%c187] : memref<230xf32, #tpu.memory_space<smem>>
    %c188 = arith.constant 188 : index
    %188 = memref.load %arg2[%c188] : memref<230xf32, #tpu.memory_space<smem>>
    %c189 = arith.constant 189 : index
    %189 = memref.load %arg2[%c189] : memref<230xf32, #tpu.memory_space<smem>>
    %c190 = arith.constant 190 : index
    %190 = memref.load %arg2[%c190] : memref<230xf32, #tpu.memory_space<smem>>
    %c191 = arith.constant 191 : index
    %191 = memref.load %arg2[%c191] : memref<230xf32, #tpu.memory_space<smem>>
    %c192 = arith.constant 192 : index
    %192 = memref.load %arg2[%c192] : memref<230xf32, #tpu.memory_space<smem>>
    %c193 = arith.constant 193 : index
    %193 = memref.load %arg2[%c193] : memref<230xf32, #tpu.memory_space<smem>>
    %c194 = arith.constant 194 : index
    %194 = memref.load %arg2[%c194] : memref<230xf32, #tpu.memory_space<smem>>
    %c195 = arith.constant 195 : index
    %195 = memref.load %arg2[%c195] : memref<230xf32, #tpu.memory_space<smem>>
    %c196 = arith.constant 196 : index
    %196 = memref.load %arg2[%c196] : memref<230xf32, #tpu.memory_space<smem>>
    %c197 = arith.constant 197 : index
    %197 = memref.load %arg2[%c197] : memref<230xf32, #tpu.memory_space<smem>>
    %c198 = arith.constant 198 : index
    %198 = memref.load %arg2[%c198] : memref<230xf32, #tpu.memory_space<smem>>
    %c199 = arith.constant 199 : index
    %199 = memref.load %arg2[%c199] : memref<230xf32, #tpu.memory_space<smem>>
    %c200 = arith.constant 200 : index
    %200 = memref.load %arg2[%c200] : memref<230xf32, #tpu.memory_space<smem>>
    %c201 = arith.constant 201 : index
    %201 = memref.load %arg2[%c201] : memref<230xf32, #tpu.memory_space<smem>>
    %c202 = arith.constant 202 : index
    %202 = memref.load %arg2[%c202] : memref<230xf32, #tpu.memory_space<smem>>
    %c203 = arith.constant 203 : index
    %203 = memref.load %arg2[%c203] : memref<230xf32, #tpu.memory_space<smem>>
    %c204 = arith.constant 204 : index
    %204 = memref.load %arg2[%c204] : memref<230xf32, #tpu.memory_space<smem>>
    %c205 = arith.constant 205 : index
    %205 = memref.load %arg2[%c205] : memref<230xf32, #tpu.memory_space<smem>>
    %c206 = arith.constant 206 : index
    %206 = memref.load %arg2[%c206] : memref<230xf32, #tpu.memory_space<smem>>
    %c207 = arith.constant 207 : index
    %207 = memref.load %arg2[%c207] : memref<230xf32, #tpu.memory_space<smem>>
    %c208 = arith.constant 208 : index
    %208 = memref.load %arg2[%c208] : memref<230xf32, #tpu.memory_space<smem>>
    %c209 = arith.constant 209 : index
    %209 = memref.load %arg2[%c209] : memref<230xf32, #tpu.memory_space<smem>>
    %c210 = arith.constant 210 : index
    %210 = memref.load %arg2[%c210] : memref<230xf32, #tpu.memory_space<smem>>
    %c211 = arith.constant 211 : index
    %211 = memref.load %arg2[%c211] : memref<230xf32, #tpu.memory_space<smem>>
    %c212 = arith.constant 212 : index
    %212 = memref.load %arg2[%c212] : memref<230xf32, #tpu.memory_space<smem>>
    %c213 = arith.constant 213 : index
    %213 = memref.load %arg2[%c213] : memref<230xf32, #tpu.memory_space<smem>>
    %c214 = arith.constant 214 : index
    %214 = memref.load %arg2[%c214] : memref<230xf32, #tpu.memory_space<smem>>
    %c215 = arith.constant 215 : index
    %215 = memref.load %arg2[%c215] : memref<230xf32, #tpu.memory_space<smem>>
    %c216 = arith.constant 216 : index
    %216 = memref.load %arg2[%c216] : memref<230xf32, #tpu.memory_space<smem>>
    %c217 = arith.constant 217 : index
    %217 = memref.load %arg2[%c217] : memref<230xf32, #tpu.memory_space<smem>>
    %c218 = arith.constant 218 : index
    %218 = memref.load %arg2[%c218] : memref<230xf32, #tpu.memory_space<smem>>
    %c219 = arith.constant 219 : index
    %219 = memref.load %arg2[%c219] : memref<230xf32, #tpu.memory_space<smem>>
    %c220 = arith.constant 220 : index
    %220 = memref.load %arg2[%c220] : memref<230xf32, #tpu.memory_space<smem>>
    %c221 = arith.constant 221 : index
    %221 = memref.load %arg2[%c221] : memref<230xf32, #tpu.memory_space<smem>>
    %c222 = arith.constant 222 : index
    %222 = memref.load %arg2[%c222] : memref<230xf32, #tpu.memory_space<smem>>
    %c223 = arith.constant 223 : index
    %223 = memref.load %arg2[%c223] : memref<230xf32, #tpu.memory_space<smem>>
    %c224 = arith.constant 224 : index
    %224 = memref.load %arg2[%c224] : memref<230xf32, #tpu.memory_space<smem>>
    %c225 = arith.constant 225 : index
    %225 = memref.load %arg2[%c225] : memref<230xf32, #tpu.memory_space<smem>>
    %c226 = arith.constant 226 : index
    %226 = memref.load %arg2[%c226] : memref<230xf32, #tpu.memory_space<smem>>
    %c227 = arith.constant 227 : index
    %227 = memref.load %arg2[%c227] : memref<230xf32, #tpu.memory_space<smem>>
    %c228 = arith.constant 228 : index
    %228 = memref.load %arg2[%c228] : memref<230xf32, #tpu.memory_space<smem>>
    %c229 = arith.constant 229 : index
    %229 = memref.load %arg2[%c229] : memref<230xf32, #tpu.memory_space<smem>>
    %c0_0 = arith.constant 0 : index
    %c0_1 = arith.constant 0 : index
    %c0_2 = arith.constant 0 : index
    %230 = vector.load %arg1[%c0_0, %c0_1, %c0_2] : memref<2x8x256xf32, #tpu.memory_space<vmem>>, vector<1x8x256xf32>
    %231 = vector.shape_cast %230 : vector<1x8x256xf32> to vector<8x256xf32>
    %c1_3 = arith.constant 1 : index
    %c0_4 = arith.constant 0 : index
    %c0_5 = arith.constant 0 : index
    %232 = vector.load %arg1[%c1_3, %c0_4, %c0_5] : memref<2x8x256xf32, #tpu.memory_space<vmem>>, vector<1x8x256xf32>
    %233 = vector.shape_cast %232 : vector<1x8x256xf32> to vector<8x256xf32>
    %234 = vector.broadcast %0 : f32 to vector<8x256xf32>
    %235 = arith.mulf %231, %234 : vector<8x256xf32>
    %236 = vector.broadcast %1 : f32 to vector<8x256xf32>
    %237 = arith.mulf %233, %236 : vector<8x256xf32>
    %238 = arith.addf %235, %237 : vector<8x256xf32>
    %239 = vector.broadcast %32 : f32 to vector<8x256xf32>
    %240 = arith.addf %238, %239 : vector<8x256xf32>
    %cst = arith.constant 0.000000e+00 : f32
    %241 = vector.broadcast %cst : f32 to vector<8x256xf32>
    %242 = arith.maximumf %240, %241 : vector<8x256xf32>
    %243 = vector.broadcast %2 : f32 to vector<8x256xf32>
    %244 = arith.mulf %231, %243 : vector<8x256xf32>
    %245 = vector.broadcast %3 : f32 to vector<8x256xf32>
    %246 = arith.mulf %233, %245 : vector<8x256xf32>
    %247 = arith.addf %244, %246 : vector<8x256xf32>
    %248 = vector.broadcast %33 : f32 to vector<8x256xf32>
    %249 = arith.addf %247, %248 : vector<8x256xf32>
    %cst_6 = arith.constant 0.000000e+00 : f32
    %250 = vector.broadcast %cst_6 : f32 to vector<8x256xf32>
    %251 = arith.maximumf %249, %250 : vector<8x256xf32>
    %252 = vector.broadcast %4 : f32 to vector<8x256xf32>
    %253 = arith.mulf %231, %252 : vector<8x256xf32>
    %254 = vector.broadcast %5 : f32 to vector<8x256xf32>
    %255 = arith.mulf %233, %254 : vector<8x256xf32>
    %256 = arith.addf %253, %255 : vector<8x256xf32>
    %257 = vector.broadcast %34 : f32 to vector<8x256xf32>
    %258 = arith.addf %256, %257 : vector<8x256xf32>
    %cst_7 = arith.constant 0.000000e+00 : f32
    %259 = vector.broadcast %cst_7 : f32 to vector<8x256xf32>
    %260 = arith.maximumf %258, %259 : vector<8x256xf32>
    %261 = vector.broadcast %6 : f32 to vector<8x256xf32>
    %262 = arith.mulf %231, %261 : vector<8x256xf32>
    %263 = vector.broadcast %7 : f32 to vector<8x256xf32>
    %264 = arith.mulf %233, %263 : vector<8x256xf32>
    %265 = arith.addf %262, %264 : vector<8x256xf32>
    %266 = vector.broadcast %35 : f32 to vector<8x256xf32>
    %267 = arith.addf %265, %266 : vector<8x256xf32>
    %cst_8 = arith.constant 0.000000e+00 : f32
    %268 = vector.broadcast %cst_8 : f32 to vector<8x256xf32>
    %269 = arith.maximumf %267, %268 : vector<8x256xf32>
    %270 = vector.broadcast %8 : f32 to vector<8x256xf32>
    %271 = arith.mulf %231, %270 : vector<8x256xf32>
    %272 = vector.broadcast %9 : f32 to vector<8x256xf32>
    %273 = arith.mulf %233, %272 : vector<8x256xf32>
    %274 = arith.addf %271, %273 : vector<8x256xf32>
    %275 = vector.broadcast %36 : f32 to vector<8x256xf32>
    %276 = arith.addf %274, %275 : vector<8x256xf32>
    %cst_9 = arith.constant 0.000000e+00 : f32
    %277 = vector.broadcast %cst_9 : f32 to vector<8x256xf32>
    %278 = arith.maximumf %276, %277 : vector<8x256xf32>
    %279 = vector.broadcast %10 : f32 to vector<8x256xf32>
    %280 = arith.mulf %231, %279 : vector<8x256xf32>
    %281 = vector.broadcast %11 : f32 to vector<8x256xf32>
    %282 = arith.mulf %233, %281 : vector<8x256xf32>
    %283 = arith.addf %280, %282 : vector<8x256xf32>
    %284 = vector.broadcast %37 : f32 to vector<8x256xf32>
    %285 = arith.addf %283, %284 : vector<8x256xf32>
    %cst_10 = arith.constant 0.000000e+00 : f32
    %286 = vector.broadcast %cst_10 : f32 to vector<8x256xf32>
    %287 = arith.maximumf %285, %286 : vector<8x256xf32>
    %288 = vector.broadcast %12 : f32 to vector<8x256xf32>
    %289 = arith.mulf %231, %288 : vector<8x256xf32>
    %290 = vector.broadcast %13 : f32 to vector<8x256xf32>
    %291 = arith.mulf %233, %290 : vector<8x256xf32>
    %292 = arith.addf %289, %291 : vector<8x256xf32>
    %293 = vector.broadcast %38 : f32 to vector<8x256xf32>
    %294 = arith.addf %292, %293 : vector<8x256xf32>
    %cst_11 = arith.constant 0.000000e+00 : f32
    %295 = vector.broadcast %cst_11 : f32 to vector<8x256xf32>
    %296 = arith.maximumf %294, %295 : vector<8x256xf32>
    %297 = vector.broadcast %14 : f32 to vector<8x256xf32>
    %298 = arith.mulf %231, %297 : vector<8x256xf32>
    %299 = vector.broadcast %15 : f32 to vector<8x256xf32>
    %300 = arith.mulf %233, %299 : vector<8x256xf32>
    %301 = arith.addf %298, %300 : vector<8x256xf32>
    %302 = vector.broadcast %39 : f32 to vector<8x256xf32>
    %303 = arith.addf %301, %302 : vector<8x256xf32>
    %cst_12 = arith.constant 0.000000e+00 : f32
    %304 = vector.broadcast %cst_12 : f32 to vector<8x256xf32>
    %305 = arith.maximumf %303, %304 : vector<8x256xf32>
    %306 = vector.broadcast %16 : f32 to vector<8x256xf32>
    %307 = arith.mulf %231, %306 : vector<8x256xf32>
    %308 = vector.broadcast %17 : f32 to vector<8x256xf32>
    %309 = arith.mulf %233, %308 : vector<8x256xf32>
    %310 = arith.addf %307, %309 : vector<8x256xf32>
    %311 = vector.broadcast %40 : f32 to vector<8x256xf32>
    %312 = arith.addf %310, %311 : vector<8x256xf32>
    %cst_13 = arith.constant 0.000000e+00 : f32
    %313 = vector.broadcast %cst_13 : f32 to vector<8x256xf32>
    %314 = arith.maximumf %312, %313 : vector<8x256xf32>
    %315 = vector.broadcast %18 : f32 to vector<8x256xf32>
    %316 = arith.mulf %231, %315 : vector<8x256xf32>
    %317 = vector.broadcast %19 : f32 to vector<8x256xf32>
    %318 = arith.mulf %233, %317 : vector<8x256xf32>
    %319 = arith.addf %316, %318 : vector<8x256xf32>
    %320 = vector.broadcast %41 : f32 to vector<8x256xf32>
    %321 = arith.addf %319, %320 : vector<8x256xf32>
    %cst_14 = arith.constant 0.000000e+00 : f32
    %322 = vector.broadcast %cst_14 : f32 to vector<8x256xf32>
    %323 = arith.maximumf %321, %322 : vector<8x256xf32>
    %324 = vector.broadcast %20 : f32 to vector<8x256xf32>
    %325 = arith.mulf %231, %324 : vector<8x256xf32>
    %326 = vector.broadcast %21 : f32 to vector<8x256xf32>
    %327 = arith.mulf %233, %326 : vector<8x256xf32>
    %328 = arith.addf %325, %327 : vector<8x256xf32>
    %329 = vector.broadcast %42 : f32 to vector<8x256xf32>
    %330 = arith.addf %328, %329 : vector<8x256xf32>
    %cst_15 = arith.constant 0.000000e+00 : f32
    %331 = vector.broadcast %cst_15 : f32 to vector<8x256xf32>
    %332 = arith.maximumf %330, %331 : vector<8x256xf32>
    %333 = vector.broadcast %22 : f32 to vector<8x256xf32>
    %334 = arith.mulf %231, %333 : vector<8x256xf32>
    %335 = vector.broadcast %23 : f32 to vector<8x256xf32>
    %336 = arith.mulf %233, %335 : vector<8x256xf32>
    %337 = arith.addf %334, %336 : vector<8x256xf32>
    %338 = vector.broadcast %43 : f32 to vector<8x256xf32>
    %339 = arith.addf %337, %338 : vector<8x256xf32>
    %cst_16 = arith.constant 0.000000e+00 : f32
    %340 = vector.broadcast %cst_16 : f32 to vector<8x256xf32>
    %341 = arith.maximumf %339, %340 : vector<8x256xf32>
    %342 = vector.broadcast %24 : f32 to vector<8x256xf32>
    %343 = arith.mulf %231, %342 : vector<8x256xf32>
    %344 = vector.broadcast %25 : f32 to vector<8x256xf32>
    %345 = arith.mulf %233, %344 : vector<8x256xf32>
    %346 = arith.addf %343, %345 : vector<8x256xf32>
    %347 = vector.broadcast %44 : f32 to vector<8x256xf32>
    %348 = arith.addf %346, %347 : vector<8x256xf32>
    %cst_17 = arith.constant 0.000000e+00 : f32
    %349 = vector.broadcast %cst_17 : f32 to vector<8x256xf32>
    %350 = arith.maximumf %348, %349 : vector<8x256xf32>
    %351 = vector.broadcast %26 : f32 to vector<8x256xf32>
    %352 = arith.mulf %231, %351 : vector<8x256xf32>
    %353 = vector.broadcast %27 : f32 to vector<8x256xf32>
    %354 = arith.mulf %233, %353 : vector<8x256xf32>
    %355 = arith.addf %352, %354 : vector<8x256xf32>
    %356 = vector.broadcast %45 : f32 to vector<8x256xf32>
    %357 = arith.addf %355, %356 : vector<8x256xf32>
    %cst_18 = arith.constant 0.000000e+00 : f32
    %358 = vector.broadcast %cst_18 : f32 to vector<8x256xf32>
    %359 = arith.maximumf %357, %358 : vector<8x256xf32>
    %360 = vector.broadcast %28 : f32 to vector<8x256xf32>
    %361 = arith.mulf %231, %360 : vector<8x256xf32>
    %362 = vector.broadcast %29 : f32 to vector<8x256xf32>
    %363 = arith.mulf %233, %362 : vector<8x256xf32>
    %364 = arith.addf %361, %363 : vector<8x256xf32>
    %365 = vector.broadcast %46 : f32 to vector<8x256xf32>
    %366 = arith.addf %364, %365 : vector<8x256xf32>
    %cst_19 = arith.constant 0.000000e+00 : f32
    %367 = vector.broadcast %cst_19 : f32 to vector<8x256xf32>
    %368 = arith.maximumf %366, %367 : vector<8x256xf32>
    %369 = vector.broadcast %30 : f32 to vector<8x256xf32>
    %370 = arith.mulf %231, %369 : vector<8x256xf32>
    %371 = vector.broadcast %31 : f32 to vector<8x256xf32>
    %372 = arith.mulf %233, %371 : vector<8x256xf32>
    %373 = arith.addf %370, %372 : vector<8x256xf32>
    %374 = vector.broadcast %47 : f32 to vector<8x256xf32>
    %375 = arith.addf %373, %374 : vector<8x256xf32>
    %cst_20 = arith.constant 0.000000e+00 : f32
    %376 = vector.broadcast %cst_20 : f32 to vector<8x256xf32>
    %377 = arith.maximumf %375, %376 : vector<8x256xf32>
    %378 = vector.broadcast %48 : f32 to vector<8x256xf32>
    %379 = arith.mulf %242, %378 : vector<8x256xf32>
    %380 = vector.broadcast %49 : f32 to vector<8x256xf32>
    %381 = arith.mulf %251, %380 : vector<8x256xf32>
    %382 = arith.addf %379, %381 : vector<8x256xf32>
    %383 = vector.broadcast %50 : f32 to vector<8x256xf32>
    %384 = arith.mulf %260, %383 : vector<8x256xf32>
    %385 = arith.addf %382, %384 : vector<8x256xf32>
    %386 = vector.broadcast %51 : f32 to vector<8x256xf32>
    %387 = arith.mulf %269, %386 : vector<8x256xf32>
    %388 = arith.addf %385, %387 : vector<8x256xf32>
    %389 = vector.broadcast %52 : f32 to vector<8x256xf32>
    %390 = arith.mulf %278, %389 : vector<8x256xf32>
    %391 = arith.addf %388, %390 : vector<8x256xf32>
    %392 = vector.broadcast %53 : f32 to vector<8x256xf32>
    %393 = arith.mulf %287, %392 : vector<8x256xf32>
    %394 = arith.addf %391, %393 : vector<8x256xf32>
    %395 = vector.broadcast %54 : f32 to vector<8x256xf32>
    %396 = arith.mulf %296, %395 : vector<8x256xf32>
    %397 = arith.addf %394, %396 : vector<8x256xf32>
    %398 = vector.broadcast %55 : f32 to vector<8x256xf32>
    %399 = arith.mulf %305, %398 : vector<8x256xf32>
    %400 = arith.addf %397, %399 : vector<8x256xf32>
    %401 = vector.broadcast %56 : f32 to vector<8x256xf32>
    %402 = arith.mulf %314, %401 : vector<8x256xf32>
    %403 = arith.addf %400, %402 : vector<8x256xf32>
    %404 = vector.broadcast %57 : f32 to vector<8x256xf32>
    %405 = arith.mulf %323, %404 : vector<8x256xf32>
    %406 = arith.addf %403, %405 : vector<8x256xf32>
    %407 = vector.broadcast %58 : f32 to vector<8x256xf32>
    %408 = arith.mulf %332, %407 : vector<8x256xf32>
    %409 = arith.addf %406, %408 : vector<8x256xf32>
    %410 = vector.broadcast %59 : f32 to vector<8x256xf32>
    %411 = arith.mulf %341, %410 : vector<8x256xf32>
    %412 = arith.addf %409, %411 : vector<8x256xf32>
    %413 = vector.broadcast %60 : f32 to vector<8x256xf32>
    %414 = arith.mulf %350, %413 : vector<8x256xf32>
    %415 = arith.addf %412, %414 : vector<8x256xf32>
    %416 = vector.broadcast %61 : f32 to vector<8x256xf32>
    %417 = arith.mulf %359, %416 : vector<8x256xf32>
    %418 = arith.addf %415, %417 : vector<8x256xf32>
    %419 = vector.broadcast %62 : f32 to vector<8x256xf32>
    %420 = arith.mulf %368, %419 : vector<8x256xf32>
    %421 = arith.addf %418, %420 : vector<8x256xf32>
    %422 = vector.broadcast %63 : f32 to vector<8x256xf32>
    %423 = arith.mulf %377, %422 : vector<8x256xf32>
    %424 = arith.addf %421, %423 : vector<8x256xf32>
    %425 = vector.broadcast %112 : f32 to vector<8x256xf32>
    %426 = arith.addf %424, %425 : vector<8x256xf32>
    %cst_21 = arith.constant 0.000000e+00 : f32
    %427 = vector.broadcast %cst_21 : f32 to vector<8x256xf32>
    %428 = arith.maximumf %426, %427 : vector<8x256xf32>
    %429 = vector.broadcast %64 : f32 to vector<8x256xf32>
    %430 = arith.mulf %242, %429 : vector<8x256xf32>
    %431 = vector.broadcast %65 : f32 to vector<8x256xf32>
    %432 = arith.mulf %251, %431 : vector<8x256xf32>
    %433 = arith.addf %430, %432 : vector<8x256xf32>
    %434 = vector.broadcast %66 : f32 to vector<8x256xf32>
    %435 = arith.mulf %260, %434 : vector<8x256xf32>
    %436 = arith.addf %433, %435 : vector<8x256xf32>
    %437 = vector.broadcast %67 : f32 to vector<8x256xf32>
    %438 = arith.mulf %269, %437 : vector<8x256xf32>
    %439 = arith.addf %436, %438 : vector<8x256xf32>
    %440 = vector.broadcast %68 : f32 to vector<8x256xf32>
    %441 = arith.mulf %278, %440 : vector<8x256xf32>
    %442 = arith.addf %439, %441 : vector<8x256xf32>
    %443 = vector.broadcast %69 : f32 to vector<8x256xf32>
    %444 = arith.mulf %287, %443 : vector<8x256xf32>
    %445 = arith.addf %442, %444 : vector<8x256xf32>
    %446 = vector.broadcast %70 : f32 to vector<8x256xf32>
    %447 = arith.mulf %296, %446 : vector<8x256xf32>
    %448 = arith.addf %445, %447 : vector<8x256xf32>
    %449 = vector.broadcast %71 : f32 to vector<8x256xf32>
    %450 = arith.mulf %305, %449 : vector<8x256xf32>
    %451 = arith.addf %448, %450 : vector<8x256xf32>
    %452 = vector.broadcast %72 : f32 to vector<8x256xf32>
    %453 = arith.mulf %314, %452 : vector<8x256xf32>
    %454 = arith.addf %451, %453 : vector<8x256xf32>
    %455 = vector.broadcast %73 : f32 to vector<8x256xf32>
    %456 = arith.mulf %323, %455 : vector<8x256xf32>
    %457 = arith.addf %454, %456 : vector<8x256xf32>
    %458 = vector.broadcast %74 : f32 to vector<8x256xf32>
    %459 = arith.mulf %332, %458 : vector<8x256xf32>
    %460 = arith.addf %457, %459 : vector<8x256xf32>
    %461 = vector.broadcast %75 : f32 to vector<8x256xf32>
    %462 = arith.mulf %341, %461 : vector<8x256xf32>
    %463 = arith.addf %460, %462 : vector<8x256xf32>
    %464 = vector.broadcast %76 : f32 to vector<8x256xf32>
    %465 = arith.mulf %350, %464 : vector<8x256xf32>
    %466 = arith.addf %463, %465 : vector<8x256xf32>
    %467 = vector.broadcast %77 : f32 to vector<8x256xf32>
    %468 = arith.mulf %359, %467 : vector<8x256xf32>
    %469 = arith.addf %466, %468 : vector<8x256xf32>
    %470 = vector.broadcast %78 : f32 to vector<8x256xf32>
    %471 = arith.mulf %368, %470 : vector<8x256xf32>
    %472 = arith.addf %469, %471 : vector<8x256xf32>
    %473 = vector.broadcast %79 : f32 to vector<8x256xf32>
    %474 = arith.mulf %377, %473 : vector<8x256xf32>
    %475 = arith.addf %472, %474 : vector<8x256xf32>
    %476 = vector.broadcast %113 : f32 to vector<8x256xf32>
    %477 = arith.addf %475, %476 : vector<8x256xf32>
    %cst_22 = arith.constant 0.000000e+00 : f32
    %478 = vector.broadcast %cst_22 : f32 to vector<8x256xf32>
    %479 = arith.maximumf %477, %478 : vector<8x256xf32>
    %480 = vector.broadcast %80 : f32 to vector<8x256xf32>
    %481 = arith.mulf %242, %480 : vector<8x256xf32>
    %482 = vector.broadcast %81 : f32 to vector<8x256xf32>
    %483 = arith.mulf %251, %482 : vector<8x256xf32>
    %484 = arith.addf %481, %483 : vector<8x256xf32>
    %485 = vector.broadcast %82 : f32 to vector<8x256xf32>
    %486 = arith.mulf %260, %485 : vector<8x256xf32>
    %487 = arith.addf %484, %486 : vector<8x256xf32>
    %488 = vector.broadcast %83 : f32 to vector<8x256xf32>
    %489 = arith.mulf %269, %488 : vector<8x256xf32>
    %490 = arith.addf %487, %489 : vector<8x256xf32>
    %491 = vector.broadcast %84 : f32 to vector<8x256xf32>
    %492 = arith.mulf %278, %491 : vector<8x256xf32>
    %493 = arith.addf %490, %492 : vector<8x256xf32>
    %494 = vector.broadcast %85 : f32 to vector<8x256xf32>
    %495 = arith.mulf %287, %494 : vector<8x256xf32>
    %496 = arith.addf %493, %495 : vector<8x256xf32>
    %497 = vector.broadcast %86 : f32 to vector<8x256xf32>
    %498 = arith.mulf %296, %497 : vector<8x256xf32>
    %499 = arith.addf %496, %498 : vector<8x256xf32>
    %500 = vector.broadcast %87 : f32 to vector<8x256xf32>
    %501 = arith.mulf %305, %500 : vector<8x256xf32>
    %502 = arith.addf %499, %501 : vector<8x256xf32>
    %503 = vector.broadcast %88 : f32 to vector<8x256xf32>
    %504 = arith.mulf %314, %503 : vector<8x256xf32>
    %505 = arith.addf %502, %504 : vector<8x256xf32>
    %506 = vector.broadcast %89 : f32 to vector<8x256xf32>
    %507 = arith.mulf %323, %506 : vector<8x256xf32>
    %508 = arith.addf %505, %507 : vector<8x256xf32>
    %509 = vector.broadcast %90 : f32 to vector<8x256xf32>
    %510 = arith.mulf %332, %509 : vector<8x256xf32>
    %511 = arith.addf %508, %510 : vector<8x256xf32>
    %512 = vector.broadcast %91 : f32 to vector<8x256xf32>
    %513 = arith.mulf %341, %512 : vector<8x256xf32>
    %514 = arith.addf %511, %513 : vector<8x256xf32>
    %515 = vector.broadcast %92 : f32 to vector<8x256xf32>
    %516 = arith.mulf %350, %515 : vector<8x256xf32>
    %517 = arith.addf %514, %516 : vector<8x256xf32>
    %518 = vector.broadcast %93 : f32 to vector<8x256xf32>
    %519 = arith.mulf %359, %518 : vector<8x256xf32>
    %520 = arith.addf %517, %519 : vector<8x256xf32>
    %521 = vector.broadcast %94 : f32 to vector<8x256xf32>
    %522 = arith.mulf %368, %521 : vector<8x256xf32>
    %523 = arith.addf %520, %522 : vector<8x256xf32>
    %524 = vector.broadcast %95 : f32 to vector<8x256xf32>
    %525 = arith.mulf %377, %524 : vector<8x256xf32>
    %526 = arith.addf %523, %525 : vector<8x256xf32>
    %527 = vector.broadcast %114 : f32 to vector<8x256xf32>
    %528 = arith.addf %526, %527 : vector<8x256xf32>
    %cst_23 = arith.constant 0.000000e+00 : f32
    %529 = vector.broadcast %cst_23 : f32 to vector<8x256xf32>
    %530 = arith.maximumf %528, %529 : vector<8x256xf32>
    %531 = vector.broadcast %96 : f32 to vector<8x256xf32>
    %532 = arith.mulf %242, %531 : vector<8x256xf32>
    %533 = vector.broadcast %97 : f32 to vector<8x256xf32>
    %534 = arith.mulf %251, %533 : vector<8x256xf32>
    %535 = arith.addf %532, %534 : vector<8x256xf32>
    %536 = vector.broadcast %98 : f32 to vector<8x256xf32>
    %537 = arith.mulf %260, %536 : vector<8x256xf32>
    %538 = arith.addf %535, %537 : vector<8x256xf32>
    %539 = vector.broadcast %99 : f32 to vector<8x256xf32>
    %540 = arith.mulf %269, %539 : vector<8x256xf32>
    %541 = arith.addf %538, %540 : vector<8x256xf32>
    %542 = vector.broadcast %100 : f32 to vector<8x256xf32>
    %543 = arith.mulf %278, %542 : vector<8x256xf32>
    %544 = arith.addf %541, %543 : vector<8x256xf32>
    %545 = vector.broadcast %101 : f32 to vector<8x256xf32>
    %546 = arith.mulf %287, %545 : vector<8x256xf32>
    %547 = arith.addf %544, %546 : vector<8x256xf32>
    %548 = vector.broadcast %102 : f32 to vector<8x256xf32>
    %549 = arith.mulf %296, %548 : vector<8x256xf32>
    %550 = arith.addf %547, %549 : vector<8x256xf32>
    %551 = vector.broadcast %103 : f32 to vector<8x256xf32>
    %552 = arith.mulf %305, %551 : vector<8x256xf32>
    %553 = arith.addf %550, %552 : vector<8x256xf32>
    %554 = vector.broadcast %104 : f32 to vector<8x256xf32>
    %555 = arith.mulf %314, %554 : vector<8x256xf32>
    %556 = arith.addf %553, %555 : vector<8x256xf32>
    %557 = vector.broadcast %105 : f32 to vector<8x256xf32>
    %558 = arith.mulf %323, %557 : vector<8x256xf32>
    %559 = arith.addf %556, %558 : vector<8x256xf32>
    %560 = vector.broadcast %106 : f32 to vector<8x256xf32>
    %561 = arith.mulf %332, %560 : vector<8x256xf32>
    %562 = arith.addf %559, %561 : vector<8x256xf32>
    %563 = vector.broadcast %107 : f32 to vector<8x256xf32>
    %564 = arith.mulf %341, %563 : vector<8x256xf32>
    %565 = arith.addf %562, %564 : vector<8x256xf32>
    %566 = vector.broadcast %108 : f32 to vector<8x256xf32>
    %567 = arith.mulf %350, %566 : vector<8x256xf32>
    %568 = arith.addf %565, %567 : vector<8x256xf32>
    %569 = vector.broadcast %109 : f32 to vector<8x256xf32>
    %570 = arith.mulf %359, %569 : vector<8x256xf32>
    %571 = arith.addf %568, %570 : vector<8x256xf32>
    %572 = vector.broadcast %110 : f32 to vector<8x256xf32>
    %573 = arith.mulf %368, %572 : vector<8x256xf32>
    %574 = arith.addf %571, %573 : vector<8x256xf32>
    %575 = vector.broadcast %111 : f32 to vector<8x256xf32>
    %576 = arith.mulf %377, %575 : vector<8x256xf32>
    %577 = arith.addf %574, %576 : vector<8x256xf32>
    %578 = vector.broadcast %115 : f32 to vector<8x256xf32>
    %579 = arith.addf %577, %578 : vector<8x256xf32>
    %cst_24 = arith.constant 0.000000e+00 : f32
    %580 = vector.broadcast %cst_24 : f32 to vector<8x256xf32>
    %581 = arith.maximumf %579, %580 : vector<8x256xf32>
    %582 = vector.broadcast %116 : f32 to vector<8x256xf32>
    %583 = arith.mulf %428, %582 : vector<8x256xf32>
    %584 = vector.broadcast %117 : f32 to vector<8x256xf32>
    %585 = arith.mulf %479, %584 : vector<8x256xf32>
    %586 = arith.addf %583, %585 : vector<8x256xf32>
    %587 = vector.broadcast %118 : f32 to vector<8x256xf32>
    %588 = arith.mulf %530, %587 : vector<8x256xf32>
    %589 = arith.addf %586, %588 : vector<8x256xf32>
    %590 = vector.broadcast %119 : f32 to vector<8x256xf32>
    %591 = arith.mulf %581, %590 : vector<8x256xf32>
    %592 = arith.addf %589, %591 : vector<8x256xf32>
    %593 = vector.broadcast %180 : f32 to vector<8x256xf32>
    %594 = arith.addf %592, %593 : vector<8x256xf32>
    %cst_25 = arith.constant 0.000000e+00 : f32
    %595 = vector.broadcast %cst_25 : f32 to vector<8x256xf32>
    %596 = arith.maximumf %594, %595 : vector<8x256xf32>
    %597 = vector.broadcast %120 : f32 to vector<8x256xf32>
    %598 = arith.mulf %428, %597 : vector<8x256xf32>
    %599 = vector.broadcast %121 : f32 to vector<8x256xf32>
    %600 = arith.mulf %479, %599 : vector<8x256xf32>
    %601 = arith.addf %598, %600 : vector<8x256xf32>
    %602 = vector.broadcast %122 : f32 to vector<8x256xf32>
    %603 = arith.mulf %530, %602 : vector<8x256xf32>
    %604 = arith.addf %601, %603 : vector<8x256xf32>
    %605 = vector.broadcast %123 : f32 to vector<8x256xf32>
    %606 = arith.mulf %581, %605 : vector<8x256xf32>
    %607 = arith.addf %604, %606 : vector<8x256xf32>
    %608 = vector.broadcast %181 : f32 to vector<8x256xf32>
    %609 = arith.addf %607, %608 : vector<8x256xf32>
    %cst_26 = arith.constant 0.000000e+00 : f32
    %610 = vector.broadcast %cst_26 : f32 to vector<8x256xf32>
    %611 = arith.maximumf %609, %610 : vector<8x256xf32>
    %612 = vector.broadcast %124 : f32 to vector<8x256xf32>
    %613 = arith.mulf %428, %612 : vector<8x256xf32>
    %614 = vector.broadcast %125 : f32 to vector<8x256xf32>
    %615 = arith.mulf %479, %614 : vector<8x256xf32>
    %616 = arith.addf %613, %615 : vector<8x256xf32>
    %617 = vector.broadcast %126 : f32 to vector<8x256xf32>
    %618 = arith.mulf %530, %617 : vector<8x256xf32>
    %619 = arith.addf %616, %618 : vector<8x256xf32>
    %620 = vector.broadcast %127 : f32 to vector<8x256xf32>
    %621 = arith.mulf %581, %620 : vector<8x256xf32>
    %622 = arith.addf %619, %621 : vector<8x256xf32>
    %623 = vector.broadcast %182 : f32 to vector<8x256xf32>
    %624 = arith.addf %622, %623 : vector<8x256xf32>
    %cst_27 = arith.constant 0.000000e+00 : f32
    %625 = vector.broadcast %cst_27 : f32 to vector<8x256xf32>
    %626 = arith.maximumf %624, %625 : vector<8x256xf32>
    %627 = vector.broadcast %128 : f32 to vector<8x256xf32>
    %628 = arith.mulf %428, %627 : vector<8x256xf32>
    %629 = vector.broadcast %129 : f32 to vector<8x256xf32>
    %630 = arith.mulf %479, %629 : vector<8x256xf32>
    %631 = arith.addf %628, %630 : vector<8x256xf32>
    %632 = vector.broadcast %130 : f32 to vector<8x256xf32>
    %633 = arith.mulf %530, %632 : vector<8x256xf32>
    %634 = arith.addf %631, %633 : vector<8x256xf32>
    %635 = vector.broadcast %131 : f32 to vector<8x256xf32>
    %636 = arith.mulf %581, %635 : vector<8x256xf32>
    %637 = arith.addf %634, %636 : vector<8x256xf32>
    %638 = vector.broadcast %183 : f32 to vector<8x256xf32>
    %639 = arith.addf %637, %638 : vector<8x256xf32>
    %cst_28 = arith.constant 0.000000e+00 : f32
    %640 = vector.broadcast %cst_28 : f32 to vector<8x256xf32>
    %641 = arith.maximumf %639, %640 : vector<8x256xf32>
    %642 = vector.broadcast %132 : f32 to vector<8x256xf32>
    %643 = arith.mulf %428, %642 : vector<8x256xf32>
    %644 = vector.broadcast %133 : f32 to vector<8x256xf32>
    %645 = arith.mulf %479, %644 : vector<8x256xf32>
    %646 = arith.addf %643, %645 : vector<8x256xf32>
    %647 = vector.broadcast %134 : f32 to vector<8x256xf32>
    %648 = arith.mulf %530, %647 : vector<8x256xf32>
    %649 = arith.addf %646, %648 : vector<8x256xf32>
    %650 = vector.broadcast %135 : f32 to vector<8x256xf32>
    %651 = arith.mulf %581, %650 : vector<8x256xf32>
    %652 = arith.addf %649, %651 : vector<8x256xf32>
    %653 = vector.broadcast %184 : f32 to vector<8x256xf32>
    %654 = arith.addf %652, %653 : vector<8x256xf32>
    %cst_29 = arith.constant 0.000000e+00 : f32
    %655 = vector.broadcast %cst_29 : f32 to vector<8x256xf32>
    %656 = arith.maximumf %654, %655 : vector<8x256xf32>
    %657 = vector.broadcast %136 : f32 to vector<8x256xf32>
    %658 = arith.mulf %428, %657 : vector<8x256xf32>
    %659 = vector.broadcast %137 : f32 to vector<8x256xf32>
    %660 = arith.mulf %479, %659 : vector<8x256xf32>
    %661 = arith.addf %658, %660 : vector<8x256xf32>
    %662 = vector.broadcast %138 : f32 to vector<8x256xf32>
    %663 = arith.mulf %530, %662 : vector<8x256xf32>
    %664 = arith.addf %661, %663 : vector<8x256xf32>
    %665 = vector.broadcast %139 : f32 to vector<8x256xf32>
    %666 = arith.mulf %581, %665 : vector<8x256xf32>
    %667 = arith.addf %664, %666 : vector<8x256xf32>
    %668 = vector.broadcast %185 : f32 to vector<8x256xf32>
    %669 = arith.addf %667, %668 : vector<8x256xf32>
    %cst_30 = arith.constant 0.000000e+00 : f32
    %670 = vector.broadcast %cst_30 : f32 to vector<8x256xf32>
    %671 = arith.maximumf %669, %670 : vector<8x256xf32>
    %672 = vector.broadcast %140 : f32 to vector<8x256xf32>
    %673 = arith.mulf %428, %672 : vector<8x256xf32>
    %674 = vector.broadcast %141 : f32 to vector<8x256xf32>
    %675 = arith.mulf %479, %674 : vector<8x256xf32>
    %676 = arith.addf %673, %675 : vector<8x256xf32>
    %677 = vector.broadcast %142 : f32 to vector<8x256xf32>
    %678 = arith.mulf %530, %677 : vector<8x256xf32>
    %679 = arith.addf %676, %678 : vector<8x256xf32>
    %680 = vector.broadcast %143 : f32 to vector<8x256xf32>
    %681 = arith.mulf %581, %680 : vector<8x256xf32>
    %682 = arith.addf %679, %681 : vector<8x256xf32>
    %683 = vector.broadcast %186 : f32 to vector<8x256xf32>
    %684 = arith.addf %682, %683 : vector<8x256xf32>
    %cst_31 = arith.constant 0.000000e+00 : f32
    %685 = vector.broadcast %cst_31 : f32 to vector<8x256xf32>
    %686 = arith.maximumf %684, %685 : vector<8x256xf32>
    %687 = vector.broadcast %144 : f32 to vector<8x256xf32>
    %688 = arith.mulf %428, %687 : vector<8x256xf32>
    %689 = vector.broadcast %145 : f32 to vector<8x256xf32>
    %690 = arith.mulf %479, %689 : vector<8x256xf32>
    %691 = arith.addf %688, %690 : vector<8x256xf32>
    %692 = vector.broadcast %146 : f32 to vector<8x256xf32>
    %693 = arith.mulf %530, %692 : vector<8x256xf32>
    %694 = arith.addf %691, %693 : vector<8x256xf32>
    %695 = vector.broadcast %147 : f32 to vector<8x256xf32>
    %696 = arith.mulf %581, %695 : vector<8x256xf32>
    %697 = arith.addf %694, %696 : vector<8x256xf32>
    %698 = vector.broadcast %187 : f32 to vector<8x256xf32>
    %699 = arith.addf %697, %698 : vector<8x256xf32>
    %cst_32 = arith.constant 0.000000e+00 : f32
    %700 = vector.broadcast %cst_32 : f32 to vector<8x256xf32>
    %701 = arith.maximumf %699, %700 : vector<8x256xf32>
    %702 = vector.broadcast %148 : f32 to vector<8x256xf32>
    %703 = arith.mulf %428, %702 : vector<8x256xf32>
    %704 = vector.broadcast %149 : f32 to vector<8x256xf32>
    %705 = arith.mulf %479, %704 : vector<8x256xf32>
    %706 = arith.addf %703, %705 : vector<8x256xf32>
    %707 = vector.broadcast %150 : f32 to vector<8x256xf32>
    %708 = arith.mulf %530, %707 : vector<8x256xf32>
    %709 = arith.addf %706, %708 : vector<8x256xf32>
    %710 = vector.broadcast %151 : f32 to vector<8x256xf32>
    %711 = arith.mulf %581, %710 : vector<8x256xf32>
    %712 = arith.addf %709, %711 : vector<8x256xf32>
    %713 = vector.broadcast %188 : f32 to vector<8x256xf32>
    %714 = arith.addf %712, %713 : vector<8x256xf32>
    %cst_33 = arith.constant 0.000000e+00 : f32
    %715 = vector.broadcast %cst_33 : f32 to vector<8x256xf32>
    %716 = arith.maximumf %714, %715 : vector<8x256xf32>
    %717 = vector.broadcast %152 : f32 to vector<8x256xf32>
    %718 = arith.mulf %428, %717 : vector<8x256xf32>
    %719 = vector.broadcast %153 : f32 to vector<8x256xf32>
    %720 = arith.mulf %479, %719 : vector<8x256xf32>
    %721 = arith.addf %718, %720 : vector<8x256xf32>
    %722 = vector.broadcast %154 : f32 to vector<8x256xf32>
    %723 = arith.mulf %530, %722 : vector<8x256xf32>
    %724 = arith.addf %721, %723 : vector<8x256xf32>
    %725 = vector.broadcast %155 : f32 to vector<8x256xf32>
    %726 = arith.mulf %581, %725 : vector<8x256xf32>
    %727 = arith.addf %724, %726 : vector<8x256xf32>
    %728 = vector.broadcast %189 : f32 to vector<8x256xf32>
    %729 = arith.addf %727, %728 : vector<8x256xf32>
    %cst_34 = arith.constant 0.000000e+00 : f32
    %730 = vector.broadcast %cst_34 : f32 to vector<8x256xf32>
    %731 = arith.maximumf %729, %730 : vector<8x256xf32>
    %732 = vector.broadcast %156 : f32 to vector<8x256xf32>
    %733 = arith.mulf %428, %732 : vector<8x256xf32>
    %734 = vector.broadcast %157 : f32 to vector<8x256xf32>
    %735 = arith.mulf %479, %734 : vector<8x256xf32>
    %736 = arith.addf %733, %735 : vector<8x256xf32>
    %737 = vector.broadcast %158 : f32 to vector<8x256xf32>
    %738 = arith.mulf %530, %737 : vector<8x256xf32>
    %739 = arith.addf %736, %738 : vector<8x256xf32>
    %740 = vector.broadcast %159 : f32 to vector<8x256xf32>
    %741 = arith.mulf %581, %740 : vector<8x256xf32>
    %742 = arith.addf %739, %741 : vector<8x256xf32>
    %743 = vector.broadcast %190 : f32 to vector<8x256xf32>
    %744 = arith.addf %742, %743 : vector<8x256xf32>
    %cst_35 = arith.constant 0.000000e+00 : f32
    %745 = vector.broadcast %cst_35 : f32 to vector<8x256xf32>
    %746 = arith.maximumf %744, %745 : vector<8x256xf32>
    %747 = vector.broadcast %160 : f32 to vector<8x256xf32>
    %748 = arith.mulf %428, %747 : vector<8x256xf32>
    %749 = vector.broadcast %161 : f32 to vector<8x256xf32>
    %750 = arith.mulf %479, %749 : vector<8x256xf32>
    %751 = arith.addf %748, %750 : vector<8x256xf32>
    %752 = vector.broadcast %162 : f32 to vector<8x256xf32>
    %753 = arith.mulf %530, %752 : vector<8x256xf32>
    %754 = arith.addf %751, %753 : vector<8x256xf32>
    %755 = vector.broadcast %163 : f32 to vector<8x256xf32>
    %756 = arith.mulf %581, %755 : vector<8x256xf32>
    %757 = arith.addf %754, %756 : vector<8x256xf32>
    %758 = vector.broadcast %191 : f32 to vector<8x256xf32>
    %759 = arith.addf %757, %758 : vector<8x256xf32>
    %cst_36 = arith.constant 0.000000e+00 : f32
    %760 = vector.broadcast %cst_36 : f32 to vector<8x256xf32>
    %761 = arith.maximumf %759, %760 : vector<8x256xf32>
    %762 = vector.broadcast %164 : f32 to vector<8x256xf32>
    %763 = arith.mulf %428, %762 : vector<8x256xf32>
    %764 = vector.broadcast %165 : f32 to vector<8x256xf32>
    %765 = arith.mulf %479, %764 : vector<8x256xf32>
    %766 = arith.addf %763, %765 : vector<8x256xf32>
    %767 = vector.broadcast %166 : f32 to vector<8x256xf32>
    %768 = arith.mulf %530, %767 : vector<8x256xf32>
    %769 = arith.addf %766, %768 : vector<8x256xf32>
    %770 = vector.broadcast %167 : f32 to vector<8x256xf32>
    %771 = arith.mulf %581, %770 : vector<8x256xf32>
    %772 = arith.addf %769, %771 : vector<8x256xf32>
    %773 = vector.broadcast %192 : f32 to vector<8x256xf32>
    %774 = arith.addf %772, %773 : vector<8x256xf32>
    %cst_37 = arith.constant 0.000000e+00 : f32
    %775 = vector.broadcast %cst_37 : f32 to vector<8x256xf32>
    %776 = arith.maximumf %774, %775 : vector<8x256xf32>
    %777 = vector.broadcast %168 : f32 to vector<8x256xf32>
    %778 = arith.mulf %428, %777 : vector<8x256xf32>
    %779 = vector.broadcast %169 : f32 to vector<8x256xf32>
    %780 = arith.mulf %479, %779 : vector<8x256xf32>
    %781 = arith.addf %778, %780 : vector<8x256xf32>
    %782 = vector.broadcast %170 : f32 to vector<8x256xf32>
    %783 = arith.mulf %530, %782 : vector<8x256xf32>
    %784 = arith.addf %781, %783 : vector<8x256xf32>
    %785 = vector.broadcast %171 : f32 to vector<8x256xf32>
    %786 = arith.mulf %581, %785 : vector<8x256xf32>
    %787 = arith.addf %784, %786 : vector<8x256xf32>
    %788 = vector.broadcast %193 : f32 to vector<8x256xf32>
    %789 = arith.addf %787, %788 : vector<8x256xf32>
    %cst_38 = arith.constant 0.000000e+00 : f32
    %790 = vector.broadcast %cst_38 : f32 to vector<8x256xf32>
    %791 = arith.maximumf %789, %790 : vector<8x256xf32>
    %792 = vector.broadcast %172 : f32 to vector<8x256xf32>
    %793 = arith.mulf %428, %792 : vector<8x256xf32>
    %794 = vector.broadcast %173 : f32 to vector<8x256xf32>
    %795 = arith.mulf %479, %794 : vector<8x256xf32>
    %796 = arith.addf %793, %795 : vector<8x256xf32>
    %797 = vector.broadcast %174 : f32 to vector<8x256xf32>
    %798 = arith.mulf %530, %797 : vector<8x256xf32>
    %799 = arith.addf %796, %798 : vector<8x256xf32>
    %800 = vector.broadcast %175 : f32 to vector<8x256xf32>
    %801 = arith.mulf %581, %800 : vector<8x256xf32>
    %802 = arith.addf %799, %801 : vector<8x256xf32>
    %803 = vector.broadcast %194 : f32 to vector<8x256xf32>
    %804 = arith.addf %802, %803 : vector<8x256xf32>
    %cst_39 = arith.constant 0.000000e+00 : f32
    %805 = vector.broadcast %cst_39 : f32 to vector<8x256xf32>
    %806 = arith.maximumf %804, %805 : vector<8x256xf32>
    %807 = vector.broadcast %176 : f32 to vector<8x256xf32>
    %808 = arith.mulf %428, %807 : vector<8x256xf32>
    %809 = vector.broadcast %177 : f32 to vector<8x256xf32>
    %810 = arith.mulf %479, %809 : vector<8x256xf32>
    %811 = arith.addf %808, %810 : vector<8x256xf32>
    %812 = vector.broadcast %178 : f32 to vector<8x256xf32>
    %813 = arith.mulf %530, %812 : vector<8x256xf32>
    %814 = arith.addf %811, %813 : vector<8x256xf32>
    %815 = vector.broadcast %179 : f32 to vector<8x256xf32>
    %816 = arith.mulf %581, %815 : vector<8x256xf32>
    %817 = arith.addf %814, %816 : vector<8x256xf32>
    %818 = vector.broadcast %195 : f32 to vector<8x256xf32>
    %819 = arith.addf %817, %818 : vector<8x256xf32>
    %cst_40 = arith.constant 0.000000e+00 : f32
    %820 = vector.broadcast %cst_40 : f32 to vector<8x256xf32>
    %821 = arith.maximumf %819, %820 : vector<8x256xf32>
    %822 = vector.broadcast %196 : f32 to vector<8x256xf32>
    %823 = arith.mulf %596, %822 : vector<8x256xf32>
    %824 = vector.broadcast %197 : f32 to vector<8x256xf32>
    %825 = arith.mulf %611, %824 : vector<8x256xf32>
    %826 = arith.addf %823, %825 : vector<8x256xf32>
    %827 = vector.broadcast %198 : f32 to vector<8x256xf32>
    %828 = arith.mulf %626, %827 : vector<8x256xf32>
    %829 = arith.addf %826, %828 : vector<8x256xf32>
    %830 = vector.broadcast %199 : f32 to vector<8x256xf32>
    %831 = arith.mulf %641, %830 : vector<8x256xf32>
    %832 = arith.addf %829, %831 : vector<8x256xf32>
    %833 = vector.broadcast %200 : f32 to vector<8x256xf32>
    %834 = arith.mulf %656, %833 : vector<8x256xf32>
    %835 = arith.addf %832, %834 : vector<8x256xf32>
    %836 = vector.broadcast %201 : f32 to vector<8x256xf32>
    %837 = arith.mulf %671, %836 : vector<8x256xf32>
    %838 = arith.addf %835, %837 : vector<8x256xf32>
    %839 = vector.broadcast %202 : f32 to vector<8x256xf32>
    %840 = arith.mulf %686, %839 : vector<8x256xf32>
    %841 = arith.addf %838, %840 : vector<8x256xf32>
    %842 = vector.broadcast %203 : f32 to vector<8x256xf32>
    %843 = arith.mulf %701, %842 : vector<8x256xf32>
    %844 = arith.addf %841, %843 : vector<8x256xf32>
    %845 = vector.broadcast %204 : f32 to vector<8x256xf32>
    %846 = arith.mulf %716, %845 : vector<8x256xf32>
    %847 = arith.addf %844, %846 : vector<8x256xf32>
    %848 = vector.broadcast %205 : f32 to vector<8x256xf32>
    %849 = arith.mulf %731, %848 : vector<8x256xf32>
    %850 = arith.addf %847, %849 : vector<8x256xf32>
    %851 = vector.broadcast %206 : f32 to vector<8x256xf32>
    %852 = arith.mulf %746, %851 : vector<8x256xf32>
    %853 = arith.addf %850, %852 : vector<8x256xf32>
    %854 = vector.broadcast %207 : f32 to vector<8x256xf32>
    %855 = arith.mulf %761, %854 : vector<8x256xf32>
    %856 = arith.addf %853, %855 : vector<8x256xf32>
    %857 = vector.broadcast %208 : f32 to vector<8x256xf32>
    %858 = arith.mulf %776, %857 : vector<8x256xf32>
    %859 = arith.addf %856, %858 : vector<8x256xf32>
    %860 = vector.broadcast %209 : f32 to vector<8x256xf32>
    %861 = arith.mulf %791, %860 : vector<8x256xf32>
    %862 = arith.addf %859, %861 : vector<8x256xf32>
    %863 = vector.broadcast %210 : f32 to vector<8x256xf32>
    %864 = arith.mulf %806, %863 : vector<8x256xf32>
    %865 = arith.addf %862, %864 : vector<8x256xf32>
    %866 = vector.broadcast %211 : f32 to vector<8x256xf32>
    %867 = arith.mulf %821, %866 : vector<8x256xf32>
    %868 = arith.addf %865, %867 : vector<8x256xf32>
    %869 = vector.broadcast %228 : f32 to vector<8x256xf32>
    %870 = arith.addf %868, %869 : vector<8x256xf32>
    %871 = vector.broadcast %212 : f32 to vector<8x256xf32>
    %872 = arith.mulf %596, %871 : vector<8x256xf32>
    %873 = vector.broadcast %213 : f32 to vector<8x256xf32>
    %874 = arith.mulf %611, %873 : vector<8x256xf32>
    %875 = arith.addf %872, %874 : vector<8x256xf32>
    %876 = vector.broadcast %214 : f32 to vector<8x256xf32>
    %877 = arith.mulf %626, %876 : vector<8x256xf32>
    %878 = arith.addf %875, %877 : vector<8x256xf32>
    %879 = vector.broadcast %215 : f32 to vector<8x256xf32>
    %880 = arith.mulf %641, %879 : vector<8x256xf32>
    %881 = arith.addf %878, %880 : vector<8x256xf32>
    %882 = vector.broadcast %216 : f32 to vector<8x256xf32>
    %883 = arith.mulf %656, %882 : vector<8x256xf32>
    %884 = arith.addf %881, %883 : vector<8x256xf32>
    %885 = vector.broadcast %217 : f32 to vector<8x256xf32>
    %886 = arith.mulf %671, %885 : vector<8x256xf32>
    %887 = arith.addf %884, %886 : vector<8x256xf32>
    %888 = vector.broadcast %218 : f32 to vector<8x256xf32>
    %889 = arith.mulf %686, %888 : vector<8x256xf32>
    %890 = arith.addf %887, %889 : vector<8x256xf32>
    %891 = vector.broadcast %219 : f32 to vector<8x256xf32>
    %892 = arith.mulf %701, %891 : vector<8x256xf32>
    %893 = arith.addf %890, %892 : vector<8x256xf32>
    %894 = vector.broadcast %220 : f32 to vector<8x256xf32>
    %895 = arith.mulf %716, %894 : vector<8x256xf32>
    %896 = arith.addf %893, %895 : vector<8x256xf32>
    %897 = vector.broadcast %221 : f32 to vector<8x256xf32>
    %898 = arith.mulf %731, %897 : vector<8x256xf32>
    %899 = arith.addf %896, %898 : vector<8x256xf32>
    %900 = vector.broadcast %222 : f32 to vector<8x256xf32>
    %901 = arith.mulf %746, %900 : vector<8x256xf32>
    %902 = arith.addf %899, %901 : vector<8x256xf32>
    %903 = vector.broadcast %223 : f32 to vector<8x256xf32>
    %904 = arith.mulf %761, %903 : vector<8x256xf32>
    %905 = arith.addf %902, %904 : vector<8x256xf32>
    %906 = vector.broadcast %224 : f32 to vector<8x256xf32>
    %907 = arith.mulf %776, %906 : vector<8x256xf32>
    %908 = arith.addf %905, %907 : vector<8x256xf32>
    %909 = vector.broadcast %225 : f32 to vector<8x256xf32>
    %910 = arith.mulf %791, %909 : vector<8x256xf32>
    %911 = arith.addf %908, %910 : vector<8x256xf32>
    %912 = vector.broadcast %226 : f32 to vector<8x256xf32>
    %913 = arith.mulf %806, %912 : vector<8x256xf32>
    %914 = arith.addf %911, %913 : vector<8x256xf32>
    %915 = vector.broadcast %227 : f32 to vector<8x256xf32>
    %916 = arith.mulf %821, %915 : vector<8x256xf32>
    %917 = arith.addf %914, %916 : vector<8x256xf32>
    %918 = vector.broadcast %229 : f32 to vector<8x256xf32>
    %919 = arith.addf %917, %918 : vector<8x256xf32>
    %c0_41 = arith.constant 0 : index
    %c0_42 = arith.constant 0 : index
    %c0_43 = arith.constant 0 : index
    %920 = vector.load %arg3[%c0_41, %c0_42, %c0_43] : memref<2x8x256xf32, #tpu.memory_space<vmem>>, vector<1x8x256xf32>
    %921 = vector.shape_cast %920 : vector<1x8x256xf32> to vector<8x256xf32>
    %922 = vector.shape_cast %870 : vector<8x256xf32> to vector<1x8x256xf32>
    tpu.vector_store %arg3[%c0_41, %c0_42, %c0_43], %922 {strides = array<i32>} : memref<2x8x256xf32, #tpu.memory_space<vmem>>, vector<1x8x256xf32>,
    %c1_44 = arith.constant 1 : index
    %c0_45 = arith.constant 0 : index
    %c0_46 = arith.constant 0 : index
    %923 = vector.load %arg3[%c1_44, %c0_45, %c0_46] : memref<2x8x256xf32, #tpu.memory_space<vmem>>, vector<1x8x256xf32>
    %924 = vector.shape_cast %923 : vector<1x8x256xf32> to vector<8x256xf32>
    %925 = vector.shape_cast %919 : vector<8x256xf32> to vector<1x8x256xf32>
    tpu.vector_store %arg3[%c1_44, %c0_45, %c0_46], %925 {strides = array<i32>} : memref<2x8x256xf32, #tpu.memory_space<vmem>>, vector<1x8x256xf32>,
    return
  }
  func.func @transform_0(%arg0: i32) -> (i32, i32, i32) {
    %c0_i32 = arith.constant 0 : i32
    %c0_i32_0 = arith.constant 0 : i32
    %c0_i32_1 = arith.constant 0 : i32
    return %c0_i32, %c0_i32_0, %arg0 : i32, i32, i32
  }
  func.func @transform_1(%arg0: i32) -> i32 {
    %c0_i32 = arith.constant 0 : i32
    %c0_i32_0 = arith.constant 0 : i32
    return %c0_i32 : i32
  }
  func.func @transform_2(%arg0: i32) -> (i32, i32, i32) {
    %c0_i32 = arith.constant 0 : i32
    %c0_i32_0 = arith.constant 0 : i32
    %c0_i32_1 = arith.constant 0 : i32
    return %c0_i32, %c0_i32_0, %arg0 : i32, i32, i32
  }
}

</mosaic_0001>

<bundles_post_ra>
// kernel: vae_forward.1
= control target key start
LH: loop header
LB: loop body
LE: loop exit
PB: predicated region body
PF: predicated region fallthrough
CT: control target
= control target key end

     0   :  { %7 = vsyncpa [#allocation3], 0  ;;  %s2979_s0 = inlined_call_operand.vmem [shape: f32[2,8,256], index: 0, kind: input, shape index: {}]   ;;  %s2980_s1 = inlined_call_operand.vmem [shape: f32[230], index: 1, kind: input, shape index: {}]   ;;  %s2981_s2 = inlined_call_operand.vmem [shape: f32[2,8,256], index: 2, kind: output, shape index: {}]  }
   0x1   :  { %s16_s11 = sshll.u32 %s2980_s1, 4  ;;  %s17_s11 = int_to_ptr.vmem [resolvable:$true] %s16_s11 }
   0x2   :  { %s1573_s12 = scalar_lea.vmem %s17_s11, 32  ;;  %p1578_p1 = scmp.lt.s32.totalorder %s17_s11, %s17_s11 }
   0x3   :  { %p1574_p0 = scmp.ne.s32.totalorder %s17_s11, %s1573_s12  ;;  %p1579_p2 = scmp.lt.s32.totalorder %s1573_s12, %s1573_s12 }
   0x5   :  { %p1580_p3 = por %p1579_p2, %p1578_p1 }
   0x7   :  { %p1581_p4 = pnand %p1580_p3, %p1574_p0 }
   0x9   :  { %1584 = shalt.err (!%p1581_p4)
}
   0xa   :  { %s1587_s13 = smov [#allocation2]  }
   0xb   :  { %19 = dma.vmem_to_smem %s17_s11, 32, %s1587_s13, [#allocation3]  }
   0xc   :  { %1585 = dma.done.wait [#allocation3], 32  }
   0xd   :  { %1586 = vsyncadd [#allocation3], 4294967264 }
   0xe   :  { %23 = sfence }
   0xf   :  { %s24_s14 = sld [smem:[#allocation2]]  ;;  %s1339_s15 = sld [smem:[#allocation2 + $0x1]]  ;;  %v1617_v0 = vld [vmem:[%s2979_s0] sm:$0xff]  ;;  %v1622_v1 = vld [vmem:[%s2979_s0 + $0x8] sm:$0xff]  ;;  %v1627_v2 = vld [vmem:[%s2979_s0 + $0x10] sm:$0xff] }
  0x10   :  { %s1340_s16 = sld [smem:[#allocation2 + $0x2]]  ;;  %s1341_s17 = sld [smem:[#allocation2 + $0x3]]  ;;  %v1632_v3 = vld [vmem:[%s2979_s0 + $0x18] sm:$0xff] }
  0x11   :  { %s1606_s18 = sld [smem:[#allocation2 + $0x4]]  ;;  %s1608_s1 = sld [smem:[#allocation2 + $0x5]] }
  0x12   :  { %s1610_s19 = sld [smem:[#allocation2 + $0x6]]  ;;  %s1612_s20 = sld [smem:[#allocation2 + $0x7]] }
  0x13   :  { %s1634_s29 = sld [smem:[#allocation2 + $0x8]]  ;;  %s1636_s30 = sld [smem:[#allocation2 + $0x9]] }
  0x14   :  { %s1638_s3 = sld [smem:[#allocation2 + $0xa]]  ;;  %s1640_s4 = sld [smem:[#allocation2 + $0xb]] }
  0x15   :  { %v259_v4 = vstv %s24_s14  ;;  %v262_v5 = vstv %s1339_s15  ;;  %s1648_s0 = sld [smem:[#allocation2 + $0xc]]  ;;  %s1650_s5 = sld [smem:[#allocation2 + $0xd]] }
  0x16   :  { %v260_v6 = vmul.f32 %v259_v4, %v1617_v0  ;;  %v261_v7 = vmul.f32 %v259_v4, %v1622_v1  ;;  %v263_v8 = vmul.f32 %v1627_v2, %v262_v5  ;;  %v264_v9 = vmul.f32 %v1632_v3, %v262_v5  ;;  %s1662_s6 = sld [smem:[#allocation2 + $0xe]]  ;;  %s1664_s7 = sld [smem:[#allocation2 + $0xf]] }
  0x17   :  { %v272_v10 = vstv %s1340_s16  ;;  %v275_v11 = vstv %s1341_s17  ;;  %v285_v12 = vstv %s1606_s18  ;;  %v288_v13 = vstv %s1608_s1  ;;  %s1670_s8 = sld [smem:[#allocation2 + $0x10]]  ;;  %s1672_s9 = sld [smem:[#allocation2 + $0x11]] }
  0x18   :  { %v1652_v14 = vadd.f32 %v263_v8, %v260_v6  ;;  %v1654_v15 = vadd.f32 %v264_v9, %v261_v7  ;;  %v273_v16 = vmul.f32 %v272_v10, %v1617_v0  ;;  %v274_v17 = vmul.f32 %v272_v10, %v1622_v1  ;;  %s1684_s10 = sld [smem:[#allocation2 + $0x20]]  ;;  %s1686_s11 = sld [smem:[#allocation2 + $0x21]] }
  0x19   :  { %v276_v18 = vmul.f32 %v1627_v2, %v275_v11  ;;  %v277_v19 = vmul.f32 %v1632_v3, %v275_v11  ;;  %v286_v20 = vmul.f32 %v285_v12, %v1617_v0  ;;  %v287_v21 = vmul.f32 %v285_v12, %v1622_v1  ;;  %s1692_s12 = sld [smem:[#allocation2 + $0x22]]  ;;  %s1694_s13 = sld [smem:[#allocation2 + $0x23]] }
  0x1a   :  { %v289_v22 = vmul.f32 %v1627_v2, %v288_v13  ;;  %v290_v23 = vmul.f32 %v1632_v3, %v288_v13  ;;  %v298_v24 = vstv %s1610_s19  ;;  %v301_v25 = vstv %s1612_s20  ;;  %s1700_s14 = sld [smem:[#allocation2 + $0x24]]  ;;  %s1702_s15 = sld [smem:[#allocation2 + $0x25]] }
  0x1b   :  { %v278_v26 = vadd.f32 %v276_v18, %v273_v16  ;;  %v279_v27 = vadd.f32 %v277_v19, %v274_v17  ;;  %v299_v28 = vmul.f32 %v298_v24, %v1617_v0  ;;  %v300_v29 = vmul.f32 %v298_v24, %v1622_v1  ;;  %s1712_s16 = sld [smem:[#allocation2 + $0x26]]  ;;  %s1720_s17 = sld [smem:[#allocation2 + $0x27]] }
  0x1c   :  { %v291_v30 = vadd.f32 %v289_v22, %v286_v20  ;;  %v292_v31 = vadd.f32 %v290_v23, %v287_v21  ;;  %v302_v32 = vmul.f32 %v1627_v2, %v301_v25  ;;  %v303_v33 = vmul.f32 %v1632_v3, %v301_v25  ;;  %s1728_s18 = sld [smem:[#allocation2 + $0x12]]  ;;  %s1730_s1 = sld [smem:[#allocation2 + $0x28]] }
  0x1d   :  { %v311_v34 = vstv %s1634_s29  ;;  %v314_v35 = vstv %s1636_s30  ;;  %v324_v36 = vstv %s1638_s3  ;;  %v327_v37 = vstv %s1640_s4  ;;  %s1740_s19 = sld [smem:[#allocation2 + $0x13]]  ;;  %s1742_s20 = sld [smem:[#allocation2 + $0x29]] }
  0x1e   :  { %v304_v38 = vadd.f32 %v302_v32, %v299_v28  ;;  %v305_v39 = vadd.f32 %v303_v33, %v300_v29  ;;  %v312_v40 = vmul.f32 %v311_v34, %v1617_v0  ;;  %v313_v41 = vmul.f32 %v311_v34, %v1622_v1  ;;  %s1748_s21 = sld [smem:[#allocation2 + $0x14]]  ;;  %s1754_s22 = sld [smem:[#allocation2 + $0x15]] }
  0x1f   :  { %v315_v42 = vmul.f32 %v1627_v2, %v314_v35  ;;  %v316_v43 = vmul.f32 %v1632_v3, %v314_v35  ;;  %v325_v44 = vmul.f32 %v324_v36, %v1617_v0  ;;  %v326_v45 = vmul.f32 %v324_v36, %v1622_v1  ;;  %s1765_s23 = sld [smem:[#allocation2 + $0x16]]  ;;  %s1767_s24 = sld [smem:[#allocation2 + $0x2a]] }
  0x20   :  { %v328_v46 = vmul.f32 %v1627_v2, %v327_v37  ;;  %v329_v47 = vmul.f32 %v1632_v3, %v327_v37  ;;  %v337_v48 = vstv %s1648_s0  ;;  %v340_v49 = vstv %s1650_s5  ;;  %s1777_s25 = sld [smem:[#allocation2 + $0x17]]  ;;  %s1779_s26 = sld [smem:[#allocation2 + $0x2b]] }
  0x21   :  { %v317_v50 = vadd.f32 %v315_v42, %v312_v40  ;;  %v318_v51 = vadd.f32 %v316_v43, %v313_v41  ;;  %v338_v52 = vmul.f32 %v337_v48, %v1617_v0  ;;  %v339_v53 = vmul.f32 %v337_v48, %v1622_v1  ;;  %s1788_s27 = sld [smem:[#allocation2 + $0x18]]  ;;  %s1790_s28 = sld [smem:[#allocation2 + $0x19]] }
  0x22   :  { %v330_v54 = vadd.f32 %v328_v46, %v325_v44  ;;  %v331_v55 = vadd.f32 %v329_v47, %v326_v45  ;;  %v341_v56 = vmul.f32 %v1627_v2, %v340_v49  ;;  %v342_v57 = vmul.f32 %v1632_v3, %v340_v49  ;;  %s1799_s29 = sld [smem:[#allocation2 + $0x1a]]  ;;  %s1804_s30 = sld [smem:[#allocation2 + $0x1b]] }
  0x23   :  { %v350_v58 = vstv %s1662_s6  ;;  %v353_v59 = vstv %s1664_s7  ;;  %v363_v60 = vstv %s1670_s8  ;;  %v366_v61 = vstv %s1672_s9  ;;  %s1806_s3 = sld [smem:[#allocation2 + $0x2c]]  ;;  %s1817_s4 = sld [smem:[#allocation2 + $0x2d]] }
  0x24   :  { %v343_v62 = vadd.f32 %v341_v56, %v338_v52  ;;  %v344_v63 = vadd.f32 %v342_v57, %v339_v53  ;;  %v351_v4 = vmul.f32 %v350_v58, %v1617_v0  ;;  %v352_v5 = vmul.f32 %v350_v58, %v1622_v1  ;;  %s1822_s0 = sld [smem:[#allocation2 + $0x1c]]  ;;  %s1824_s5 = sld [smem:[#allocation2 + $0x1d]] }
  0x25   :  { %v267_v6 = vstv %s1684_s10  ;;  %v280_v7 = vstv %s1686_s11  ;;  %v354_v8 = vmul.f32 %v1627_v2, %v353_v59  ;;  %v355_v9 = vmul.f32 %v1632_v3, %v353_v59  ;;  %s1834_s6 = sld [smem:[#allocation2 + $0x1e]]  ;;  %s1836_s7 = sld [smem:[#allocation2 + $0x1f]] }
  0x26   :  { %v268_v10 = vadd.f32 %v267_v6, %v1652_v14  ;;  %v269_v11 = vadd.f32 %v267_v6, %v1654_v15  ;;  %v281_v12 = vadd.f32 %v280_v7, %v278_v26  ;;  %v282_v13 = vadd.f32 %v280_v7, %v279_v27  ;;  %s1842_s8 = sld [smem:[#allocation2 + $0x2e]]  ;;  %s1844_s9 = sld [smem:[#allocation2 + $0x2f]] }
  0x27   :  { %v293_v16 = vstv %s1692_s12  ;;  %v306_v17 = vstv %s1694_s13  ;;  %v319_v18 = vstv %s1700_s14  ;;  %v332_v19 = vstv %s1702_s15  ;;  %s1854_s10 = sld [smem:[#allocation2 + $0x30]]  ;;  %s1856_s11 = sld [smem:[#allocation2 + $0x31]] }
  0x28   :  { %v1732_v20 = vmax.f32 %v268_v10, 0.0  ;;  %v1734_v21 = vmax.f32 %v269_v11, 0.0  ;;  %v294_v22 = vadd.f32 %v293_v16, %v291_v30  ;;  %v295_v23 = vadd.f32 %v293_v16, %v292_v31  ;;  %s1868_s12 = sld [smem:[#allocation2 + $0x32]]  ;;  %s1870_s13 = sld [smem:[#allocation2 + $0x33]] }
  0x29   :  { %v1736_v24 = vmax.f32 %v281_v12, 0.0  ;;  %v1738_v14 = vmax.f32 %v282_v13, 0.0  ;;  %v307_v15 = vadd.f32 %v306_v17, %v304_v38  ;;  %v308_v25 = vadd.f32 %v306_v17, %v305_v39  ;;  %s1884_s14 = sld [smem:[#allocation2 + $0x34]]  ;;  %s1886_s15 = sld [smem:[#allocation2 + $0x35]] }
  0x2a   :  { %v1744_v26 = vmax.f32 %v294_v22, 0.0  ;;  %v1746_v27 = vmax.f32 %v295_v23, 0.0  ;;  %v320_v28 = vadd.f32 %v319_v18, %v317_v50  ;;  %v321_v29 = vadd.f32 %v319_v18, %v318_v51 }
  0x2b   :  { %v1750_v30 = vmax.f32 %v307_v15, 0.0  ;;  %v1752_v31 = vmax.f32 %v308_v25, 0.0  ;;  %v333_v32 = vadd.f32 %v332_v19, %v330_v54  ;;  %v334_v33 = vadd.f32 %v332_v19, %v331_v55 }
  0x2c   :  { %3005 = vst [vmem:[#allocation5_spill] sm:$0xff] %v1744_v26  ;;  %3006 = vst [vmem:[#allocation6_spill] sm:$0xff] %v1746_v27  ;;  %v1756_v34 = vmax.f32 %v320_v28, 0.0  ;;  %v1758_v35 = vmax.f32 %v321_v29, 0.0  ;;  %v345_v36 = vstv %s1712_s16  ;;  %v356_v37 = vadd.f32 %v354_v8, %v351_v4  ;;  %s1896_s16 = sld [smem:[#allocation2 + $0x36]] }
  0x2d   :  { %3007 = vst [vmem:[#allocation7_spill] sm:$0xff] %v1750_v30  ;;  %v1761_v38 = vmax.f32 %v333_v32, 0.0  ;;  %v1763_v39 = vmax.f32 %v334_v33, 0.0  ;;  %v346_v40 = vadd.f32 %v345_v36, %v343_v62  ;;  %v347_v41 = vadd.f32 %v345_v36, %v344_v63 }
  0x2e   :  { %3008 = vst [vmem:[#allocation8_spill] sm:$0xff] %v1756_v34  ;;  %v357_v42 = vadd.f32 %v355_v9, %v352_v5  ;;  %v358_v43 = vstv %s1720_s17  ;;  %v364_v44 = vmul.f32 %v363_v60, %v1617_v0  ;;  %v365_v45 = vmul.f32 %v363_v60, %v1622_v1  ;;  %s1898_s17 = sld [smem:[#allocation2 + $0x37]] }
  0x2f   :  { %v1772_v46 = vmax.f32 %v346_v40, 0.0  ;;  %v1774_v47 = vmax.f32 %v347_v41, 0.0  ;;  %v359_v48 = vadd.f32 %v358_v43, %v356_v37  ;;  %v367_v49 = vmul.f32 %v1627_v2, %v366_v61 }
  0x30   :  { %v360_v50 = vadd.f32 %v358_v43, %v357_v42  ;;  %v368_v51 = vmul.f32 %v1632_v3, %v366_v61  ;;  %v371_v52 = vstv %s1730_s1  ;;  %v376_v53 = vstv %s1728_s18  ;;  %s1904_s18 = sld [smem:[#allocation2 + $0x38]]  ;;  %s1906_s1 = sld [smem:[#allocation2 + $0x39]] }
  0x31   :  { %v1784_v54 = vmax.f32 %v359_v48, 0.0  ;;  %v369_v55 = vadd.f32 %v367_v49, %v364_v44  ;;  %v377_v56 = vmul.f32 %v376_v53, %v1617_v0  ;;  %v378_v57 = vmul.f32 %v376_v53, %v1622_v1 }
  0x32   :  { %v1792_v58 = vmax.f32 %v360_v50, 0.0  ;;  %v370_v59 = vadd.f32 %v368_v51, %v365_v45  ;;  %v379_v60 = vstv %s1740_s19  ;;  %v384_v61 = vstv %s1742_s20  ;;  %s1916_s19 = sld [smem:[#allocation2 + $0x3a]]  ;;  %s1918_s20 = sld [smem:[#allocation2 + $0x3b]] }
  0x33   :  { %v372_v62 = vadd.f32 %v371_v52, %v369_v55  ;;  %v380_v63 = vmul.f32 %v1627_v2, %v379_v60  ;;  %v381_v4 = vmul.f32 %v1632_v3, %v379_v60  ;;  %v389_v5 = vstv %s1748_s21  ;;  %s1928_s21 = sld [smem:[#allocation2 + $0x3c]] }
  0x34   :  { %v373_v6 = vadd.f32 %v371_v52, %v370_v59  ;;  %v390_v7 = vmul.f32 %v389_v5, %v1617_v0  ;;  %v391_v8 = vmul.f32 %v389_v5, %v1622_v1  ;;  %v392_v9 = vstv %s1754_s22  ;;  %s1930_s22 = sld [smem:[#allocation2 + $0x3d]] }
  0x35   :  { %v1808_v10 = vmax.f32 %v372_v62, 0.0  ;;  %v382_v11 = vadd.f32 %v380_v63, %v377_v56  ;;  %v383_v12 = vadd.f32 %v381_v4, %v378_v57  ;;  %v393_v13 = vmul.f32 %v1627_v2, %v392_v9 }
  0x36   :  { %v1811_v16 = vmax.f32 %v373_v6, 0.0  ;;  %v394_v17 = vmul.f32 %v1632_v3, %v392_v9  ;;  %v397_v18 = vstv %s1767_s24  ;;  %v402_v19 = vstv %s1765_s23  ;;  %s1938_s23 = sld [smem:[#allocation2 + $0x3e]]  ;;  %s1940_s24 = sld [smem:[#allocation2 + $0x3f]] }
  0x37   :  { %v385_v22 = vadd.f32 %v384_v61, %v382_v11  ;;  %v386_v23 = vadd.f32 %v384_v61, %v383_v12  ;;  %v395_v15 = vadd.f32 %v393_v13, %v390_v7  ;;  %v403_v25 = vmul.f32 %v402_v19, %v1617_v0 }
  0x38   :  { %v396_v28 = vadd.f32 %v394_v17, %v391_v8  ;;  %v404_v29 = vmul.f32 %v402_v19, %v1622_v1  ;;  %v405_v32 = vstv %s1777_s25  ;;  %v410_v33 = vstv %s1779_s26  ;;  %s1948_s25 = sld [smem:[#allocation2 + $0x40]] }
  0x39   :  { %v1826_v36 = vmax.f32 %v385_v22, 0.0  ;;  %v1828_v37 = vmax.f32 %v386_v23, 0.0  ;;  %v398_v40 = vadd.f32 %v397_v18, %v395_v15  ;;  %v406_v41 = vmul.f32 %v1627_v2, %v405_v32  ;;  %s1950_s26 = sld [smem:[#allocation2 + $0x70]] }
  0x3a   :  { %v399_v42 = vadd.f32 %v397_v18, %v396_v28  ;;  %v407_v43 = vmul.f32 %v1632_v3, %v405_v32  ;;  %v415_v44 = vstv %s1788_s27  ;;  %v418_v45 = vstv %s1790_s28  ;;  %s1954_s27 = sld [smem:[#allocation2 + $0x41]]  ;;  %s1956_s28 = sld [smem:[#allocation2 + $0x42]] }
  0x3b   :  { %v1838_v48 = vmax.f32 %v398_v40, 0.0  ;;  %v408_v49 = vadd.f32 %v406_v41, %v403_v25  ;;  %v416_v50 = vmul.f32 %v415_v44, %v1617_v0  ;;  %v417_v51 = vmul.f32 %v415_v44, %v1622_v1 }
  0x3c   :  { %v1846_v52 = vmax.f32 %v399_v42, 0.0  ;;  %v409_v53 = vadd.f32 %v407_v43, %v404_v29  ;;  %v419_v55 = vmul.f32 %v1627_v2, %v418_v45  ;;  %v420_v56 = vmul.f32 %v1632_v3, %v418_v45 }
  0x3d   :  { %v411_v57 = vadd.f32 %v410_v33, %v408_v49  ;;  %v423_v59 = vstv %s1806_s3  ;;  %v428_v60 = vstv %s1799_s29  ;;  %v431_v61 = vstv %s1804_s30  ;;  %s1964_s29 = sld [smem:[#allocation2 + $0x43]]  ;;  %s1966_s30 = sld [smem:[#allocation2 + $0x44]] }
  0x3e   :  { %v412_v62 = vadd.f32 %v410_v33, %v409_v53  ;;  %v421_v63 = vadd.f32 %v419_v55, %v416_v50  ;;  %v422_v4 = vadd.f32 %v420_v56, %v417_v51  ;;  %v429_v5 = vmul.f32 %v428_v60, %v1617_v0  ;;  %s1978_s3 = sld [smem:[#allocation2 + $0x45]] }
  0x3f   :  { %v1858_v6 = vmax.f32 %v411_v57, 0.0  ;;  %v430_v7 = vmul.f32 %v428_v60, %v1622_v1  ;;  %v432_v8 = vmul.f32 %v1627_v2, %v431_v61  ;;  %v433_v9 = vmul.f32 %v1632_v3, %v431_v61 }
  0x40   :  { %v1863_v11 = vmax.f32 %v412_v62, 0.0  ;;  %v424_v12 = vadd.f32 %v423_v59, %v421_v63  ;;  %v425_v13 = vadd.f32 %v423_v59, %v422_v4  ;;  %v436_v17 = vstv %s1817_s4  ;;  %s1980_s4 = sld [smem:[#allocation2 + $0x46]] }
  0x41   :  { %v434_v18 = vadd.f32 %v432_v8, %v429_v5  ;;  %v435_v19 = vadd.f32 %v433_v9, %v430_v7  ;;  %v441_v22 = vstv %s1822_s0  ;;  %v444_v23 = vstv %s1824_s5  ;;  %s1984_s0 = sld [smem:[#allocation2 + $0x47]]  ;;  %s1986_s5 = sld [smem:[#allocation2 + $0x48]] }
  0x42   :  { %v1872_v15 = vmax.f32 %v424_v12, 0.0  ;;  %v1874_v25 = vmax.f32 %v425_v13, 0.0  ;;  %v442_v28 = vmul.f32 %v441_v22, %v1617_v0  ;;  %v443_v29 = vmul.f32 %v441_v22, %v1622_v1 }
  0x43   :  { %v437_v32 = vadd.f32 %v436_v17, %v434_v18  ;;  %v438_v33 = vadd.f32 %v436_v17, %v435_v19  ;;  %v445_v40 = vmul.f32 %v1627_v2, %v444_v23  ;;  %v446_v41 = vmul.f32 %v1632_v3, %v444_v23 }
  0x44   :  { %v449_v42 = vstv %s1842_s8  ;;  %v454_v43 = vstv %s1834_s6  ;;  %v457_v44 = vstv %s1836_s7  ;;  %v462_v45 = vstv %s1844_s9  ;;  %s2008_s6 = sld [smem:[#allocation2 + $0x49]]  ;;  %s2010_s7 = sld [smem:[#allocation2 + $0x4a]] }
  0x45   :  { %v1888_v49 = vmax.f32 %v437_v32, 0.0  ;;  %v1890_v50 = vmax.f32 %v438_v33, 0.0  ;;  %v447_v51 = vadd.f32 %v445_v40, %v442_v28  ;;  %v448_v53 = vadd.f32 %v446_v41, %v443_v29  ;;  %s2012_s8 = sld [smem:[#allocation2 + $0x4b]]  ;;  %s2014_s9 = sld [smem:[#allocation2 + $0x4c]] }
  0x46   :  { %v455_v55 = vmul.f32 %v454_v43, %v1617_v0  ;;  %v456_v56 = vmul.f32 %v454_v43, %v1622_v1  ;;  %v458_v57 = vmul.f32 %v1627_v2, %v457_v44  ;;  %v459_v59 = vmul.f32 %v1632_v3, %v457_v44 }
  0x47   :  { %v450_v60 = vadd.f32 %v449_v42, %v447_v51  ;;  %v451_v61 = vadd.f32 %v449_v42, %v448_v53  ;;  %v467_v62 = vstv %s1854_s10  ;;  %v470_v63 = vstv %s1856_s11  ;;  %s2028_s10 = sld [smem:[#allocation2 + $0x4d]]  ;;  %s2030_s11 = sld [smem:[#allocation2 + $0x4e]] }
  0x48   :  { %v460_v4 = vadd.f32 %v458_v57, %v455_v55  ;;  %v461_v5 = vadd.f32 %v459_v59, %v456_v56  ;;  %v468_v0 = vmul.f32 %v467_v62, %v1732_v20  ;;  %v469_v1 = vmul.f32 %v467_v62, %v1734_v21 }
  0x49   :  { %v1908_v2 = vmax.f32 %v450_v60, 0.0  ;;  %v1910_v3 = vmax.f32 %v451_v61, 0.0  ;;  %v471_v7 = vmul.f32 %v470_v63, %v1736_v24  ;;  %v472_v8 = vmul.f32 %v470_v63, %v1738_v14 }
  0x4a   :  { %v463_v9 = vadd.f32 %v462_v45, %v460_v4  ;;  %v464_v12 = vadd.f32 %v462_v45, %v461_v5  ;;  %v475_v13 = vstv %s1868_s12  ;;  %v480_v17 = vstv %s1870_s13  ;;  %s2032_s12 = sld [smem:[#allocation2 + $0x4f]]  ;;  %s2034_s13 = sld [smem:[#allocation2 + $0x71]] }
  0x4b   :  { %v473_v18 = vadd.f32 %v471_v7, %v468_v0  ;;  %v474_v19 = vadd.f32 %v472_v8, %v469_v1  ;;  %v476_v22 = vmul.f32 %v475_v13, %v1744_v26  ;;  %v477_v23 = vmul.f32 %v475_v13, %v1746_v27 }
  0x4c   :  { %v1922_v28 = vmax.f32 %v463_v9, 0.0  ;;  %v1924_v29 = vmax.f32 %v464_v12, 0.0  ;;  %v481_v32 = vmul.f32 %v480_v17, %v1750_v30  ;;  %v482_v33 = vmul.f32 %v480_v17, %v1752_v31 }
  0x4d   :  { %v478_v40 = vadd.f32 %v476_v22, %v473_v18  ;;  %v479_v41 = vadd.f32 %v477_v23, %v474_v19  ;;  %v485_v42 = vstv %s1884_s14  ;;  %v490_v43 = vstv %s1886_s15  ;;  %s2044_s14 = sld [smem:[#allocation2 + $0x50]]  ;;  %s2046_s15 = sld [smem:[#allocation2 + $0x51]] }
  0x4e   :  { %v486_v44 = vmul.f32 %v485_v42, %v1756_v34  ;;  %v487_v45 = vmul.f32 %v485_v42, %v1758_v35  ;;  %v491_v51 = vmul.f32 %v490_v43, %v1761_v38  ;;  %v492_v53 = vmul.f32 %v490_v43, %v1763_v39 }
  0x4f   :  { %v483_v55 = vadd.f32 %v481_v32, %v478_v40  ;;  %v484_v56 = vadd.f32 %v482_v33, %v479_v41  ;;  %v495_v57 = vstv %s1896_s16  ;;  %v500_v59 = vstv %s1898_s17  ;;  %s2054_s16 = sld [smem:[#allocation2 + $0x52]]  ;;  %s2056_s17 = sld [smem:[#allocation2 + $0x53]] }
  0x50   :  { %v496_v60 = vmul.f32 %v495_v57, %v1772_v46  ;;  %v497_v61 = vmul.f32 %v495_v57, %v1774_v47  ;;  %v501_v62 = vmul.f32 %v500_v59, %v1784_v54  ;;  %v502_v63 = vmul.f32 %v500_v59, %v1792_v58 }
  0x51   :  { %v488_v4 = vadd.f32 %v486_v44, %v483_v55  ;;  %v489_v5 = vadd.f32 %v487_v45, %v484_v56  ;;  %v505_v0 = vstv %s1904_s18  ;;  %v510_v1 = vstv %s1906_s1  ;;  %s2070_s18 = sld [smem:[#allocation2 + $0x54]]  ;;  %s2072_s1 = sld [smem:[#allocation2 + $0x55]] }
  0x52   :  { %v506_v7 = vmul.f32 %v505_v0, %v1808_v10  ;;  %v507_v8 = vmul.f32 %v505_v0, %v1811_v16  ;;  %v511_v9 = vmul.f32 %v510_v1, %v1826_v36  ;;  %v512_v12 = vmul.f32 %v510_v1, %v1828_v37 }
  0x53   :  { %v493_v13 = vadd.f32 %v491_v51, %v488_v4  ;;  %v494_v17 = vadd.f32 %v492_v53, %v489_v5  ;;  %v515_v18 = vstv %s1916_s19  ;;  %v520_v19 = vstv %s1918_s20  ;;  %s2084_s19 = sld [smem:[#allocation2 + $0x56]]  ;;  %s2086_s20 = sld [smem:[#allocation2 + $0x57]] }
  0x54   :  { %v516_v22 = vmul.f32 %v515_v18, %v1838_v48  ;;  %v517_v23 = vmul.f32 %v515_v18, %v1846_v52  ;;  %v521_v32 = vmul.f32 %v520_v19, %v1858_v6  ;;  %v522_v33 = vmul.f32 %v520_v19, %v1863_v11 }
  0x55   :  { %v498_v40 = vadd.f32 %v496_v60, %v493_v13  ;;  %v499_v41 = vadd.f32 %v497_v61, %v494_v17  ;;  %v525_v42 = vstv %s1928_s21  ;;  %v530_v43 = vstv %s1930_s22  ;;  %s2096_s21 = sld [smem:[#allocation2 + $0x58]]  ;;  %s2098_s22 = sld [smem:[#allocation2 + $0x59]] }
  0x56   :  { %v526_v44 = vmul.f32 %v525_v42, %v1872_v15  ;;  %v527_v45 = vmul.f32 %v525_v42, %v1874_v25  ;;  %v531_v51 = vmul.f32 %v530_v43, %v1888_v49  ;;  %v532_v53 = vmul.f32 %v530_v43, %v1890_v50 }
  0x57   :  { %v503_v55 = vadd.f32 %v501_v62, %v498_v40  ;;  %v504_v56 = vadd.f32 %v502_v63, %v499_v41  ;;  %v535_v57 = vstv %s1938_s23  ;;  %v540_v59 = vstv %s1940_s24  ;;  %s2106_s23 = sld [smem:[#allocation2 + $0x5a]]  ;;  %s2108_s24 = sld [smem:[#allocation2 + $0x5b]] }
  0x58   :  { %v536_v60 = vmul.f32 %v535_v57, %v1908_v2  ;;  %v537_v61 = vmul.f32 %v535_v57, %v1910_v3  ;;  %v1991_v4 = vmul.f32 %v540_v59, %v1922_v28  ;;  %v1994_v5 = vmul.f32 %v540_v59, %v1924_v29 }
  0x59   :  { %v508_v62 = vadd.f32 %v506_v7, %v503_v55  ;;  %v509_v63 = vadd.f32 %v507_v8, %v504_v56  ;;  %v550_v1 = vstv %s1948_s25  ;;  %v553_v18 = vstv %s1954_s27  ;;  %s2114_s25 = sld [smem:[#allocation2 + $0x5c]]  ;;  %s2122_s27 = sld [smem:[#allocation2 + $0x5e]] }
  0x5a   :  { %v551_v13 = vmul.f32 %v550_v1, %v1732_v20  ;;  %v552_v17 = vmul.f32 %v550_v1, %v1734_v21  ;;  %v558_v19 = vstv %s1956_s28  ;;  %v554_v42 = vmul.f32 %v553_v18, %v1736_v24  ;;  %s2124_s28 = sld [smem:[#allocation2 + $0x5f]] }
  0x5b   :  { %v513_v40 = vadd.f32 %v511_v9, %v508_v62  ;;  %v514_v41 = vadd.f32 %v512_v12, %v509_v63  ;;  %v555_v43 = vmul.f32 %v553_v18, %v1738_v14  ;;  %v559_v57 = vmul.f32 %v558_v19, %v1744_v26 }
  0x5c   :  { %v560_v59 = vmul.f32 %v558_v19, %v1746_v27  ;;  %v563_v7 = vstv %s1964_s29  ;;  %v568_v8 = vstv %s1966_s30  ;;  %v556_v12 = vadd.f32 %v554_v42, %v551_v13  ;;  %s2130_s29 = sld [smem:[#allocation2 + $0x60]]  ;;  %s2132_s30 = sld [smem:[#allocation2 + $0x72]] }
  0x5d   :  { %v518_v55 = vadd.f32 %v516_v22, %v513_v40  ;;  %v519_v9 = vadd.f32 %v517_v23, %v514_v41  ;;  %v557_v56 = vadd.f32 %v555_v43, %v552_v17  ;;  %v564_v62 = vmul.f32 %v563_v7, %v1750_v30 }
  0x5e   :  { %v565_v63 = vmul.f32 %v563_v7, %v1752_v31  ;;  %v569_v1 = vmul.f32 %v568_v8, %v1756_v34  ;;  %v570_v18 = vmul.f32 %v568_v8, %v1758_v35  ;;  %v561_v22 = vadd.f32 %v559_v57, %v556_v12 }
  0x5f   :  { %v523_v19 = vadd.f32 %v521_v32, %v518_v55  ;;  %v524_v0 = vadd.f32 %v522_v33, %v519_v9  ;;  %v562_v40 = vadd.f32 %v560_v59, %v557_v56  ;;  %v573_v23 = vstv %s1978_s3  ;;  %s2140_s3 = sld [smem:[#allocation2 + $0x61]] }
  0x60   :  { %v578_v41 = vstv %s1980_s4  ;;  %v583_v13 = vstv %s1984_s0  ;;  %v588_v17 = vstv %s1986_s5  ;;  %v566_v27 = vadd.f32 %v564_v62, %v561_v22  ;;  %s2142_s4 = sld [smem:[#allocation2 + $0x62]]  ;;  %s2146_s0 = sld [smem:[#allocation2 + $0x63]] }
  0x61   :  { %v528_v42 = vadd.f32 %v526_v44, %v523_v19  ;;  %v529_v43 = vadd.f32 %v527_v45, %v524_v0  ;;  %v567_v26 = vadd.f32 %v565_v63, %v562_v40  ;;  %v574_v30 = vmul.f32 %v573_v23, %v1761_v38  ;;  %s2148_s5 = sld [smem:[#allocation2 + $0x64]] }
  0x62   :  { %v575_v7 = vmul.f32 %v573_v23, %v1763_v39  ;;  %v579_v34 = vmul.f32 %v578_v41, %v1772_v46  ;;  %v580_v8 = vmul.f32 %v578_v41, %v1774_v47  ;;  %v571_v44 = vadd.f32 %v569_v1, %v566_v27 }
  0x63   :  { %v533_v32 = vadd.f32 %v531_v51, %v528_v42  ;;  %v534_v33 = vadd.f32 %v532_v53, %v529_v43  ;;  %v572_v45 = vadd.f32 %v570_v18, %v567_v26  ;;  %v584_v0 = vmul.f32 %v583_v13, %v1784_v54 }
  0x64   :  { %v585_v57 = vmul.f32 %v583_v13, %v1792_v58  ;;  %v589_v59 = vmul.f32 %v588_v17, %v1808_v10  ;;  %v590_v55 = vmul.f32 %v588_v17, %v1811_v16  ;;  %v576_v51 = vadd.f32 %v574_v30, %v571_v44 }
  0x65   :  { %v538_v9 = vadd.f32 %v536_v60, %v533_v32  ;;  %v539_v12 = vadd.f32 %v537_v61, %v534_v33  ;;  %v577_v56 = vadd.f32 %v575_v7, %v572_v45  ;;  %v593_v53 = vstv %s2008_s6  ;;  %s2164_s6 = sld [smem:[#allocation2 + $0x65]] }
  0x66   :  { %v598_v27 = vstv %s2010_s7  ;;  %v603_v26 = vstv %s2012_s8  ;;  %v608_v62 = vstv %s2014_s9  ;;  %v581_v18 = vadd.f32 %v579_v34, %v576_v51  ;;  %s2166_s7 = sld [smem:[#allocation2 + $0x66]]  ;;  %s2178_s8 = sld [smem:[#allocation2 + $0x67]] }
  0x67   :  { %v543_v63 = vadd.f32 %v1991_v4, %v538_v9  ;;  %v544_v1 = vadd.f32 %v1994_v5, %v539_v12  ;;  %v582_v19 = vadd.f32 %v580_v8, %v577_v56  ;;  %v594_v60 = vmul.f32 %v593_v53, %v1826_v36  ;;  %s2180_s9 = sld [smem:[#allocation2 + $0x68]] }
  0x68   :  { %v595_v30 = vmul.f32 %v593_v53, %v1828_v37  ;;  %v599_v61 = vmul.f32 %v598_v27, %v1838_v48  ;;  %v600_v22 = vmul.f32 %v598_v27, %v1846_v52  ;;  %v3009_v40 = vstv %s1950_s26  ;;  %s2116_s26 = sld [smem:[#allocation2 + $0x5d]] }
  0x69   :  { %v546_v4 = vadd.f32 %v3009_v40, %v543_v63  ;;  %v3010_v23 = vmov %v3009_v40  ;;  %v586_v5 = vadd.f32 %v584_v0, %v581_v18  ;;  %v587_v41 = vadd.f32 %v585_v57, %v582_v19 }
  0x6a   :  { %v547_v34 = vadd.f32 %v3010_v23, %v544_v1  ;;  %v604_v13 = vmul.f32 %v603_v26, %v1858_v6  ;;  %v605_v17 = vmul.f32 %v603_v26, %v1863_v11  ;;  %v609_v42 = vmul.f32 %v608_v62, %v1872_v15 }
  0x6b   :  { %v610_v43 = vmul.f32 %v608_v62, %v1874_v25  ;;  %v2066_v7 = vmax.f32 %v546_v4, 0.0  ;;  %v591_v32 = vadd.f32 %v589_v59, %v586_v5  ;;  %v592_v33 = vadd.f32 %v590_v55, %v587_v41  ;;  %v3011_v5 = vld [vmem:[#allocation5_spill] sm:$0xff] }
  0x6c   :  { %v2068_v8 = vmax.f32 %v547_v34, 0.0  ;;  %v613_v44 = vstv %s2028_s10  ;;  %v618_v45 = vstv %s2030_s11  ;;  %v623_v0 = vstv %s2032_s12  ;;  %s2184_s10 = sld [smem:[#allocation2 + $0x69]]  ;;  %s2186_s11 = sld [smem:[#allocation2 + $0x6a]] }
  0x6d   :  { %v628_v57 = vstv %s2034_s13  ;;  %v596_v9 = vadd.f32 %v594_v60, %v591_v32  ;;  %v597_v12 = vadd.f32 %v595_v30, %v592_v33  ;;  %v614_v51 = vmul.f32 %v613_v44, %v1888_v49  ;;  %v3012_v32 = vld [vmem:[#allocation6_spill] sm:$0xff]  ;;  %s2202_s12 = sld [smem:[#allocation2 + $0x6b]]  ;;  %s2204_s13 = sld [smem:[#allocation2 + $0x6c]] }
  0x6e   :  { %v615_v56 = vmul.f32 %v613_v44, %v1890_v50  ;;  %v619_v53 = vmul.f32 %v618_v45, %v1908_v2  ;;  %v620_v59 = vmul.f32 %v618_v45, %v1910_v3  ;;  %v624_v55 = vmul.f32 %v623_v0, %v1922_v28 }
  0x6f   :  { %v625_v27 = vmul.f32 %v623_v0, %v1924_v29  ;;  %v601_v26 = vadd.f32 %v599_v61, %v596_v9  ;;  %v602_v62 = vadd.f32 %v600_v22, %v597_v12  ;;  %v633_v63 = vstv %s2044_s14  ;;  %v3013_v0 = vld [vmem:[#allocation7_spill] sm:$0xff]  ;;  %s2206_s14 = sld [smem:[#allocation2 + $0x6d]] }
  0x70   :  { %v636_v1 = vstv %s2046_s15  ;;  %v634_v18 = vmul.f32 %v633_v63, %v1732_v20  ;;  %v635_v19 = vmul.f32 %v633_v63, %v1734_v21  ;;  %v641_v23 = vstv %s2054_s16  ;;  %s2208_s15 = sld [smem:[#allocation2 + $0x6e]]  ;;  %s2218_s16 = sld [smem:[#allocation2 + $0x6f]] }
  0x71   :  { %v637_v60 = vmul.f32 %v636_v1, %v1736_v24  ;;  %v638_v30 = vmul.f32 %v636_v1, %v1738_v14  ;;  %v606_v40 = vadd.f32 %v604_v13, %v601_v26  ;;  %v607_v4 = vadd.f32 %v605_v17, %v602_v62 }
  0x72   :  { %v646_v34 = vstv %s2056_s17  ;;  %v642_v41 = vmul.f32 %v641_v23, %v3011_v5  ;;  %v643_v33 = vmul.f32 %v641_v23, %v3012_v32  ;;  %v651_v26 = vstv %s2070_s18  ;;  %s2220_s17 = sld [smem:[#allocation2 + $0x73]]  ;;  %s2222_s18 = sld [smem:[#allocation2 + $0x74]] }
  0x73   :  { %v639_v61 = vadd.f32 %v637_v60, %v634_v18  ;;  %v640_v22 = vadd.f32 %v638_v30, %v635_v19  ;;  %v611_v44 = vadd.f32 %v609_v42, %v606_v40  ;;  %v612_v45 = vadd.f32 %v610_v43, %v607_v4  ;;  %v3014_v18 = vld [vmem:[#allocation8_spill] sm:$0xff] }
  0x74   :  { %v647_v9 = vmul.f32 %v646_v34, %v3013_v0  ;;  %v648_v13 = vmul.f32 %v646_v34, %v1752_v31  ;;  %v656_v62 = vstv %s2072_s1  ;;  %v652_v19 = vmul.f32 %v651_v26, %v3014_v18  ;;  %s2224_s1 = sld [smem:[#allocation2 + $0x75]] }
  0x75   :  { %v644_v17 = vadd.f32 %v642_v41, %v639_v61  ;;  %v645_v12 = vadd.f32 %v643_v33, %v640_v22  ;;  %v616_v63 = vadd.f32 %v614_v51, %v611_v44  ;;  %v617_v1 = vadd.f32 %v615_v56, %v612_v45 }
  0x76   :  { %v653_v42 = vmul.f32 %v651_v26, %v1758_v35  ;;  %v657_v30 = vmul.f32 %v656_v62, %v1761_v38  ;;  %v658_v40 = vmul.f32 %v656_v62, %v1763_v39  ;;  %v661_v51 = vstv %s2084_s19  ;;  %s2238_s19 = sld [smem:[#allocation2 + $0x76]] }
  0x77   :  { %v649_v43 = vadd.f32 %v647_v9, %v644_v17  ;;  %v650_v60 = vadd.f32 %v648_v13, %v645_v12  ;;  %v621_v4 = vadd.f32 %v619_v53, %v616_v63  ;;  %v622_v23 = vadd.f32 %v620_v59, %v617_v1 }
  0x78   :  { %v666_v56 = vstv %s2086_s20  ;;  %v662_v22 = vmul.f32 %v661_v51, %v1772_v46  ;;  %v663_v41 = vmul.f32 %v661_v51, %v1774_v47  ;;  %v671_v13 = vstv %s2096_s21  ;;  %s2240_s20 = sld [smem:[#allocation2 + $0x77]]  ;;  %s2250_s21 = sld [smem:[#allocation2 + $0x78]] }
  0x79   :  { %v654_v34 = vadd.f32 %v652_v19, %v649_v43  ;;  %v655_v61 = vadd.f32 %v653_v42, %v650_v60  ;;  %v626_v33 = vadd.f32 %v624_v55, %v621_v4  ;;  %v627_v44 = vadd.f32 %v625_v27, %v622_v23 }
  0x7a   :  { %v667_v53 = vmul.f32 %v666_v56, %v1784_v54  ;;  %v668_v59 = vmul.f32 %v666_v56, %v1792_v58  ;;  %v676_v17 = vstv %s2098_s22  ;;  %v672_v55 = vmul.f32 %v671_v13, %v1808_v10  ;;  %s2252_s22 = sld [smem:[#allocation2 + $0xb4]] }
  0x7b   :  { %v659_v45 = vadd.f32 %v657_v30, %v654_v34  ;;  %v660_v9 = vadd.f32 %v658_v40, %v655_v61  ;;  %v629_v12 = vadd.f32 %v628_v57, %v626_v33  ;;  %v630_v26 = vadd.f32 %v628_v57, %v627_v44 }
  0x7c   :  { %v673_v27 = vmul.f32 %v671_v13, %v1811_v16  ;;  %v677_v1 = vmul.f32 %v676_v17, %v1826_v36  ;;  %v678_v19 = vmul.f32 %v676_v17, %v1828_v37  ;;  %v681_v43 = vstv %s2106_s23  ;;  %s2260_s23 = sld [smem:[#allocation2 + $0x79]] }
  0x7d   :  { %v664_v62 = vadd.f32 %v662_v22, %v659_v45  ;;  %v665_v63 = vadd.f32 %v663_v41, %v660_v9  ;;  %v2150_v57 = vmax.f32 %v629_v12, 0.0  ;;  %v2152_v42 = vmax.f32 %v630_v26, 0.0 }
  0x7e   :  { %v686_v60 = vstv %s2108_s24  ;;  %v682_v4 = vmul.f32 %v681_v43, %v1838_v48  ;;  %v683_v23 = vmul.f32 %v681_v43, %v1846_v52  ;;  %v691_v34 = vstv %s2114_s25  ;;  %s2262_s24 = sld [smem:[#allocation2 + $0x7a]]  ;;  %s2270_s25 = sld [smem:[#allocation2 + $0x7b]] }
  0x7f   :  { %3015 = vst [vmem:[#allocation5_spill] sm:$0xff] %v2152_v42  ;;  %v669_v30 = vadd.f32 %v667_v53, %v664_v62  ;;  %v670_v40 = vadd.f32 %v668_v59, %v665_v63  ;;  %v687_v51 = vmul.f32 %v686_v60, %v1858_v6  ;;  %v688_v56 = vmul.f32 %v686_v60, %v1863_v11 }
  0x80   :  { %v696_v61 = vstv %s2116_s26  ;;  %v692_v33 = vmul.f32 %v691_v34, %v1872_v15  ;;  %v693_v44 = vmul.f32 %v691_v34, %v1874_v25  ;;  %v701_v45 = vstv %s2122_s27  ;;  %s2272_s26 = sld [smem:[#allocation2 + $0xb5]]  ;;  %s2276_s27 = sld [smem:[#allocation2 + $0x7c]] }
  0x81   :  { %v674_v22 = vadd.f32 %v672_v55, %v669_v30  ;;  %v675_v41 = vadd.f32 %v673_v27, %v670_v40  ;;  %v697_v53 = vmul.f32 %v696_v61, %v1888_v49  ;;  %v698_v59 = vmul.f32 %v696_v61, %v1890_v50 }
  0x82   :  { %v706_v9 = vstv %s2124_s28  ;;  %v702_v12 = vmul.f32 %v701_v45, %v1908_v2  ;;  %v703_v26 = vmul.f32 %v701_v45, %v1910_v3  ;;  %v716_v63 = vstv %s2130_s29  ;;  %s2278_s28 = sld [smem:[#allocation2 + $0x7d]]  ;;  %s2288_s29 = sld [smem:[#allocation2 + $0x7e]] }
  0x83   :  { %v679_v13 = vadd.f32 %v677_v1, %v674_v22  ;;  %v680_v17 = vadd.f32 %v678_v19, %v675_v41  ;;  %v707_v55 = vmul.f32 %v706_v9, %v1922_v28  ;;  %v708_v27 = vmul.f32 %v706_v9, %v1924_v29 }
  0x84   :  { %v717_v19 = vmul.f32 %v716_v63, %v1732_v20  ;;  %v718_v60 = vmul.f32 %v716_v63, %v1734_v21  ;;  %v719_v30 = vstv %s2140_s3  ;;  %v724_v40 = vstv %s2142_s4  ;;  %s2300_s3 = sld [smem:[#allocation2 + $0x80]]  ;;  %s2302_s4 = sld [smem:[#allocation2 + $0xb6]] }
  0x85   :  { %v684_v1 = vadd.f32 %v682_v4, %v679_v13  ;;  %v685_v43 = vadd.f32 %v683_v23, %v680_v17  ;;  %v729_v34 = vstv %s2146_s0  ;;  %v734_v61 = vstv %s2148_s5  ;;  %s2310_s0 = sld [smem:[#allocation2 + $0x81]]  ;;  %s2312_s5 = sld [smem:[#allocation2 + $0x82]] }
  0x86   :  { %v720_v45 = vmul.f32 %v719_v30, %v1736_v24  ;;  %v721_v4 = vmul.f32 %v719_v30, %v1738_v14  ;;  %v725_v20 = vmul.f32 %v724_v40, %v3011_v5  ;;  %v726_v21 = vmul.f32 %v724_v40, %v3012_v32 }
  0x87   :  { %v689_v22 = vadd.f32 %v687_v51, %v684_v1  ;;  %v690_v41 = vadd.f32 %v688_v56, %v685_v43  ;;  %v730_v23 = vmul.f32 %v729_v34, %v3013_v0  ;;  %v731_v9 = vmul.f32 %v729_v34, %v1752_v31 }
  0x88   :  { %v722_v63 = vadd.f32 %v720_v45, %v717_v19  ;;  %v723_v62 = vadd.f32 %v721_v4, %v718_v60  ;;  %v735_v42 = vmul.f32 %v734_v61, %v3014_v18  ;;  %v736_v51 = vmul.f32 %v734_v61, %v1758_v35 }
  0x89   :  { %v694_v13 = vadd.f32 %v692_v33, %v689_v22  ;;  %v695_v17 = vadd.f32 %v693_v44, %v690_v41  ;;  %v739_v56 = vstv %s2164_s6  ;;  %v744_v24 = vstv %s2166_s7  ;;  %s2332_s6 = sld [smem:[#allocation2 + $0x83]]  ;;  %s2336_s7 = sld [smem:[#allocation2 + $0xb7]] }
  0x8a   :  { %v727_v31 = vadd.f32 %v725_v20, %v722_v63  ;;  %v728_v32 = vadd.f32 %v726_v21, %v723_v62  ;;  %v740_v35 = vmul.f32 %v739_v56, %v1761_v38  ;;  %v741_v0 = vmul.f32 %v739_v56, %v1763_v39 }
  0x8b   :  { %v699_v14 = vadd.f32 %v697_v53, %v694_v13  ;;  %v700_v5 = vadd.f32 %v698_v59, %v695_v17  ;;  %v745_v18 = vmul.f32 %v744_v24, %v1772_v46  ;;  %v746_v33 = vmul.f32 %v744_v24, %v1774_v47 }
  0x8c   :  { %v732_v53 = vadd.f32 %v730_v23, %v727_v31  ;;  %v733_v43 = vadd.f32 %v731_v9, %v728_v32  ;;  %v749_v59 = vstv %s2178_s8  ;;  %v754_v19 = vstv %s2180_s9  ;;  %s2344_s8 = sld [smem:[#allocation2 + $0x84]]  ;;  %s2346_s9 = sld [smem:[#allocation2 + $0x85]] }
  0x8d   :  { %v704_v44 = vadd.f32 %v702_v12, %v699_v14  ;;  %v705_v1 = vadd.f32 %v703_v26, %v700_v5  ;;  %v759_v62 = vstv %s2184_s10  ;;  %v764_v60 = vstv %s2186_s11  ;;  %s2352_s10 = sld [smem:[#allocation2 + $0x86]]  ;;  %s2354_s11 = sld [smem:[#allocation2 + $0x87]] }
  0x8e   :  { %v737_v30 = vadd.f32 %v735_v42, %v732_v53  ;;  %v738_v46 = vadd.f32 %v736_v51, %v733_v43  ;;  %v750_v47 = vmul.f32 %v749_v59, %v1784_v54  ;;  %v751_v12 = vmul.f32 %v749_v59, %v1792_v58 }
  0x8f   :  { %v709_v38 = vadd.f32 %v707_v55, %v704_v44  ;;  %v710_v39 = vadd.f32 %v708_v27, %v705_v1  ;;  %v755_v26 = vmul.f32 %v754_v19, %v1808_v10  ;;  %v756_v40 = vmul.f32 %v754_v19, %v1811_v16 }
  0x90   :  { %v3016_v34 = vstv %s2132_s30  ;;  %v742_v27 = vadd.f32 %v740_v35, %v737_v30  ;;  %v743_v22 = vadd.f32 %v741_v0, %v738_v46  ;;  %v760_v41 = vmul.f32 %v759_v62, %v1826_v36  ;;  %s2290_s30 = sld [smem:[#allocation2 + $0x7f]] }
  0x91   :  { %v712_v61 = vadd.f32 %v3016_v34, %v709_v38  ;;  %v3017_v55 = vmov %v3016_v34  ;;  %v761_v54 = vmul.f32 %v759_v62, %v1828_v37  ;;  %v765_v58 = vmul.f32 %v764_v60, %v1838_v48 }
  0x92   :  { %v713_v42 = vadd.f32 %v3017_v55, %v710_v39  ;;  %v766_v10 = vmul.f32 %v764_v60, %v1846_v52  ;;  %v747_v4 = vadd.f32 %v745_v18, %v742_v27  ;;  %v748_v20 = vadd.f32 %v746_v33, %v743_v22  ;;  %v3018_v18 = vld [vmem:[#allocation5_spill] sm:$0xff] }
  0x93   :  { %v2242_v16 = vmax.f32 %v712_v61, 0.0  ;;  %v769_v21 = vstv %s2202_s12  ;;  %v774_v23 = vstv %s2204_s13  ;;  %v779_v9 = vstv %s2206_s14  ;;  %s2368_s12 = sld [smem:[#allocation2 + $0x88]]  ;;  %s2382_s13 = sld [smem:[#allocation2 + $0x89]] }
  0x94   :  { %v2244_v45 = vmax.f32 %v713_v42, 0.0  ;;  %v784_v36 = vstv %s2208_s15  ;;  %v752_v37 = vadd.f32 %v750_v47, %v747_v4  ;;  %v753_v48 = vadd.f32 %v751_v12, %v748_v20  ;;  %s2384_s14 = sld [smem:[#allocation2 + $0xb8]]  ;;  %s2391_s15 = sld [smem:[#allocation2 + $0x8a]] }
  0x95   :  { %v770_v52 = vmul.f32 %v769_v21, %v1858_v6  ;;  %v771_v13 = vmul.f32 %v769_v21, %v1863_v11  ;;  %v775_v17 = vmul.f32 %v774_v23, %v1872_v15  ;;  %v776_v63 = vmul.f32 %v774_v23, %v1874_v25 }
  0x96   :  { %v780_v51 = vmul.f32 %v779_v9, %v1888_v49  ;;  %v781_v56 = vmul.f32 %v779_v9, %v1890_v50  ;;  %v757_v24 = vadd.f32 %v755_v26, %v752_v37  ;;  %v758_v14 = vadd.f32 %v756_v40, %v753_v48 }
  0x97   :  { %v785_v5 = vmul.f32 %v784_v36, %v1908_v2  ;;  %v786_v6 = vmul.f32 %v784_v36, %v1910_v3  ;;  %v789_v31 = vstv %s2218_s16  ;;  %v794_v11 = vstv %s2220_s17  ;;  %s2401_s16 = sld [smem:[#allocation2 + $0x8b]]  ;;  %s2409_s17 = sld [smem:[#allocation2 + $0x8c]] }
  0x98   :  { %v799_v32 = vstv %s2222_s18  ;;  %v802_v15 = vstv %s2224_s1  ;;  %v762_v25 = vadd.f32 %v760_v41, %v757_v24  ;;  %v763_v49 = vadd.f32 %v761_v54, %v758_v14  ;;  %s2411_s18 = sld [smem:[#allocation2 + $0x8d]]  ;;  %s2423_s1 = sld [smem:[#allocation2 + $0xb9]] }
  0x99   :  { %v790_v50 = vmul.f32 %v789_v31, %v1922_v28  ;;  %v791_v35 = vmul.f32 %v789_v31, %v1924_v29  ;;  %v800_v2 = vmul.f32 %v799_v32, %v2066_v7  ;;  %v801_v3 = vmul.f32 %v799_v32, %v2068_v8 }
  0x9a   :  { %v803_v0 = vmul.f32 %v802_v15, %v2150_v57  ;;  %v804_v33 = vmul.f32 %v802_v15, %v3018_v18  ;;  %v767_v44 = vadd.f32 %v765_v58, %v762_v25  ;;  %v768_v1 = vadd.f32 %v766_v10, %v763_v49 }
  0x9b   :  { %v807_v53 = vstv %s2238_s19  ;;  %v812_v28 = vstv %s2240_s20  ;;  %v817_v38 = vstv %s2252_s22  ;;  %v822_v39 = vstv %s2250_s21  ;;  %s2427_s19 = sld [smem:[#allocation2 + $0x8e]]  ;;  %s2429_s20 = sld [smem:[#allocation2 + $0x8f]] }
  0x9c   :  { %v805_v43 = vadd.f32 %v803_v0, %v800_v2  ;;  %v806_v29 = vadd.f32 %v804_v33, %v801_v3  ;;  %v808_v59 = vmul.f32 %v807_v53, %v2242_v16  ;;  %v809_v19 = vmul.f32 %v807_v53, %v2244_v45  ;;  %s2441_s21 = sld [smem:[#allocation2 + $0x90]]  ;;  %s2445_s22 = sld [smem:[#allocation2 + $0xba]] }
  0x9d   :  { %v772_v62 = vadd.f32 %v770_v52, %v767_v44  ;;  %v773_v60 = vadd.f32 %v771_v13, %v768_v1  ;;  %v823_v47 = vmul.f32 %v822_v39, %v2066_v7  ;;  %v824_v12 = vmul.f32 %v822_v39, %v2068_v8 }
  0x9e   :  { %v2294_v30 = vadd.f32 %v808_v59, %v805_v43  ;;  %v2296_v46 = vadd.f32 %v809_v19, %v806_v29  ;;  %v825_v34 = vstv %s2260_s23  ;;  %v830_v61 = vstv %s2262_s24  ;;  %s2449_s23 = sld [smem:[#allocation2 + $0x91]]  ;;  %s2451_s24 = sld [smem:[#allocation2 + $0x92]] }
  0x9f   :  { %v777_v26 = vadd.f32 %v775_v17, %v772_v62  ;;  %v778_v40 = vadd.f32 %v776_v63, %v773_v60  ;;  %v826_v55 = vmul.f32 %v825_v34, %v2150_v57  ;;  %v827_v42 = vmul.f32 %v825_v34, %v3018_v18 }
  0xa0   :  { %v831_v27 = vmul.f32 %v830_v61, %v2242_v16  ;;  %v832_v22 = vmul.f32 %v830_v61, %v2244_v45  ;;  %v835_v58 = vstv %s2270_s25  ;;  %v840_v10 = vstv %s2272_s26  ;;  %s2461_s25 = sld [smem:[#allocation2 + $0x93]]  ;;  %s2467_s26 = sld [smem:[#allocation2 + $0x94]] }
  0xa1   :  { %v782_v41 = vadd.f32 %v780_v51, %v777_v26  ;;  %v783_v54 = vadd.f32 %v781_v56, %v778_v40  ;;  %v828_v4 = vadd.f32 %v826_v55, %v823_v47  ;;  %v829_v20 = vadd.f32 %v827_v42, %v824_v12 }
  0xa2   :  { %v845_v21 = vstv %s2276_s27  ;;  %v848_v23 = vstv %s2278_s28  ;;  %v853_v24 = vstv %s2288_s29  ;;  %v858_v14 = vstv %s2290_s30  ;;  %s2471_s27 = sld [smem:[#allocation2 + $0x95]]  ;;  %s2473_s28 = sld [smem:[#allocation2 + $0xbb]] }
  0xa3   :  { %v787_v9 = vadd.f32 %v785_v5, %v782_v41  ;;  %v788_v36 = vadd.f32 %v786_v6, %v783_v54  ;;  %v846_v37 = vmul.f32 %v845_v21, %v2066_v7  ;;  %v847_v48 = vmul.f32 %v845_v21, %v2068_v8  ;;  %s2482_s29 = sld [smem:[#allocation2 + $0x96]]  ;;  %s2484_s30 = sld [smem:[#allocation2 + $0x97]] }
  0xa4   :  { %v833_v52 = vadd.f32 %v831_v27, %v828_v4  ;;  %v834_v13 = vadd.f32 %v832_v22, %v829_v20  ;;  %v849_v17 = vmul.f32 %v848_v23, %v2150_v57  ;;  %v850_v63 = vmul.f32 %v848_v23, %v3018_v18 }
  0xa5   :  { %v792_v51 = vadd.f32 %v790_v50, %v787_v9  ;;  %v793_v56 = vadd.f32 %v791_v35, %v788_v36  ;;  %v854_v31 = vmul.f32 %v853_v24, %v2242_v16  ;;  %v855_v32 = vmul.f32 %v853_v24, %v2244_v45 }
  0xa6   :  { %v851_v5 = vadd.f32 %v849_v17, %v846_v37  ;;  %v852_v6 = vadd.f32 %v850_v63, %v847_v48  ;;  %v863_v49 = vstv %s2302_s4  ;;  %v868_v2 = vstv %s2300_s3  ;;  %s2495_s3 = sld [smem:[#allocation2 + $0x98]]  ;;  %s2501_s4 = sld [smem:[#allocation2 + $0x99]] }
  0xa7   :  { %v795_v15 = vadd.f32 %v794_v11, %v792_v51  ;;  %v796_v25 = vadd.f32 %v794_v11, %v793_v56  ;;  %v869_v3 = vmul.f32 %v868_v2, %v2066_v7  ;;  %v870_v0 = vmul.f32 %v868_v2, %v2068_v8 }
  0xa8   :  { %v856_v50 = vadd.f32 %v854_v31, %v851_v5  ;;  %v857_v35 = vadd.f32 %v855_v32, %v852_v6  ;;  %v871_v1 = vstv %s2310_s0  ;;  %v876_v11 = vstv %s2312_s5  ;;  %s2509_s0 = sld [smem:[#allocation2 + $0x9a]]  ;;  %s2511_s5 = sld [smem:[#allocation2 + $0xbc]] }
  0xa9   :  { %v2338_v33 = vmax.f32 %v795_v15, 0.0  ;;  %v2340_v44 = vmax.f32 %v796_v25, 0.0  ;;  %v872_v53 = vmul.f32 %v871_v1, %v2150_v57  ;;  %v873_v43 = vmul.f32 %v871_v1, %v3018_v18 }
  0xaa   :  { %v877_v29 = vmul.f32 %v876_v11, %v2242_v16  ;;  %v878_v59 = vmul.f32 %v876_v11, %v2244_v45  ;;  %v881_v21 = vstv %s2332_s6  ;;  %v886_v9 = vstv %s2336_s7  ;;  %s2519_s6 = sld [smem:[#allocation2 + $0x9b]]  ;;  %s2523_s7 = sld [smem:[#allocation2 + $0xbd]] }
  0xab   :  { %v813_v19 = vmul.f32 %v812_v28, %v2338_v33  ;;  %v814_v62 = vmul.f32 %v812_v28, %v2340_v44  ;;  %v836_v60 = vmul.f32 %v835_v58, %v2338_v33  ;;  %v837_v39 = vmul.f32 %v835_v58, %v2340_v44 }
  0xac   :  { %v859_v47 = vmul.f32 %v858_v14, %v2338_v33  ;;  %v860_v12 = vmul.f32 %v858_v14, %v2340_v44  ;;  %v874_v26 = vadd.f32 %v872_v53, %v869_v3  ;;  %v875_v40 = vadd.f32 %v873_v43, %v870_v0 }
  0xad   :  { %v815_v34 = vadd.f32 %v813_v19, %v2294_v30  ;;  %v816_v61 = vadd.f32 %v814_v62, %v2296_v46  ;;  %v838_v55 = vadd.f32 %v836_v60, %v833_v52  ;;  %v839_v42 = vadd.f32 %v837_v39, %v834_v13 }
  0xae   :  { %v861_v27 = vadd.f32 %v859_v47, %v856_v50  ;;  %v862_v28 = vadd.f32 %v860_v12, %v857_v35  ;;  %v879_v22 = vadd.f32 %v877_v29, %v874_v26  ;;  %v880_v20 = vadd.f32 %v878_v59, %v875_v40 }
  0xaf   :  { %v2372_v41 = vadd.f32 %v817_v38, %v815_v34  ;;  %v2376_v54 = vadd.f32 %v817_v38, %v816_v61  ;;  %v2378_v58 = vadd.f32 %v840_v10, %v838_v55  ;;  %v2380_v30 = vadd.f32 %v840_v10, %v839_v42 }
  0xb0   :  { %v2386_v46 = vadd.f32 %v863_v49, %v861_v27  ;;  %v2388_v4 = vadd.f32 %v863_v49, %v862_v28  ;;  %v882_v48 = vmul.f32 %v881_v21, %v2338_v33  ;;  %v883_v52 = vmul.f32 %v881_v21, %v2340_v44 }
  0xb1   :  { %v2999_v38 = vmax.f32 %v2372_v41, 0.0  ;;  %v2998_v10 = vmax.f32 %v2376_v54, 0.0  ;;  %v2997_v23 = vmax.f32 %v2378_v58, 0.0  ;;  %v2996_v36 = vmax.f32 %v2380_v30, 0.0 }
  0xb2   :  { %v2995_v37 = vmax.f32 %v2386_v46, 0.0  ;;  %v891_v13 = vstv %s2344_s8  ;;  %v894_v17 = vstv %s2346_s9  ;;  %v899_v63 = vstv %s2352_s10  ;;  %s2529_s8 = sld [smem:[#allocation2 + $0x9c]]  ;;  %s2531_s9 = sld [smem:[#allocation2 + $0x9d]] }
  0xb3   :  { %v904_v51 = vstv %s2354_s11  ;;  %v884_v56 = vadd.f32 %v882_v48, %v879_v22  ;;  %v885_v24 = vadd.f32 %v883_v52, %v880_v20  ;;  %v892_v14 = vmul.f32 %v891_v13, %v2066_v7  ;;  %s2543_s10 = sld [smem:[#allocation2 + $0x9e]]  ;;  %s2545_s11 = sld [smem:[#allocation2 + $0x9f]] }
  0xb4   :  { %v893_v5 = vmul.f32 %v891_v13, %v2068_v8  ;;  %v895_v6 = vmul.f32 %v894_v17, %v2150_v57  ;;  %v896_v31 = vmul.f32 %v894_v17, %v3018_v18  ;;  %v900_v32 = vmul.f32 %v899_v63, %v2242_v16 }
  0xb5   :  { %v901_v15 = vmul.f32 %v899_v63, %v2244_v45  ;;  %v2994_v25 = vmax.f32 %v2388_v4, 0.0  ;;  %v2418_v49 = vadd.f32 %v886_v9, %v884_v56  ;;  %v2420_v2 = vadd.f32 %v886_v9, %v885_v24 }
  0xb6   :  { %v905_v50 = vmul.f32 %v904_v51, %v2338_v33  ;;  %v897_v35 = vadd.f32 %v895_v6, %v892_v14  ;;  %v898_v3 = vadd.f32 %v896_v31, %v893_v5  ;;  %v906_v0 = vmul.f32 %v904_v51, %v2340_v44 }
  0xb7   :  { %v914_v1 = vstv %s2368_s12  ;;  %v2993_v11 = vmax.f32 %v2418_v49, 0.0  ;;  %v909_v53 = vstv %s2384_s14  ;;  %v917_v62 = vstv %s2382_s13  ;;  %s2555_s12 = sld [smem:[#allocation2 + $0xa0]]  ;;  %s2561_s13 = sld [smem:[#allocation2 + $0xbe]] }
  0xb8   :  { %v915_v43 = vmul.f32 %v914_v1, %v2066_v7  ;;  %v916_v29 = vmul.f32 %v914_v1, %v2068_v8  ;;  %v902_v59 = vadd.f32 %v900_v32, %v897_v35  ;;  %v903_v19 = vadd.f32 %v901_v15, %v898_v3  ;;  %s2566_s14 = sld [smem:[#allocation2 + $0xa1]] }
  0xb9   :  { %v922_v60 = vstv %s2391_s15  ;;  %v918_v39 = vmul.f32 %v917_v62, %v2150_v57  ;;  %v919_v47 = vmul.f32 %v917_v62, %v3018_v18  ;;  %v2992_v40 = vmax.f32 %v2420_v2, 0.0  ;;  %s2568_s15 = sld [smem:[#allocation2 + $0xa2]] }
  0xba   :  { %v923_v12 = vmul.f32 %v922_v60, %v2242_v16  ;;  %v924_v26 = vmul.f32 %v922_v60, %v2244_v45  ;;  %v907_v34 = vadd.f32 %v905_v50, %v902_v59  ;;  %v908_v61 = vadd.f32 %v906_v0, %v903_v19 }
  0xbb   :  { %v927_v55 = vstv %s2401_s16  ;;  %v920_v42 = vadd.f32 %v918_v39, %v915_v43  ;;  %v921_v27 = vadd.f32 %v919_v47, %v916_v29  ;;  %v937_v9 = vstv %s2409_s17  ;;  %s2577_s16 = sld [smem:[#allocation2 + $0xa3]]  ;;  %s2583_s17 = sld [smem:[#allocation2 + $0xa4]] }
  0xbc   :  { %v928_v28 = vmul.f32 %v927_v55, %v2338_v33  ;;  %v929_v22 = vmul.f32 %v927_v55, %v2340_v44  ;;  %v2453_v20 = vadd.f32 %v909_v53, %v907_v34  ;;  %v2455_v21 = vadd.f32 %v909_v53, %v908_v61 }
  0xbd   :  { %v940_v48 = vstv %s2411_s18  ;;  %v925_v52 = vadd.f32 %v923_v12, %v920_v42  ;;  %v926_v13 = vadd.f32 %v924_v26, %v921_v27  ;;  %v938_v17 = vmul.f32 %v937_v9, %v2066_v7  ;;  %s2587_s18 = sld [smem:[#allocation2 + $0xa5]] }
  0xbe   :  { %v939_v63 = vmul.f32 %v937_v9, %v2068_v8  ;;  %v2991_v51 = vmax.f32 %v2453_v20, 0.0  ;;  %v932_v56 = vstv %s2423_s1  ;;  %v941_v24 = vmul.f32 %v940_v48, %v2150_v57  ;;  %s2589_s1 = sld [smem:[#allocation2 + $0xbf]] }
  0xbf   :  { %v942_v14 = vmul.f32 %v940_v48, %v3018_v18  ;;  %v930_v5 = vadd.f32 %v928_v28, %v925_v52  ;;  %v931_v6 = vadd.f32 %v929_v22, %v926_v13  ;;  %v945_v31 = vstv %s2427_s19  ;;  %s2598_s19 = sld [smem:[#allocation2 + $0xa6]] }
  0xc0   :  { %v950_v32 = vstv %s2429_s20  ;;  %v943_v15 = vadd.f32 %v941_v24, %v938_v17  ;;  %v946_v35 = vmul.f32 %v945_v31, %v2242_v16  ;;  %v947_v3 = vmul.f32 %v945_v31, %v2244_v45  ;;  %s2600_s20 = sld [smem:[#allocation2 + $0xa7]] }
  0xc1   :  { %v944_v50 = vadd.f32 %v942_v14, %v939_v63  ;;  %v2478_v1 = vadd.f32 %v932_v56, %v930_v5  ;;  %v951_v53 = vmul.f32 %v950_v32, %v2338_v33  ;;  %v952_v43 = vmul.f32 %v950_v32, %v2340_v44 }
  0xc2   :  { %v2486_v29 = vadd.f32 %v932_v56, %v931_v6  ;;  %v948_v59 = vadd.f32 %v946_v35, %v943_v15  ;;  %v960_v62 = vstv %s2441_s21  ;;  %v955_v39 = vstv %s2445_s22  ;;  %s2611_s21 = sld [smem:[#allocation2 + $0xa8]]  ;;  %s2617_s22 = sld [smem:[#allocation2 + $0xa9]] }
  0xc3   :  { %v949_v19 = vadd.f32 %v947_v3, %v944_v50  ;;  %v961_v47 = vmul.f32 %v960_v62, %v2066_v7  ;;  %v962_v12 = vmul.f32 %v960_v62, %v2068_v8  ;;  %v963_v61 = vstv %s2449_s23  ;;  %s2625_s23 = sld [smem:[#allocation2 + $0xaa]] }
  0xc4   :  { %v953_v26 = vadd.f32 %v951_v53, %v948_v59  ;;  %v968_v55 = vstv %s2451_s24  ;;  %v964_v42 = vmul.f32 %v963_v61, %v2150_v57  ;;  %v965_v27 = vmul.f32 %v963_v61, %v3018_v18  ;;  %s2627_s24 = sld [smem:[#allocation2 + $0xc0]] }
  0xc5   :  { %v954_v34 = vadd.f32 %v952_v43, %v949_v19  ;;  %v969_v28 = vmul.f32 %v968_v55, %v2242_v16  ;;  %v970_v22 = vmul.f32 %v968_v55, %v2244_v45  ;;  %v973_v13 = vstv %s2461_s25  ;;  %s2635_s25 = sld [smem:[#allocation2 + $0xab]] }
  0xc6   :  { %v2504_v48 = vadd.f32 %v955_v39, %v953_v26  ;;  %v966_v17 = vadd.f32 %v964_v42, %v961_v47  ;;  %v967_v63 = vadd.f32 %v965_v27, %v962_v12  ;;  %v974_v56 = vmul.f32 %v973_v13, %v2338_v33 }
  0xc7   :  { %v2506_v52 = vadd.f32 %v955_v39, %v954_v34  ;;  %v975_v24 = vmul.f32 %v973_v13, %v2340_v44  ;;  %v978_v5 = vstv %s2473_s28  ;;  %v983_v6 = vstv %s2467_s26  ;;  %s2639_s26 = sld [smem:[#allocation2 + $0xc1]]  ;;  %s2647_s28 = sld [smem:[#allocation2 + $0xad]] }
  0xc8   :  { %v986_v31 = vstv %s2471_s27  ;;  %v971_v32 = vadd.f32 %v969_v28, %v966_v17  ;;  %v972_v15 = vadd.f32 %v970_v22, %v967_v63  ;;  %v984_v50 = vmul.f32 %v983_v6, %v2066_v7  ;;  %s2645_s27 = sld [smem:[#allocation2 + $0xac]] }
  0xc9   :  { %v985_v35 = vmul.f32 %v983_v6, %v2068_v8  ;;  %v987_v3 = vmul.f32 %v986_v31, %v2150_v57  ;;  %v988_v53 = vmul.f32 %v986_v31, %v3018_v18  ;;  %v991_v43 = vstv %s2482_s29  ;;  %s2659_s29 = sld [smem:[#allocation2 + $0xae]] }
  0xca   :  { %v996_v59 = vstv %s2484_s30  ;;  %v976_v19 = vadd.f32 %v974_v56, %v971_v32  ;;  %v977_v62 = vadd.f32 %v975_v24, %v972_v15  ;;  %v992_v39 = vmul.f32 %v991_v43, %v2242_v16  ;;  %s2661_s30 = sld [smem:[#allocation2 + $0xaf]] }
  0xcb   :  { %v993_v47 = vmul.f32 %v991_v43, %v2244_v45  ;;  %v989_v12 = vadd.f32 %v987_v3, %v984_v50  ;;  %v990_v26 = vadd.f32 %v988_v53, %v985_v35  ;;  %v997_v34 = vmul.f32 %v996_v59, %v2338_v33 }
  0xcc   :  { %v998_v61 = vmul.f32 %v996_v59, %v2340_v44  ;;  %v2538_v42 = vadd.f32 %v978_v5, %v976_v19  ;;  %v2540_v27 = vadd.f32 %v978_v5, %v977_v62  ;;  %v1006_v28 = vstv %s2495_s3  ;;  %s2671_s3 = sld [smem:[#allocation2 + $0xb0]] }
  0xcd   :  { %v994_v22 = vadd.f32 %v992_v39, %v989_v12  ;;  %v995_v13 = vadd.f32 %v993_v47, %v990_v26  ;;  %v1007_v17 = vmul.f32 %v1006_v28, %v2066_v7  ;;  %v1008_v63 = vmul.f32 %v1006_v28, %v2068_v8 }
  0xce   :  { %v1001_v24 = vstv %s2511_s5  ;;  %v1009_v6 = vstv %s2501_s4  ;;  %v1014_v31 = vstv %s2509_s0  ;;  %v1019_v43 = vstv %s2519_s6  ;;  %s2677_s4 = sld [smem:[#allocation2 + $0xc2]]  ;;  %s2682_s0 = sld [smem:[#allocation2 + $0xb1]] }
  0xcf   :  { %v999_v5 = vadd.f32 %v997_v34, %v994_v22  ;;  %v1000_v32 = vadd.f32 %v998_v61, %v995_v13  ;;  %v1010_v15 = vmul.f32 %v1009_v6, %v2150_v57  ;;  %v1011_v50 = vmul.f32 %v1009_v6, %v3018_v18  ;;  %s2684_s5 = sld [smem:[#allocation2 + $0xb2]]  ;;  %s2693_s6 = sld [smem:[#allocation2 + $0xb3]] }
  0xd0   :  { %v1015_v3 = vmul.f32 %v1014_v31, %v2242_v16  ;;  %v1016_v53 = vmul.f32 %v1014_v31, %v2244_v45  ;;  %v1024_v39 = vstv %s2523_s7  ;;  %v1020_v47 = vmul.f32 %v1019_v43, %v2338_v33  ;;  %s2699_s7 = sld [smem:[#allocation2 + $0xc3]] }
  0xd1   :  { %v2563_v59 = vadd.f32 %v1001_v24, %v999_v5  ;;  %v1012_v19 = vadd.f32 %v1010_v15, %v1007_v17  ;;  %v1013_v62 = vadd.f32 %v1011_v50, %v1008_v63  ;;  %v1021_v12 = vmul.f32 %v1019_v43, %v2340_v44 }
  0xd2   :  { %v1029_v26 = vstv %s2529_s8  ;;  %v1032_v34 = vstv %s2531_s9  ;;  %v2574_v61 = vadd.f32 %v1001_v24, %v1000_v32  ;;  %v1037_v24 = vstv %s2543_s10  ;;  %s2703_s8 = sld [smem:[#allocation2 + $0xc4]]  ;;  %s2705_s9 = sld [smem:[#allocation2 + $0xc5]] }
  0xd3   :  { %v1017_v22 = vadd.f32 %v1015_v3, %v1012_v19  ;;  %v1018_v13 = vadd.f32 %v1016_v53, %v1013_v62  ;;  %v1030_v17 = vmul.f32 %v1029_v26, %v2066_v7  ;;  %v1031_v63 = vmul.f32 %v1029_v26, %v2068_v8  ;;  %s2714_s10 = sld [smem:[#allocation2 + $0xc6]] }
  0xd4   :  { %v1033_v6 = vmul.f32 %v1032_v34, %v2150_v57  ;;  %v1034_v31 = vmul.f32 %v1032_v34, %v3018_v18  ;;  %v1042_v32 = vstv %s2545_s11  ;;  %v1038_v53 = vmul.f32 %v1037_v24, %v2242_v16  ;;  %s2716_s11 = sld [smem:[#allocation2 + $0xc7]] }
  0xd5   :  { %v1022_v5 = vadd.f32 %v1020_v47, %v1017_v22  ;;  %v1023_v15 = vadd.f32 %v1021_v12, %v1018_v13  ;;  %v1039_v43 = vmul.f32 %v1037_v24, %v2244_v45  ;;  %v1043_v47 = vmul.f32 %v1042_v32, %v2338_v33 }
  0xd6   :  { %v1035_v50 = vadd.f32 %v1033_v6, %v1030_v17  ;;  %v1036_v3 = vadd.f32 %v1034_v31, %v1031_v63  ;;  %v1044_v12 = vmul.f32 %v1042_v32, %v2340_v44  ;;  %v1052_v13 = vstv %s2555_s12  ;;  %s2727_s12 = sld [smem:[#allocation2 + $0xc8]] }
  0xd7   :  { %v2594_v62 = vadd.f32 %v1024_v39, %v1022_v5  ;;  %v2602_v26 = vadd.f32 %v1024_v39, %v1023_v15  ;;  %v1047_v63 = vstv %s2561_s13  ;;  %v1053_v6 = vmul.f32 %v1052_v13, %v2066_v7  ;;  %s2729_s13 = sld [smem:[#allocation2 + $0xc9]] }
  0xd8   :  { %v1040_v34 = vadd.f32 %v1038_v53, %v1035_v50  ;;  %v1041_v22 = vadd.f32 %v1039_v43, %v1036_v3  ;;  %v1054_v31 = vmul.f32 %v1052_v13, %v2068_v8  ;;  %v1055_v32 = vstv %s2566_s14  ;;  %s2743_s14 = sld [smem:[#allocation2 + $0xca]] }
  0xd9   :  { %v1060_v19 = vstv %s2568_s15  ;;  %v1056_v39 = vmul.f32 %v1055_v32, %v2150_v57  ;;  %v1057_v15 = vmul.f32 %v1055_v32, %v3018_v18  ;;  %v1070_v53 = vstv %s2589_s1  ;;  %s2745_s15 = sld [smem:[#allocation2 + $0xcb]]  ;;  %s2771_s1 = sld [smem:[#allocation2 + $0xcf]] }
  0xda   :  { %v1045_v5 = vadd.f32 %v1043_v47, %v1040_v34  ;;  %v1046_v24 = vadd.f32 %v1044_v12, %v1041_v22  ;;  %v1061_v50 = vmul.f32 %v1060_v19, %v2242_v16  ;;  %v1062_v3 = vmul.f32 %v1060_v19, %v2244_v45 }
  0xdb   :  { %v1065_v12 = vstv %s2577_s16  ;;  %v1058_v34 = vadd.f32 %v1056_v39, %v1053_v6  ;;  %v1059_v22 = vadd.f32 %v1057_v15, %v1054_v31  ;;  %v1078_v17 = vstv %s2587_s18  ;;  %s2755_s16 = sld [smem:[#allocation2 + $0xcc]]  ;;  %s2769_s18 = sld [smem:[#allocation2 + $0xce]] }
  0xdc   :  { %v2620_v43 = vadd.f32 %v1047_v63, %v1045_v5  ;;  %v2622_v47 = vadd.f32 %v1047_v63, %v1046_v24  ;;  %v1066_v13 = vmul.f32 %v1065_v12, %v2338_v33  ;;  %v1067_v19 = vmul.f32 %v1065_v12, %v2340_v44 }
  0xdd   :  { %v1075_v5 = vstv %s2583_s17  ;;  %v1063_v63 = vadd.f32 %v1061_v50, %v1058_v34  ;;  %v1064_v24 = vadd.f32 %v1062_v3, %v1059_v22  ;;  %v1079_v31 = vmul.f32 %v1078_v17, %v2150_v57  ;;  %s2757_s17 = sld [smem:[#allocation2 + $0xcd]] }
  0xde   :  { %v1076_v28 = vmul.f32 %v1075_v5, %v2066_v7  ;;  %v1077_v6 = vmul.f32 %v1075_v5, %v2068_v8  ;;  %v1080_v39 = vmul.f32 %v1078_v17, %v3018_v18  ;;  %v1083_v15 = vstv %s2598_s19  ;;  %s2783_s19 = sld [smem:[#allocation2 + $0xd0]] }
  0xdf   :  { %v1088_v12 = vstv %s2600_s20  ;;  %v1068_v32 = vadd.f32 %v1066_v13, %v1063_v63  ;;  %v1069_v50 = vadd.f32 %v1067_v19, %v1064_v24  ;;  %v1084_v3 = vmul.f32 %v1083_v15, %v2242_v16  ;;  %s2785_s20 = sld [smem:[#allocation2 + $0xd1]] }
  0xe0   :  { %v1085_v34 = vmul.f32 %v1083_v15, %v2244_v45  ;;  %v1081_v22 = vadd.f32 %v1079_v31, %v1076_v28  ;;  %v1082_v5 = vadd.f32 %v1080_v39, %v1077_v6  ;;  %v1089_v17 = vmul.f32 %v1088_v12, %v2338_v33 }
  0xe1   :  { %v1090_v35 = vmul.f32 %v1088_v12, %v2340_v44  ;;  %v2654_v55 = vadd.f32 %v1070_v53, %v1068_v32  ;;  %v2656_v14 = vadd.f32 %v1070_v53, %v1069_v50  ;;  %v1098_v13 = vstv %s2611_s21  ;;  %s2797_s21 = sld [smem:[#allocation2 + $0xd2]] }
  0xe2   :  { %v1086_v19 = vadd.f32 %v1084_v3, %v1081_v22  ;;  %v1087_v28 = vadd.f32 %v1085_v34, %v1082_v5  ;;  %v1099_v63 = vmul.f32 %v1098_v13, %v2066_v7  ;;  %v1100_v24 = vmul.f32 %v1098_v13, %v2068_v8 }
  0xe3   :  { %v1093_v31 = vstv %s2627_s24  ;;  %v1101_v32 = vstv %s2617_s22  ;;  %v1106_v39 = vstv %s2625_s23  ;;  %v1111_v5 = vstv %s2635_s25  ;;  %s2799_s22 = sld [smem:[#allocation2 + $0xd3]]  ;;  %s2810_s23 = sld [smem:[#allocation2 + $0xd4]] }
  0xe4   :  { %v1091_v53 = vadd.f32 %v1089_v17, %v1086_v19  ;;  %v1092_v15 = vadd.f32 %v1090_v35, %v1087_v28  ;;  %v1102_v12 = vmul.f32 %v1101_v32, %v2150_v57  ;;  %v1103_v50 = vmul.f32 %v1101_v32, %v3018_v18  ;;  %s2814_s24 = sld [smem:[#allocation2 + $0xd5]]  ;;  %s2816_s25 = sld [smem:[#allocation2 + $0xd6]] }
  0xe5   :  { %v1107_v34 = vmul.f32 %v1106_v39, %v2242_v16  ;;  %v1108_v22 = vmul.f32 %v1106_v39, %v2244_v45  ;;  %v1116_v19 = vstv %s2639_s26  ;;  %v1112_v28 = vmul.f32 %v1111_v5, %v2338_v33  ;;  %s2828_s26 = sld [smem:[#allocation2 + $0xd7]] }
  0xe6   :  { %v2679_v13 = vadd.f32 %v1093_v31, %v1091_v53  ;;  %v1104_v35 = vadd.f32 %v1102_v12, %v1099_v63  ;;  %v1105_v17 = vadd.f32 %v1103_v50, %v1100_v24  ;;  %v1113_v32 = vmul.f32 %v1111_v5, %v2340_v44 }
  0xe7   :  { %v1121_v3 = vstv %s2645_s27  ;;  %v1124_v39 = vstv %s2647_s28  ;;  %v2690_v6 = vadd.f32 %v1093_v31, %v1092_v15  ;;  %v1129_v31 = vstv %s2659_s29  ;;  %s2830_s27 = sld [smem:[#allocation2 + $0xd8]]  ;;  %s2850_s28 = sld [smem:[#allocation2 + $0xd9]] }
  0xe8   :  { %v1109_v56 = vadd.f32 %v1107_v34, %v1104_v35  ;;  %v1110_v63 = vadd.f32 %v1108_v22, %v1105_v17  ;;  %v1122_v24 = vmul.f32 %v1121_v3, %v2066_v7  ;;  %v1123_v12 = vmul.f32 %v1121_v3, %v2068_v8  ;;  %s2852_s29 = sld [smem:[#allocation2 + $0xda]] }
  0xe9   :  { %v1125_v50 = vmul.f32 %v1124_v39, %v2150_v57  ;;  %v1126_v9 = vmul.f32 %v1124_v39, %v3018_v18  ;;  %v1134_v15 = vstv %s2661_s30  ;;  %v1130_v3 = vmul.f32 %v1129_v31, %v2242_v16  ;;  %s2856_s30 = sld [smem:[#allocation2 + $0xdb]] }
  0xea   :  { %v1114_v5 = vadd.f32 %v1112_v28, %v1109_v56  ;;  %v1115_v60 = vadd.f32 %v1113_v32, %v1110_v63  ;;  %v1131_v35 = vmul.f32 %v1129_v31, %v2244_v45  ;;  %v1135_v56 = vmul.f32 %v1134_v15, %v2338_v33 }
  0xeb   :  { %v1127_v34 = vadd.f32 %v1125_v50, %v1122_v24  ;;  %v1128_v22 = vadd.f32 %v1126_v9, %v1123_v12  ;;  %v1136_v28 = vmul.f32 %v1134_v15, %v2340_v44  ;;  %v1144_v24 = vstv %s2671_s3  ;;  %s2858_s3 = sld [smem:[#allocation2 + $0xdc]] }
  0xec   :  { %v2710_v39 = vadd.f32 %v1116_v19, %v1114_v5  ;;  %v2718_v32 = vadd.f32 %v1116_v19, %v1115_v60  ;;  %v1139_v50 = vstv %s2677_s4  ;;  %v1145_v5 = vmul.f32 %v1144_v24, %v2066_v7  ;;  %s2887_s4 = sld [smem:[#allocation2 + $0xdd]] }
  0xed   :  { %v1132_v9 = vadd.f32 %v1130_v3, %v1127_v34  ;;  %v1133_v63 = vadd.f32 %v1131_v35, %v1128_v22  ;;  %v1146_v31 = vmul.f32 %v1144_v24, %v2068_v8  ;;  %v1147_v15 = vstv %s2682_s0  ;;  %s2889_s0 = sld [smem:[#allocation2 + $0xe4]] }
  0xee   :  { %v3002_v12 = vmax.f32 %v2710_v39, 0.0  ;;  %v1152_v0 = vstv %s2684_s5  ;;  %v1148_v60 = vmul.f32 %v1147_v15, %v2150_v57  ;;  %v1149_v19 = vmul.f32 %v1147_v15, %v3018_v18  ;;  %s2899_s5 = sld [smem:[#allocation2 + $0xde]] }
  0xef   :  { %v1137_v17 = vadd.f32 %v1135_v56, %v1132_v9  ;;  %v1138_v53 = vadd.f32 %v1136_v28, %v1133_v63  ;;  %v1153_v34 = vmul.f32 %v1152_v0, %v2242_v16  ;;  %v1154_v7 = vmul.f32 %v1152_v0, %v2244_v45 }
  0xf0   :  { %v3001_v8 = vmax.f32 %v2718_v32, 0.0  ;;  %v1157_v35 = vstv %s2693_s6  ;;  %v1150_v56 = vadd.f32 %v1148_v60, %v1145_v5  ;;  %v1151_v28 = vadd.f32 %v1149_v19, %v1146_v31  ;;  %s2905_s6 = sld [smem:[#allocation2 + $0xdf]] }
  0xf1   :  { %v2736_v22 = vadd.f32 %v1139_v50, %v1137_v17  ;;  %v2738_v3 = vadd.f32 %v1139_v50, %v1138_v53  ;;  %v1158_v9 = vmul.f32 %v1157_v35, %v2338_v33  ;;  %v1159_v57 = vmul.f32 %v1157_v35, %v2340_v44 }
  0xf2   :  { %v1162_v45 = vstv %s2699_s7  ;;  %v1167_v18 = vstv %s2703_s8  ;;  %v1170_v0 = vstv %s2705_s9  ;;  %v1155_v53 = vadd.f32 %v1153_v34, %v1150_v56  ;;  %s2915_s7 = sld [smem:[#allocation2 + $0xe0]]  ;;  %s2921_s8 = sld [smem:[#allocation2 + $0xe1]] }
  0xf3   :  { %v3000_v16 = vmax.f32 %v2736_v22, 0.0  ;;  %v1156_v17 = vadd.f32 %v1154_v7, %v1151_v28  ;;  %v1168_v63 = vmul.f32 %v1167_v18, %v2999_v38  ;;  %v1169_v33 = vmul.f32 %v1167_v18, %v2998_v10  ;;  %s2929_s9 = sld [smem:[#allocation2 + $0xe2]] }
  0xf4   :  { %v1171_v44 = vmul.f32 %v1170_v0, %v2997_v23  ;;  %v1172_v24 = vmul.f32 %v1170_v0, %v2996_v36  ;;  %v1175_v50 = vstv %s2714_s10  ;;  %v1180_v5 = vstv %s2716_s11  ;;  %s2936_s10 = sld [smem:[#allocation2 + $0xe3]] }
  0xf5   :  { %v1160_v31 = vadd.f32 %v1158_v9, %v1155_v53  ;;  %v1161_v15 = vadd.f32 %v1159_v57, %v1156_v17  ;;  %v1176_v60 = vmul.f32 %v1175_v50, %v2995_v37  ;;  %v1177_v19 = vmul.f32 %v1175_v50, %v2994_v25 }
  0xf6   :  { %v1173_v34 = vadd.f32 %v1171_v44, %v1168_v63  ;;  %v1174_v7 = vadd.f32 %v1172_v24, %v1169_v33  ;;  %v1181_v35 = vmul.f32 %v1180_v5, %v2993_v11  ;;  %v1182_v56 = vmul.f32 %v1180_v5, %v2992_v40 }
  0xf7   :  { %v2777_v28 = vadd.f32 %v1162_v45, %v1160_v31  ;;  %v2779_v9 = vadd.f32 %v1162_v45, %v1161_v15  ;;  %v1185_v57 = vstv %s2727_s12  ;;  %v1190_v18 = vstv %s2729_s13 }
  0xf8   :  { %v1178_v0 = vadd.f32 %v1176_v60, %v1173_v34  ;;  %v1179_v53 = vadd.f32 %v1177_v19, %v1174_v7  ;;  %v1186_v17 = vmul.f32 %v1185_v57, %v2991_v51  ;;  %v3020_v63 = vmax.f32 %v2455_v21, 0.0 }
  0xf9   :  { %3019 = vst [vmem:[#allocation6_spill] sm:$0xff] %v2777_v28  ;;  %v3003_v44 = vmax.f32 %v2738_v3, 0.0  ;;  %v3021_v24 = vmax.f32 %v2478_v1, 0.0  ;;  %v3022_v5 = vmax.f32 %v2486_v29, 0.0  ;;  %v1195_v19 = vstv %s2743_s14 }
  0xfa   :  { %v1187_v33 = vmul.f32 %v1185_v57, %v3020_v63  ;;  %v1183_v15 = vadd.f32 %v1181_v35, %v1178_v0  ;;  %v1184_v60 = vadd.f32 %v1182_v56, %v1179_v53  ;;  %v1200_v34 = vstv %s2745_s15  ;;  %s1567_s15 = sld [smem:[#allocation2 + $0xe5]] }
  0xfb   :  { %v1191_v50 = vmul.f32 %v1190_v18, %v3021_v24  ;;  %v1192_v31 = vmul.f32 %v1190_v18, %v3022_v5  ;;  %v3023_v57 = vmax.f32 %v2504_v48, 0.0  ;;  %v3024_v51 = vmax.f32 %v2506_v52, 0.0 }
  0xfc   :  { %v3025_v40 = vmax.f32 %v2538_v42, 0.0  ;;  %v1188_v5 = vadd.f32 %v1186_v17, %v1183_v15  ;;  %v1189_v35 = vadd.f32 %v1187_v33, %v1184_v60  ;;  %v1205_v56 = vstv %s2755_s16 }
  0xfd   :  { %v1196_v63 = vmul.f32 %v1195_v19, %v3023_v57  ;;  %v1197_v24 = vmul.f32 %v1195_v19, %v3024_v51  ;;  %v1210_v0 = vstv %s2757_s17  ;;  %v3026_v53 = vmax.f32 %v2540_v27, 0.0 }
  0xfe   :  { %v1201_v18 = vmul.f32 %v1200_v34, %v3025_v40  ;;  %v3027_v11 = vmax.f32 %v2563_v59, 0.0  ;;  %v3028_v19 = vmax.f32 %v2574_v61, 0.0  ;;  %v3029_v17 = vmax.f32 %v2594_v62, 0.0 }
  0xff   :  { %v1202_v57 = vmul.f32 %v1200_v34, %v3026_v53  ;;  %v1193_v15 = vadd.f32 %v1191_v50, %v1188_v5  ;;  %v1194_v60 = vadd.f32 %v1192_v31, %v1189_v35  ;;  %v1215_v25 = vstv %s2769_s18 }
 0x100   :  { %v1206_v51 = vmul.f32 %v1205_v56, %v3027_v11  ;;  %v1207_v40 = vmul.f32 %v1205_v56, %v3028_v19  ;;  %v1211_v33 = vmul.f32 %v1210_v0, %v3029_v17  ;;  %v1220_v37 = vstv %s2771_s1 }
 0x101   :  { %v3030_v34 = vmax.f32 %v2602_v26, 0.0  ;;  %v3031_v11 = vmax.f32 %v2620_v43, 0.0  ;;  %v3032_v56 = vmax.f32 %v2622_v47, 0.0  ;;  %v3033_v50 = vmax.f32 %v2654_v55, 0.0 }
 0x102   :  { %v1198_v5 = vadd.f32 %v1196_v63, %v1193_v15  ;;  %v1199_v35 = vadd.f32 %v1197_v24, %v1194_v60  ;;  %v1225_v17 = vstv %s2783_s19  ;;  %v1230_v23 = vstv %s2785_s20 }
 0x103   :  { %v1212_v53 = vmul.f32 %v1210_v0, %v3030_v34  ;;  %v1216_v36 = vmul.f32 %v1215_v25, %v3031_v11  ;;  %v1217_v19 = vmul.f32 %v1215_v25, %v3032_v56  ;;  %v1221_v31 = vmul.f32 %v1220_v37, %v3033_v50 }
 0x104   :  { %v3034_v10 = vmax.f32 %v2656_v14, 0.0  ;;  %v3035_v0 = vmax.f32 %v2679_v13, 0.0  ;;  %v3036_v7 = vmax.f32 %v2690_v6, 0.0  ;;  %v1231_v45 = vmul.f32 %v1230_v23, %v3002_v12 }
 0x105   :  { %v1203_v25 = vadd.f32 %v1201_v18, %v1198_v5  ;;  %v1204_v63 = vadd.f32 %v1202_v57, %v1199_v35  ;;  %v1235_v24 = vstv %s2797_s21  ;;  %v3037_v18 = vmax.f32 %v2777_v28, 0.0 }
 0x106   :  { %v1222_v38 = vmul.f32 %v1220_v37, %v3034_v10  ;;  %v1226_v34 = vmul.f32 %v1225_v17, %v3035_v0  ;;  %v1227_v11 = vmul.f32 %v1225_v17, %v3036_v7  ;;  %v1240_v10 = vstv %s2799_s22 }
 0x107   :  { %v1232_v37 = vmul.f32 %v1230_v23, %v3001_v8  ;;  %v1236_v7 = vmul.f32 %v1235_v24, %v3000_v16  ;;  %v1237_v15 = vmul.f32 %v1235_v24, %v3003_v44  ;;  %v1241_v57 = vmul.f32 %v1240_v10, %v3037_v18 }
 0x108   :  { %v1208_v60 = vadd.f32 %v1206_v51, %v1203_v25  ;;  %v1209_v56 = vadd.f32 %v1207_v40, %v1204_v63  ;;  %v3038_v50 = vmax.f32 %v2779_v9, 0.0  ;;  %v1248_v35 = vstv %s2810_s23 }
 0x109   :  { %v3039_v17 = vmax.f32 %v2372_v41, 0.0  ;;  %v3040_v0 = vmax.f32 %v2376_v54, 0.0  ;;  %v1251_v8 = vstv %s2814_s24  ;;  %v1256_v12 = vstv %s2816_s25 }
 0x10a   :  { %v1242_v5 = vmul.f32 %v1240_v10, %v3038_v50  ;;  %v1213_v24 = vadd.f32 %v1211_v33, %v1208_v60  ;;  %v1214_v44 = vadd.f32 %v1212_v53, %v1209_v56  ;;  %v3041_v28 = vmax.f32 %v2378_v58, 0.0 }
 0x10b   :  { %v1249_v23 = vmul.f32 %v1248_v35, %v3039_v17  ;;  %v1250_v16 = vmul.f32 %v1248_v35, %v3040_v0  ;;  %v3042_v51 = vmax.f32 %v2380_v30, 0.0  ;;  %v3043_v25 = vmax.f32 %v2386_v46, 0.0 }
 0x10c   :  { %v1252_v18 = vmul.f32 %v1251_v8, %v3041_v28  ;;  %v3044_v10 = vmax.f32 %v2388_v4, 0.0  ;;  %v1261_v50 = vstv %s2828_s26  ;;  %v1266_v17 = vstv %s2830_s27 }
 0x10d   :  { %v1253_v40 = vmul.f32 %v1251_v8, %v3042_v51  ;;  %v1257_v63 = vmul.f32 %v1256_v12, %v3043_v25  ;;  %v1218_v54 = vadd.f32 %v1216_v36, %v1213_v24  ;;  %v1219_v35 = vadd.f32 %v1217_v19, %v1214_v44 }
 0x10e   :  { %v1258_v41 = vmul.f32 %v1256_v12, %v3044_v10  ;;  %v1254_v33 = vadd.f32 %v1252_v18, %v1249_v23  ;;  %v3045_v30 = vmax.f32 %v2418_v49, 0.0  ;;  %v3046_v4 = vmax.f32 %v2420_v2, 0.0 }
 0x10f   :  { %v1255_v58 = vadd.f32 %v1253_v40, %v1250_v16  ;;  %v3047_v8 = vmax.f32 %v2453_v20, 0.0  ;;  %v3048_v36 = vmax.f32 %v2455_v21, 0.0  ;;  %v1223_v53 = vadd.f32 %v1221_v31, %v1218_v54 }
 0x110   :  { %v1262_v46 = vmul.f32 %v1261_v50, %v3045_v30  ;;  %v1263_v12 = vmul.f32 %v1261_v50, %v3046_v4  ;;  %v1224_v19 = vadd.f32 %v1222_v38, %v1219_v35  ;;  %v1259_v60 = vadd.f32 %v1257_v63, %v1254_v33 }
 0x111   :  { %v1267_v28 = vmul.f32 %v1266_v17, %v3047_v8  ;;  %v1268_v44 = vmul.f32 %v1266_v17, %v3048_v36  ;;  %v1260_v16 = vadd.f32 %v1258_v41, %v1255_v58  ;;  %v1271_v56 = vstv %s2850_s28 }
 0x112   :  { %v1276_v23 = vstv %s2852_s29  ;;  %v1281_v0 = vstv %s2856_s30  ;;  %v1286_v49 = vstv %s2858_s3  ;;  %v1228_v24 = vadd.f32 %v1226_v34, %v1223_v53 }
 0x113   :  { %v1229_v18 = vadd.f32 %v1227_v11, %v1224_v19  ;;  %v1264_v2 = vadd.f32 %v1262_v46, %v1259_v60  ;;  %v1265_v51 = vadd.f32 %v1263_v12, %v1260_v16  ;;  %v3049_v20 = vmax.f32 %v2478_v1, 0.0 }
 0x114   :  { %v3050_v31 = vmax.f32 %v2486_v29, 0.0  ;;  %v3051_v40 = vmax.f32 %v2504_v48, 0.0  ;;  %v3052_v63 = vmax.f32 %v2506_v52, 0.0  ;;  %v1233_v34 = vadd.f32 %v1231_v45, %v1228_v24 }
 0x115   :  { %v1272_v21 = vmul.f32 %v1271_v56, %v3049_v20  ;;  %v1234_v11 = vadd.f32 %v1232_v37, %v1229_v18  ;;  %v1269_v41 = vadd.f32 %v1267_v28, %v1264_v2  ;;  %v1270_v50 = vadd.f32 %v1268_v44, %v1265_v51 }
 0x116   :  { %v1273_v38 = vmul.f32 %v1271_v56, %v3050_v31  ;;  %v1277_v25 = vmul.f32 %v1276_v23, %v3051_v40  ;;  %v1278_v10 = vmul.f32 %v1276_v23, %v3052_v63  ;;  %v3053_v1 = vmax.f32 %v2538_v42, 0.0 }
 0x117   :  { %v3054_v29 = vmax.f32 %v2540_v27, 0.0  ;;  %v1238_v35 = vadd.f32 %v1236_v7, %v1233_v34  ;;  %v1239_v48 = vadd.f32 %v1237_v15, %v1234_v11  ;;  %v1274_v33 = vadd.f32 %v1272_v21, %v1269_v41 }
 0x118   :  { %v1282_v17 = vmul.f32 %v1281_v0, %v3053_v1  ;;  %v1275_v58 = vadd.f32 %v1273_v38, %v1270_v50  ;;  %v1245_v52 = vstv %s2889_s0  ;;  %v3055_v45 = vmax.f32 %v2563_v59, 0.0 }
 0x119   :  { %v1283_v54 = vmul.f32 %v1281_v0, %v3054_v29  ;;  %v3056_v30 = vmax.f32 %v2574_v61, 0.0  ;;  %v1291_v42 = vstv %s2887_s4  ;;  %v1243_v4 = vadd.f32 %v1241_v57, %v1238_v35 }
 0x11a   :  { %v1287_v37 = vmul.f32 %v1286_v49, %v3055_v45  ;;  %v1244_v12 = vadd.f32 %v1242_v5, %v1239_v48  ;;  %v1279_v27 = vadd.f32 %v1277_v25, %v1274_v33  ;;  %v1280_v8 = vadd.f32 %v1278_v10, %v1275_v58  ;;  %v3069_v48 = vld [vmem:[#allocation6_spill] sm:$0xff] }
 0x11b   :  { %v1288_v46 = vmul.f32 %v1286_v49, %v3056_v30  ;;  %v3057_v7 = vmax.f32 %v2594_v62, 0.0  ;;  %v3058_v28 = vmax.f32 %v2602_v26, 0.0  ;;  %v1296_v59 = vstv %s2899_s5 }
 0x11c   :  { %v1246_v44 = vadd.f32 %v1245_v52, %v1243_v4  ;;  %v1247_v53 = vadd.f32 %v1245_v52, %v1244_v12  ;;  %v1284_v61 = vadd.f32 %v1282_v17, %v1279_v27  ;;  %v1285_v19 = vadd.f32 %v1283_v54, %v1280_v8 }
 0x11d   :  { %v1292_v15 = vmul.f32 %v1291_v42, %v3057_v7  ;;  %v1293_v36 = vmul.f32 %v1291_v42, %v3058_v28  ;;  %v1301_v57 = vstv %s2905_s6  ;;  %v3059_v16 = vmax.f32 %v2620_v43, 0.0 }
 0x11e   :  { %v1289_v5 = vadd.f32 %v1287_v37, %v1284_v61  ;;  %v1290_v60 = vadd.f32 %v1288_v46, %v1285_v19  ;;  %v3060_v56 = vmax.f32 %v2622_v47, 0.0  ;;  %1329 = vst [vmem:[%s2981_s2] sm:$0xff] %v1246_v44  ;;  %1330 = vst [vmem:[%s2981_s2 + $0x8] sm:$0xff] %v1247_v53  ;;  %v1306_v26 = vstv %s2915_s7 }
 0x11f   :  { %v1297_v62 = vmul.f32 %v1296_v59, %v3059_v16  ;;  %v3061_v24 = vmax.f32 %v2654_v55, 0.0  ;;  %v3062_v18 = vmax.f32 %v2656_v14, 0.0  ;;  %v1311_v47 = vstv %s2921_s8 }
 0x120   :  { %v1298_v23 = vmul.f32 %v1296_v59, %v3060_v56  ;;  %v1294_v0 = vadd.f32 %v1292_v15, %v1289_v5  ;;  %v1295_v49 = vadd.f32 %v1293_v36, %v1290_v60  ;;  %v3063_v21 = vmax.f32 %v2679_v13, 0.0 }
 0x121   :  { %v1302_v43 = vmul.f32 %v1301_v57, %v3061_v24  ;;  %v1303_v2 = vmul.f32 %v1301_v57, %v3062_v18  ;;  %v3064_v38 = vmax.f32 %v2690_v6, 0.0  ;;  %v1316_v25 = vstv %s2929_s9 }
 0x122   :  { %v1299_v51 = vadd.f32 %v1297_v62, %v1294_v0  ;;  %v1300_v20 = vadd.f32 %v1298_v23, %v1295_v49  ;;  %v1307_v31 = vmul.f32 %v1306_v26, %v3063_v21  ;;  %v3065_v34 = vmax.f32 %v2710_v39, 0.0 }
 0x123   :  { %v1308_v40 = vmul.f32 %v1306_v26, %v3064_v38  ;;  %v3066_v11 = vmax.f32 %v2718_v32, 0.0  ;;  %v1321_v41 = vstv %s2936_s10  ;;  %v3067_v17 = vmax.f32 %v2736_v22, 0.0 }
 0x124   :  { %v1304_v63 = vadd.f32 %v1302_v43, %v1299_v51  ;;  %v1305_v10 = vadd.f32 %v1303_v2, %v1300_v20  ;;  %v1312_v55 = vmul.f32 %v1311_v47, %v3065_v34  ;;  %v3068_v29 = vmax.f32 %v2738_v3, 0.0 }
 0x125   :  { %v1313_v14 = vmul.f32 %v1311_v47, %v3066_v11  ;;  %v1317_v13 = vmul.f32 %v1316_v25, %v3067_v17  ;;  %v3070_v33 = vmax.f32 %v3069_v48, 0.0  ;;  %v3071_v39 = vmax.f32 %v2779_v9, 0.0 }
 0x126   :  { %v1309_v50 = vadd.f32 %v1307_v31, %v1304_v63  ;;  %v1310_v1 = vadd.f32 %v1308_v40, %v1305_v10  ;;  %v1318_v6 = vmul.f32 %v1316_v25, %v3068_v29  ;;  %v1326_v37 = vstv %s1567_s15 }
 0x127   :  { %v1322_v58 = vmul.f32 %v1321_v41, %v3070_v33  ;;  %v1323_v52 = vmul.f32 %v1321_v41, %v3071_v39 }
 0x128   :  { %v1314_v54 = vadd.f32 %v1312_v55, %v1309_v50  ;;  %v1315_v35 = vadd.f32 %v1313_v14, %v1310_v1 }
 0x12a   :  { %v1319_v45 = vadd.f32 %v1317_v13, %v1314_v54  ;;  %v1320_v32 = vadd.f32 %v1318_v6, %v1315_v35 }
 0x12c   :  { %v1324_v30 = vadd.f32 %v1322_v58, %v1319_v45  ;;  %v1325_v46 = vadd.f32 %v1323_v52, %v1320_v32 }
 0x12e   :  { %v1327_v42 = vadd.f32 %v1326_v37, %v1324_v30  ;;  %v1328_v4 = vadd.f32 %v1326_v37, %v1325_v46 }
 0x130   :  { %1570 = vst [vmem:[%s2981_s2 + $0x10] sm:$0xff] %v1327_v42  ;;  %1571 = vst [vmem:[%s2981_s2 + $0x18] sm:$0xff] %v1328_v4 }
 0x131   :  { %1338 = vsyncpa [#allocation3], 1 }

</bundles_post_ra>
